<compile_context>
chip_gen: v7x
topology: tpu7x:2x2x1
jax: 0.10.0
libtpu: 0.0.40
codegen_flags: <defaults>
</compile_context>

<pallas_src>
import functools

import jax
import jax.numpy as jnp
from jax.experimental import pallas as pl
from jax.experimental.pallas import tpu as pltpu

# Sizes implied by FullModel's default config:
#   resnet-18 hidden_sizes[-1] = 512, bert-tiny hidden_size = 128,
#   projection_dim = 512, out_classes = 3.
CNN_OUT = 512
BERT_OUT = 128
PROJ_DIM = 512
N_CLASSES = 3
OUT_PAD = 128       # lane-dense padded logits width
VOCAB = 100


def _fused_forward_kernel(img_ref, cls_ref,
                          wct_ref, bc_ref,
                          wp_ref, bp_ref,
                          w1i_ref, w1t_ref, b1_ref,
                          w2_ref, b2_ref,
                          out_ref,
                          acc_ref,
                          *, tile_b: int, inference: bool, inv_hw: float):
    h = pl.program_id(1)

    @pl.when(h == 0)
    def _init():
        acc_ref[...] = jnp.zeros_like(acc_ref)

    # ---- ResNet surrogate: 1x1 conv on the MXU over the NCHW-native tile,
    #      then bias + ReLU (VPU) and running spatial sum (XLU) into the
    #      resident (TILE_B, CNN_OUT) f32 accumulator. ----
    wct = wct_ref[...]                       # (CNN_OUT, C_in)   bf16
    bc = bc_ref[...]                         # (CNN_OUT, 1)      f32
    for b in range(tile_b):                  # tile_b <= 8, unrolled
        xb = img_ref[b]                      # (C_in, TILE_HW)   bf16
        fb = jnp.dot(wct, xb, preferred_element_type=jnp.float32)  # (CNN_OUT, TILE_HW)
        fb = jnp.maximum(fb + bc, 0.0)       # bias + ReLU
        acc_ref[b, :] += jnp.sum(fb, axis=1)  # spatial partial sum

    # ---- Finalize once, on the last spatial step. ----
    @pl.when(h == pl.num_programs(1) - 1)
    def _finalize():
        x_img = acc_ref[...] * inv_hw        # global average pool (mean)

        # BERT pooler surrogate: tanh(CLS @ Wp + bp)   (MXU bf16, f32 acc)
        cls = cls_ref[...][:, 0, :]          # (TILE_B, BERT_OUT) bf16
        x_text = jnp.tanh(
            jnp.dot(cls, wp_ref[...],
                    preferred_element_type=jnp.float32) + bp_ref[...])

        # Classifier head; torch.cat([x_img, x_text]) eliminated via pre-split w1.
        hdn = (jnp.dot(x_img.astype(jnp.bfloat16), w1i_ref[...],
                       preferred_element_type=jnp.float32)
               + jnp.dot(x_text.astype(jnp.bfloat16), w1t_ref[...],
                         preferred_element_type=jnp.float32)
               + b1_ref[...])
        hdn = jnp.maximum(hdn, 0.0)          # ReLU

        # Lane-dense (TILE_B, 128) logits; padded classes carry bias = -1e30.
        logits = jnp.dot(hdn.astype(jnp.bfloat16), w2_ref[...],
                         preferred_element_type=jnp.float32) + b2_ref[...]

        if inference:                        # torch.softmax(x, -1)
            m = jnp.max(logits, axis=-1, keepdims=True)
            e = jnp.exp(logits - m)          # padded lanes underflow to 0
            logits = e / jnp.sum(e, axis=-1, keepdims=True)

        out_ref[:, 0, :] = logits.astype(out_ref.dtype)


def init_params(seed: int = 0, c_in: int = 3):
    """Deterministic nn.Linear-style (uniform +-1/sqrt(fan_in)) surrogate init."""
    keys = jax.random.split(jax.random.PRNGKey(seed), 8)

    def lin(k, fan_in, fan_out):
        bound = float(fan_in) ** -0.5
        return jax.random.uniform(k, (fan_in, fan_out), jnp.float32, -bound, bound)

    params = {}
    params['emb'] = jax.random.normal(keys[0], (VOCAB, BERT_OUT), jnp.float32) * 0.02

    # Pointwise-conv weight stored transposed (CNN_OUT, C_in) so the in-kernel
    # MXU matmul is dot((CNN_OUT,C_in), (C_in,TILE_HW)) on the NCHW-native tile;
    # bias stored as a (CNN_OUT, 1) column so it broadcasts over the lane axis.
    params['wc_t'] = lin(keys[1], c_in, CNN_OUT).T.astype(jnp.bfloat16)   # (512, C_in)
    params['bc_col'] = jnp.zeros((CNN_OUT, 1), jnp.float32)

    params['wp'] = lin(keys[2], BERT_OUT, BERT_OUT).astype(jnp.bfloat16)
    params['bp'] = jnp.zeros((1, BERT_OUT), jnp.float32)

    fan1 = CNN_OUT + BERT_OUT
    w1 = lin(keys[3], fan1, PROJ_DIM)
    params['w1_img'] = w1[:CNN_OUT].astype(jnp.bfloat16)        # (512, 512)
    params['w1_txt'] = w1[CNN_OUT:].astype(jnp.bfloat16)        # (128, 512)
    b1_bound = float(fan1) ** -0.5
    params['b1'] = jax.random.uniform(keys[4], (1, PROJ_DIM), jnp.float32,
                                      -b1_bound, b1_bound)

    # Lane-dense padded head: real classes in columns [:N_CLASSES]; padded
    # biases = -1e30 so a 128-wide softmax matches the 3-wide one exactly.
    w2 = lin(keys[5], PROJ_DIM, N_CLASSES)
    params['w2_pad'] = (jnp.zeros((PROJ_DIM, OUT_PAD), jnp.float32)
                        .at[:, :N_CLASSES].set(w2).astype(jnp.bfloat16))
    b2_bound = float(PROJ_DIM) ** -0.5
    b2 = jax.random.uniform(keys[6], (1, N_CLASSES), jnp.float32,
                            -b2_bound, b2_bound)
    params['b2_pad'] = (jnp.full((1, OUT_PAD), -1e30, jnp.float32)
                        .at[:, :N_CLASSES].set(b2))
    return params


def _pick_tile_b(batch: int) -> int:
    """>= 2 batch blocks when B >= 2 (so v7x's 2 TCs both get work); <= 8 rows."""
    if batch <= 1:
        return 1
    target = min(8, max(1, batch // 2))
    for t in range(target, 0, -1):
        if batch % t == 0:
            return t
    return 1


def _pick_tile_hw(hw: int) -> int:
    """Largest divisor of HW among {512, 256, 128}; fall back to the full map."""
    for t in (512, 256, 128):
        if hw % t == 0:
            return t
    return hw


@functools.partial(jax.jit, static_argnames=('inference',))
def full_model_forward(img_nchw, text_tokens, params, *, inference: bool = False):
    B, C_in, H, W = img_nchw.shape
    HW = H * W

    # NCHW-native: a pure reshape (no HBM transpose); HW stays lane-dense.
    img = img_nchw.reshape(B, C_in, HW).astype(jnp.bfloat16)
    # Embed ONLY the CLS token -> (B, 1, 128) (3-D keeps TILE_B unconstrained
    # by the (8,128) block rule on the minor two dims).
    cls = jnp.take(params['emb'], text_tokens[:, 0], axis=0)
    cls = cls.astype(jnp.bfloat16).reshape(B, 1, BERT_OUT)

    tile_b = _pick_tile_b(B)
    tile_hw = _pick_tile_hw(HW)
    grid = (B // tile_b, HW // tile_hw)
    inv_hw = 1.0 / float(HW)

    kernel = functools.partial(_fused_forward_kernel, tile_b=tile_b,
                               inference=inference, inv_hw=inv_hw)

    def _full_spec(arr):
        ndim = arr.ndim

        def index_map(b, h):
            return (0,) * ndim

        return pl.BlockSpec(arr.shape, index_map)

    in_specs = [
        pl.BlockSpec((tile_b, C_in, tile_hw), lambda b, h: (b, 0, h)),   # img
        pl.BlockSpec((tile_b, 1, BERT_OUT), lambda b, h: (b, 0, 0)),     # cls
        _full_spec(params['wc_t']),
        _full_spec(params['bc_col']),
        _full_spec(params['wp']),
        _full_spec(params['bp']),
        _full_spec(params['w1_img']),
        _full_spec(params['w1_txt']),
        _full_spec(params['b1']),
        _full_spec(params['w2_pad']),
        _full_spec(params['b2_pad']),
    ]
    out_spec = pl.BlockSpec((tile_b, 1, OUT_PAD), lambda b, h: (b, 0, 0))

    # Right-sized VMEM: resident (double-buffered) weights ~3 MiB, img tile
    # double buffer, plus a few live (CNN_OUT, tile_hw) f32 conv intermediates.
    fb_bytes = CNN_OUT * tile_hw * 4
    img_blk_bytes = tile_b * 8 * tile_hw * 2          # C_in padded to 8 sublanes
    vmem_limit = int(min(max(4 * 2**20 + 2 * img_blk_bytes
                             + 2 * (tile_b + 2) * fb_bytes + 2 * 2**20,
                             16 * 2**20),
                         48 * 2**20))

    grid_spec = pltpu.PrefetchScalarGridSpec(
        num_scalar_prefetch=0,
        grid=grid,
        in_specs=in_specs,
        out_specs=out_spec,
        scratch_shapes=[pltpu.VMEM((tile_b, CNN_OUT), jnp.float32)],
    )

    out = pl.pallas_call(
        kernel,
        out_shape=jax.ShapeDtypeStruct((B, 1, OUT_PAD), jnp.float32),
        grid_spec=grid_spec,
        compiler_params=pltpu.CompilerParams(
            dimension_semantics=("parallel", "arbitrary"),
            vmem_limit_bytes=vmem_limit),
    )(img, cls,
      params['wc_t'], params['bc_col'],
      params['wp'], params['bp'],
      params['w1_img'], params['w1_txt'], params['b1'],
      params['w2_pad'], params['b2_pad'])

    return out[:, 0, :N_CLASSES]


def _reference_forward(img_nchw, text_tokens, params, inference):
    """Pure-JAX reference of the same surrogate math (same bf16 casts)."""
    B, C_in, H, W = img_nchw.shape
    HW = H * W
    img = img_nchw.reshape(B, C_in, HW).astype(jnp.bfloat16)
    feat = jnp.einsum('oc,bch->boh', params['wc_t'], img,
                      preferred_element_type=jnp.float32)
    feat = jnp.maximum(feat + params['bc_col'][None], 0.0)
    x_img = jnp.sum(feat, axis=-1) / HW
    cls = jnp.take(params['emb'], text_tokens[:, 0], axis=0).astype(jnp.bfloat16)
    x_text = jnp.tanh(jnp.dot(cls, params['wp'],
                              preferred_element_type=jnp.float32) + params['bp'])
    hdn = (jnp.dot(x_img.astype(jnp.bfloat16), params['w1_img'],
                   preferred_element_type=jnp.float32)
           + jnp.dot(x_text.astype(jnp.bfloat16), params['w1_txt'],
                     preferred_element_type=jnp.float32)
           + params['b1'])
    hdn = jnp.maximum(hdn, 0.0)
    logits = (jnp.dot(hdn.astype(jnp.bfloat16), params['w2_pad'],
                      preferred_element_type=jnp.float32)
              + params['b2_pad'])[:, :N_CLASSES]
    if inference:
        logits = jax.nn.softmax(logits, axis=-1)
    return logits


if __name__ == "__main__":
    key = jax.random.PRNGKey(0)
    k_img, k_txt = jax.random.split(key)

    B, C_in, H, W, S = 2, 3, 16, 16, 8
    img = jax.random.normal(k_img, (B, C_in, H, W), jnp.float32)       # torch NCHW
    text = jax.random.randint(k_txt, (B, S), 0, VOCAB, jnp.int32)      # padded token ids

    params = init_params(seed=0, c_in=C_in)

    # Default FullModel(inference=False): raw logits (no softmax).
    logits = full_model_forward(img, text, params, inference=False)
    jax.block_until_ready(logits)
    assert logits.shape == (B, N_CLASSES) and logits.dtype == jnp.float32

    # Numeric check against the pure-JAX reference of the same surrogate math.
    ref_logits = _reference_forward(img, text, params, inference=False)
    max_err = float(jnp.max(jnp.abs(logits - ref_logits)))
    assert max_err < 2e-3, f"kernel vs reference mismatch: {max_err}"

    # inference=True path: softmax probabilities.
    probs = full_model_forward(img, text, params, inference=True)
    jax.block_until_ready(probs)
    assert probs.shape == (B, N_CLASSES)
    assert bool(jnp.all(jnp.abs(jnp.sum(probs, axis=-1) - 1.0) < 1e-3))

    print("KERNEL_OK")
</pallas_src>

<mosaic_0001>
module attributes {stable_mosaic.version = 11 : i64} {
  func.func @_fused_forward_kernel(%arg0: i32, %arg1: i32, %arg2: memref<1x3x256xbf16, #tpu.memory_space<vmem>>, %arg3: memref<1x1x128xbf16, #tpu.memory_space<vmem>>, %arg4: memref<512x3xbf16, #tpu.memory_space<vmem>>, %arg5: memref<512x1xf32, #tpu.memory_space<vmem>>, %arg6: memref<128x128xbf16, #tpu.memory_space<vmem>>, %arg7: memref<1x128xf32, #tpu.memory_space<vmem>>, %arg8: memref<512x512xbf16, #tpu.memory_space<vmem>>, %arg9: memref<128x512xbf16, #tpu.memory_space<vmem>>, %arg10: memref<1x512xf32, #tpu.memory_space<vmem>>, %arg11: memref<512x128xbf16, #tpu.memory_space<vmem>>, %arg12: memref<1x128xf32, #tpu.memory_space<vmem>>, %arg13: memref<1x1x128xf32, #tpu.memory_space<vmem>>, %arg14: memref<1x512xf32, #tpu.memory_space<vmem>>) attributes {dimension_semantics = [#tpu.dimension_semantics<parallel>, #tpu.dimension_semantics<arbitrary>], iteration_bounds = array<i64: 2, 1>, scalar_prefetch = 0 : i64, scratch_operands = 1 : i64, tpu.core_type = #tpu.core_type<tc>, window_params = [{transform_indices = @transform_0, window_bounds = array<i64: 1, 3, 256>}, {transform_indices = @transform_1, window_bounds = array<i64: 1, 1, 128>}, {pipeline_mode = #tpu.pipeline_mode<synchronous>, transform_indices = @transform_2, window_bounds = array<i64: 512, 3>}, {pipeline_mode = #tpu.pipeline_mode<synchronous>, transform_indices = @transform_3, window_bounds = array<i64: 512, 1>}, {pipeline_mode = #tpu.pipeline_mode<synchronous>, transform_indices = @transform_4, window_bounds = array<i64: 128, 128>}, {pipeline_mode = #tpu.pipeline_mode<synchronous>, transform_indices = @transform_5, window_bounds = array<i64: 1, 128>}, {pipeline_mode = #tpu.pipeline_mode<synchronous>, transform_indices = @transform_6, window_bounds = array<i64: 512, 512>}, {pipeline_mode = #tpu.pipeline_mode<synchronous>, transform_indices = @transform_7, window_bounds = array<i64: 128, 512>}, {pipeline_mode = #tpu.pipeline_mode<synchronous>, transform_indices = @transform_8, window_bounds = array<i64: 1, 512>}, {pipeline_mode = #tpu.pipeline_mode<synchronous>, transform_indices = @transform_9, window_bounds = array<i64: 512, 128>}, {pipeline_mode = #tpu.pipeline_mode<synchronous>, transform_indices = @transform_10, window_bounds = array<i64: 1, 128>}, {transform_indices = @transform_11, window_bounds = array<i64: 1, 1, 128>}]} {
    %c0_i32 = arith.constant 0 : i32
    %0 = arith.cmpi eq, %arg1, %c0_i32 : i32
    %1 = arith.extui %0 : i1 to i32
    %c0_i32_0 = arith.constant 0 : i32
    %2 = arith.cmpi ne, %1, %c0_i32_0 : i32
    scf.if %2 {
      %cst_15 = arith.constant 0.000000e+00 : f32
      %22 = vector.broadcast %cst_15 : f32 to vector<1x512xf32>
      %c0_16 = arith.constant 0 : index
      %c0_17 = arith.constant 0 : index
      %23 = vector.load %arg14[%c0_16, %c0_17] : memref<1x512xf32, #tpu.memory_space<vmem>>, vector<1x512xf32>
      tpu.vector_store %arg14[%c0_16, %c0_17], %22 {strides = array<i32>} : memref<1x512xf32, #tpu.memory_space<vmem>>, vector<1x512xf32>,
    } else {
    }
    %c0 = arith.constant 0 : index
    %c0_1 = arith.constant 0 : index
    %3 = vector.load %arg4[%c0, %c0_1] : memref<512x3xbf16, #tpu.memory_space<vmem>>, vector<512x3xbf16>
    %c0_2 = arith.constant 0 : index
    %c0_3 = arith.constant 0 : index
    %4 = vector.load %arg5[%c0_2, %c0_3] : memref<512x1xf32, #tpu.memory_space<vmem>>, vector<512x1xf32>
    %c0_4 = arith.constant 0 : index
    %c0_5 = arith.constant 0 : index
    %c0_6 = arith.constant 0 : index
    %5 = vector.load %arg2[%c0_4, %c0_5, %c0_6] : memref<1x3x256xbf16, #tpu.memory_space<vmem>>, vector<1x3x256xbf16>
    %6 = vector.shape_cast %5 : vector<1x3x256xbf16> to vector<3x256xbf16>
    %cst = arith.constant dense<0.000000e+00> : vector<512x256xf32>
    %7 = tpu.matmul %3, %6, %cst {dimension_numbers = #tpu.dot_dimension_numbers<[1], [0], [0], [1], [0, 0, 1, 1], [], []>} : vector<512x3xbf16>, vector<3x256xbf16>, vector<512x256xf32> -> vector<512x256xf32>
    %8 = vector.broadcast %4 : vector<512x1xf32> to vector<512x256xf32>
    %9 = arith.addf %7, %8 : vector<512x256xf32>
    %cst_7 = arith.constant 0.000000e+00 : f32
    %10 = vector.broadcast %cst_7 : f32 to vector<512x256xf32>
    %11 = arith.maximumf %9, %10 : vector<512x256xf32>
    %c0_8 = arith.constant 0 : index
    %c0_9 = arith.constant 0 : index
    %12 = vector.load %arg14[%c0_8, %c0_9] : memref<1x512xf32, #tpu.memory_space<vmem>>, vector<1x512xf32>
    %13 = vector.shape_cast %12 : vector<1x512xf32> to vector<512xf32>
    %cst_10 = arith.constant dense<0.000000e+00> : vector<512xf32>
    %14 = vector.multi_reduction <add>, %11, %cst_10 [1] : vector<512x256xf32> to vector<512xf32>
    %15 = arith.addf %13, %14 : vector<512xf32>
    %c0_11 = arith.constant 0 : index
    %c0_12 = arith.constant 0 : index
    %16 = vector.load %arg14[%c0_11, %c0_12] : memref<1x512xf32, #tpu.memory_space<vmem>>, vector<1x512xf32>
    %17 = vector.shape_cast %16 : vector<1x512xf32> to vector<512xf32>
    %18 = vector.shape_cast %15 : vector<512xf32> to vector<1x512xf32>
    tpu.vector_store %arg14[%c0_11, %c0_12], %18 {strides = array<i32>} : memref<1x512xf32, #tpu.memory_space<vmem>>, vector<1x512xf32>,
    %c0_i32_13 = arith.constant 0 : i32
    %19 = arith.cmpi eq, %arg1, %c0_i32_13 : i32
    %20 = arith.extui %19 : i1 to i32
    %c0_i32_14 = arith.constant 0 : i32
    %21 = arith.cmpi ne, %20, %c0_i32_14 : i32
    scf.if %21 {
      %c0_15 = arith.constant 0 : index
      %c0_16 = arith.constant 0 : index
      %22 = vector.load %arg14[%c0_15, %c0_16] : memref<1x512xf32, #tpu.memory_space<vmem>>, vector<1x512xf32>
      %cst_17 = arith.constant 3.906250e-03 : f32
      %23 = vector.broadcast %cst_17 : f32 to vector<1x512xf32>
      %24 = arith.mulf %22, %23 : vector<1x512xf32>
      %c0_18 = arith.constant 0 : index
      %c0_19 = arith.constant 0 : index
      %c0_20 = arith.constant 0 : index
      %25 = vector.load %arg3[%c0_18, %c0_19, %c0_20] : memref<1x1x128xbf16, #tpu.memory_space<vmem>>, vector<1x1x128xbf16>
      %26 = vector.shape_cast %25 : vector<1x1x128xbf16> to vector<1x128xbf16>
      %c0_21 = arith.constant 0 : index
      %c0_22 = arith.constant 0 : index
      %27 = vector.load %arg6[%c0_21, %c0_22] : memref<128x128xbf16, #tpu.memory_space<vmem>>, vector<128x128xbf16>
      %cst_23 = arith.constant dense<0.000000e+00> : vector<1x128xf32>
      %28 = tpu.matmul %26, %27, %cst_23 {dimension_numbers = #tpu.dot_dimension_numbers<[1], [0], [0], [1], [0, 0, 1, 1], [], []>} : vector<1x128xbf16>, vector<128x128xbf16>, vector<1x128xf32> -> vector<1x128xf32>
      %c0_24 = arith.constant 0 : index
      %c0_25 = arith.constant 0 : index
      %29 = vector.load %arg7[%c0_24, %c0_25] : memref<1x128xf32, #tpu.memory_space<vmem>>, vector<1x128xf32>
      %30 = arith.addf %28, %29 : vector<1x128xf32>
      %31 = math.tanh %30 : vector<1x128xf32>
      %32 = arith.truncf %24 : vector<1x512xf32> to vector<1x512xbf16>
      %c0_26 = arith.constant 0 : index
      %c0_27 = arith.constant 0 : index
      %33 = vector.load %arg8[%c0_26, %c0_27] : memref<512x512xbf16, #tpu.memory_space<vmem>>, vector<512x512xbf16>
      %cst_28 = arith.constant dense<0.000000e+00> : vector<1x512xf32>
      %34 = tpu.matmul %32, %33, %cst_28 {dimension_numbers = #tpu.dot_dimension_numbers<[1], [0], [0], [1], [0, 0, 1, 1], [], []>} : vector<1x512xbf16>, vector<512x512xbf16>, vector<1x512xf32> -> vector<1x512xf32>
      %35 = arith.truncf %31 : vector<1x128xf32> to vector<1x128xbf16>
      %c0_29 = arith.constant 0 : index
      %c0_30 = arith.constant 0 : index
      %36 = vector.load %arg9[%c0_29, %c0_30] : memref<128x512xbf16, #tpu.memory_space<vmem>>, vector<128x512xbf16>
      %cst_31 = arith.constant dense<0.000000e+00> : vector<1x512xf32>
      %37 = tpu.matmul %35, %36, %cst_31 {dimension_numbers = #tpu.dot_dimension_numbers<[1], [0], [0], [1], [0, 0, 1, 1], [], []>} : vector<1x128xbf16>, vector<128x512xbf16>, vector<1x512xf32> -> vector<1x512xf32>
      %38 = arith.addf %34, %37 : vector<1x512xf32>
      %c0_32 = arith.constant 0 : index
      %c0_33 = arith.constant 0 : index
      %39 = vector.load %arg10[%c0_32, %c0_33] : memref<1x512xf32, #tpu.memory_space<vmem>>, vector<1x512xf32>
      %40 = arith.addf %38, %39 : vector<1x512xf32>
      %cst_34 = arith.constant 0.000000e+00 : f32
      %41 = vector.broadcast %cst_34 : f32 to vector<1x512xf32>
      %42 = arith.maximumf %40, %41 : vector<1x512xf32>
      %43 = arith.truncf %42 : vector<1x512xf32> to vector<1x512xbf16>
      %c0_35 = arith.constant 0 : index
      %c0_36 = arith.constant 0 : index
      %44 = vector.load %arg11[%c0_35, %c0_36] : memref<512x128xbf16, #tpu.memory_space<vmem>>, vector<512x128xbf16>
      %cst_37 = arith.constant dense<0.000000e+00> : vector<1x128xf32>
      %45 = tpu.matmul %43, %44, %cst_37 {dimension_numbers = #tpu.dot_dimension_numbers<[1], [0], [0], [1], [0, 0, 1, 1], [], []>} : vector<1x512xbf16>, vector<512x128xbf16>, vector<1x128xf32> -> vector<1x128xf32>
      %c0_38 = arith.constant 0 : index
      %c0_39 = arith.constant 0 : index
      %46 = vector.load %arg12[%c0_38, %c0_39] : memref<1x128xf32, #tpu.memory_space<vmem>>, vector<1x128xf32>
      %47 = arith.addf %45, %46 : vector<1x128xf32>
      %c0_40 = arith.constant 0 : index
      %c0_41 = arith.constant 0 : index
      %c0_42 = arith.constant 0 : index
      %48 = vector.load %arg13[%c0_40, %c0_41, %c0_42] : memref<1x1x128xf32, #tpu.memory_space<vmem>>, vector<1x1x128xf32>
      %49 = vector.shape_cast %48 : vector<1x1x128xf32> to vector<1x128xf32>
      %50 = vector.shape_cast %47 : vector<1x128xf32> to vector<1x1x128xf32>
      tpu.vector_store %arg13[%c0_40, %c0_41, %c0_42], %50 {strides = array<i32>} : memref<1x1x128xf32, #tpu.memory_space<vmem>>, vector<1x1x128xf32>,
    } else {
    }
    return
  }
  func.func @transform_0(%arg0: i32, %arg1: i32) -> (i32, i32, i32) {
    %c0_i32 = arith.constant 0 : i32
    %c0_i32_0 = arith.constant 0 : i32
    return %arg0, %c0_i32, %arg1 : i32, i32, i32
  }
  func.func @transform_1(%arg0: i32, %arg1: i32) -> (i32, i32, i32) {
    %c0_i32 = arith.constant 0 : i32
    %c0_i32_0 = arith.constant 0 : i32
    %c0_i32_1 = arith.constant 0 : i32
    return %arg0, %c0_i32, %c0_i32_0 : i32, i32, i32
  }
  func.func @transform_2(%arg0: i32, %arg1: i32) -> (i32, i32) {
    %c0_i32 = arith.constant 0 : i32
    %c0_i32_0 = arith.constant 0 : i32
    %c0_i32_1 = arith.constant 0 : i32
    return %c0_i32, %c0_i32_0 : i32, i32
  }
  func.func @transform_3(%arg0: i32, %arg1: i32) -> (i32, i32) {
    %c0_i32 = arith.constant 0 : i32
    %c0_i32_0 = arith.constant 0 : i32
    %c0_i32_1 = arith.constant 0 : i32
    return %c0_i32, %c0_i32_0 : i32, i32
  }
  func.func @transform_4(%arg0: i32, %arg1: i32) -> (i32, i32) {
    %c0_i32 = arith.constant 0 : i32
    %c0_i32_0 = arith.constant 0 : i32
    %c0_i32_1 = arith.constant 0 : i32
    return %c0_i32, %c0_i32_0 : i32, i32
  }
  func.func @transform_5(%arg0: i32, %arg1: i32) -> (i32, i32) {
    %c0_i32 = arith.constant 0 : i32
    %c0_i32_0 = arith.constant 0 : i32
    %c0_i32_1 = arith.constant 0 : i32
    return %c0_i32, %c0_i32_0 : i32, i32
  }
  func.func @transform_6(%arg0: i32, %arg1: i32) -> (i32, i32) {
    %c0_i32 = arith.constant 0 : i32
    %c0_i32_0 = arith.constant 0 : i32
    %c0_i32_1 = arith.constant 0 : i32
    return %c0_i32, %c0_i32_0 : i32, i32
  }
  func.func @transform_7(%arg0: i32, %arg1: i32) -> (i32, i32) {
    %c0_i32 = arith.constant 0 : i32
    %c0_i32_0 = arith.constant 0 : i32
    %c0_i32_1 = arith.constant 0 : i32
    return %c0_i32, %c0_i32_0 : i32, i32
  }
  func.func @transform_8(%arg0: i32, %arg1: i32) -> (i32, i32) {
    %c0_i32 = arith.constant 0 : i32
    %c0_i32_0 = arith.constant 0 : i32
    %c0_i32_1 = arith.constant 0 : i32
    return %c0_i32, %c0_i32_0 : i32, i32
  }
  func.func @transform_9(%arg0: i32, %arg1: i32) -> (i32, i32) {
    %c0_i32 = arith.constant 0 : i32
    %c0_i32_0 = arith.constant 0 : i32
    %c0_i32_1 = arith.constant 0 : i32
    return %c0_i32, %c0_i32_0 : i32, i32
  }
  func.func @transform_10(%arg0: i32, %arg1: i32) -> (i32, i32) {
    %c0_i32 = arith.constant 0 : i32
    %c0_i32_0 = arith.constant 0 : i32
    %c0_i32_1 = arith.constant 0 : i32
    return %c0_i32, %c0_i32_0 : i32, i32
  }
  func.func @transform_11(%arg0: i32, %arg1: i32) -> (i32, i32, i32) {
    %c0_i32 = arith.constant 0 : i32
    %c0_i32_0 = arith.constant 0 : i32
    %c0_i32_1 = arith.constant 0 : i32
    return %arg0, %c0_i32, %c0_i32_0 : i32, i32, i32
  }
}

</mosaic_0001>

<bundles_post_ra>
// kernel: full_model_forward.1
= control target key start
LH: loop header
LB: loop body
LE: loop exit
PB: predicated region body
PF: predicated region fallthrough
CT: control target
= control target key end

     0   :  { %s13686_s0 = inlined_call_operand.vmem [shape: bf16[2,3,256], index: 0, kind: input, shape index: {}]   ;;  %s13687_s1 = inlined_call_operand.vmem [shape: bf16[2,1,128], index: 1, kind: input, shape index: {}]   ;;  %s13688_s2 = inlined_call_operand.vmem [shape: bf16[512,3], index: 2, kind: input, shape index: {}]   ;;  %s13689_s3 = inlined_call_operand.vmem [shape: f32[512,1], index: 3, kind: input, shape index: {}]   ;;  %s13690_s4 = inlined_call_operand.hbm [shape: bf16[128,128], index: 4, kind: input, shape index: {}]   ;;  %s13691_s5 = inlined_call_operand.vmem [shape: f32[1,128], index: 5, kind: input, shape index: {}]   ;;  %s13692_s6 = inlined_call_operand.vmem [shape: bf16[512,512], index: 6, kind: input, shape index: {}]   ;;  %s13693_s7 = inlined_call_operand.hbm [shape: bf16[128,512], index: 7, kind: input, shape index: {}]   ;;  %s13694_s8 = inlined_call_operand.vmem [shape: f32[1,512], index: 8, kind: input, shape index: {}]   ;;  %s13695_s9 = inlined_call_operand.hbm [shape: bf16[512,128], index: 9, kind: input, shape index: {}]   ;;  %s13696_s10 = inlined_call_operand.vmem [shape: f32[1,128], index: 10, kind: input, shape index: {}]   ;;  %s13697_s11 = inlined_call_operand.hbm [shape: f32[2,1,128], index: 11, kind: output, shape index: {}]  }
   0x1   :  { %13745 = sst [smem:[#allocation41_spill]] %s13693_s7 }
   0x2   :  { %13746 = sst [smem:[#allocation42_spill]] %s13697_s11 }
   0x3   :  { %16 = vsyncpa [#allocation4], 0 }
   0x4   :  { %17 = vsyncpa [#allocation7], 0 }
   0x5   :  { %18 = vsyncpa [#allocation5], 0 }
   0x6   :  { %20 = vsyncpa [#allocation5 + $0x1], 0  ;;  %s10547_s17 = smov 0   ;;  %s10549_s18 = smov 0  }
   0x7   :  { %s10551_s19 = smov 0   ;;  %s10553_s20 = smov 0  }
   0x8   :  { %s10555_s21 = smov 0   ;;  %s10557_s22 = smov 0  }
   0x9 LB: > { %13747 = sst [smem:[#allocation13_spill]] %s10452_s17  ;;  %s9536_s23 = sadd.s32 4294967295, %s10472_s22   ;;  %s10472_s22 = sphi %s10557_s22, %s26_s22   ;;  %s10468_s21 = sphi %s10555_s21, %s13843_s21   ;;  %s10464_s20 = sphi %s10553_s20, %s13846_s20   ;;  %s10460_s19 = sphi %s10551_s19, %s13841_s19   ;;  %s10456_s18 = sphi %s10549_s18, %s13845_s18   ;;  %s10452_s17 = sphi %s10547_s17, %s13844_s17  }
   0xa   : > { %13748 = sst [smem:[#allocation14_spill]] %s10460_s19  ;;  %s9537_s24 = sadd.s32 4294967294, %s10472_s22  }
   0xb   : > { %13749 = sst [smem:[#allocation15_spill]] %s10468_s21  ;;  %s38_s25 = sadd.s32 1, %s10468_s21 }
   0xc   : > { %13750 = sst [smem:[#allocation16_spill]] %s10472_s22  ;;  %s288_s26 = sadd.s32 1, %s10460_s19 }
   0xd   : > { %p40_p0 = scmp.ge.s32.totalorder %s38_s25, 2  ;;  %p298_p1 = scmp.ne.s32.totalorder %s10460_s19, %s10456_s18 }
   0xe   : > { %p299_p2 = scmp.eq.s32.totalorder %s9536_s23, 1  ;;  %p304_p3 = scmp.ne.s32.totalorder %s10456_s18, %s10452_s17 }
   0xf   : > { %s13848_s25 = smov (%p40_p0, %s38_s25), 0  ;;  %p305_p5 = scmp.eq.s32.totalorder %s9537_s24, 1 }
  0x10   : > { %13751 = sst [smem:[#allocation17_spill]] %s13848_s25  ;;  %p10587_p4 = por %p299_p2, %p298_p1 }
  0x11   : > { %s285_s28 = ssub.s32 %s10468_s21, %s13848_s25  ;;  %p9538_p6 = scmp.ge.s32.totalorder %s10472_s22, 1 }
  0x12   : > { %s13752_s27 = scalar_select %p10587_p4, 1, 0 }
  0x13   : > { %p286_p7 = scmp.eq.s32.totalorder %s285_s28, 0  ;;  %p10594_p8 = por %p305_p5, %p304_p3 }
  0x14   : > { %p312_p9 = scmp.lt.s32.totalorder %s10472_s22, 3  ;;  %p10606_p11 = scmp.eq.s32.totalorder %s9536_s23, 0 }
  0x15   : > { %s13753_s29 = scalar_select %p10594_p8, 1, 0 }
  0x16   : > { %s10600_s30 = scalar_select %p286_p7, %s10460_s19, %s288_s26  }
  0x17   : > { %13754 = sst [smem:[#allocation18_spill]] %s13753_s29  ;;  %p10602_p10 = pnand %p9538_p6, %p312_p9 }
  0x18   : > { %13755 = sst [smem:[#allocation19_spill]] %s10600_s30  ;;  %s10474_s14 = smov [#allocation6]  }
  0x19   : > { %s13756_s12 = scalar_select %p10602_p10, 1, 0 }
  0x1a   : > { %s13757_s13 = scalar_select %p10606_p11, 1, 0 }
  0x1b   : > { %p9905_p12 = pneg %p10602_p10  ;;  %s349_s15 = sshll.u32 %s10474_s14, 4  ;;  %s350_s15 = int_to_ptr.vmem [resolvable:$true] %s349_s15 }
  0x1c   : > { %s10475_s24 = smov [#allocation3]   ;;  %s13759_s7 = sld [smem:[#allocation41_spill]] }
  0x1d   : > { %p10614_p13 = pnand %p10606_p11, %p9905_p12  ;;  %s330_s26 = sshll.u32 %s10475_s24, 4  ;;  %s331_s26 = int_to_ptr.vmem [resolvable:$true] %s330_s26 }
  0x1f   : > { %p10626_p1 = pneg %p10614_p13 }
  0x22   : > { %s10302_s23 = scalar_lea.hbm %s13759_s7, 4096 }
  0x23   : > { %p10303_p0 = scmp.ne.s32.totalorder %s13759_s7, %s10302_s23  ;;  %p10309_p5 = scmp.lt.u32.totalorder %s10302_s23, %s13759_s7 }
  0x25   : > { %p10305_p2 = pnand %p10626_p1, %p10303_p0 }
  0x27   : > { %p10306_p3 = pneg %p10305_p2 }
  0x29   : > { %p10311_p6 = pnand %p10309_p5, %p10306_p3 }
  0x2b   : > { %10314 = shalt.err (!%p10311_p6)
}
  0x2c   : > { %s10315_s25 = scalar_lea.vmem %s350_s15, 4096  ;;  %p10323_p8 = scmp.lt.s32.totalorder %s350_s15, %s350_s15 }
  0x2d   : > { %p10316_p7 = scmp.ne.s32.totalorder %s350_s15, %s10315_s25  ;;  %p10324_p4 = scmp.lt.s32.totalorder %s10315_s25, %s10315_s25 }
  0x2f   : > { %p10318_p9 = pnand %p10316_p7, %p10626_p1  ;;  %p10325_p11 = por %p10324_p4, %p10323_p8 }
  0x31   : > { %p10319_p12 = pneg %p10318_p9 }
  0x33   : > { %p10326_p10 = pnand %p10325_p11, %p10319_p12 }
  0x35   : > { %10329 = shalt.err (!%p10326_p10)
}
  0x36   : > { %s10476_s21 = smov 256   ;;  %s10477_s30 = smov 16  }
  0x37   : > { %9911 = dma.hbm_to_vmem [thread:$0]  (!%p10614_p13), %s13759_s7, 4096, %s350_s15, [#allocation7], %s10476_s21, %s10476_s21, %s10477_s30  }
  0x38   : > { %s10330_s23 = scalar_lea.hbm %s13690_s4, 1024 }
  0x39   : > { %p10331_p4 = scmp.ne.s32.totalorder %s13690_s4, %s10330_s23  ;;  %p10337_p11 = scmp.lt.u32.totalorder %s10330_s23, %s13690_s4 }
  0x3b   : > { %p10333_p8 = pnand %p10331_p4, %p10626_p1 }
  0x3d   : > { %p10334_p10 = pneg %p10333_p8 }
  0x3f   : > { %p10339_p0 = pnand %p10337_p11, %p10334_p10 }
  0x41   : > { %10342 = shalt.err (!%p10339_p0)
}
  0x42   : > { %s10343_s19 = scalar_lea.vmem %s331_s26, 1024  ;;  %p10351_p6 = scmp.lt.s32.totalorder %s331_s26, %s331_s26 }
  0x43   : > { %p10344_p2 = scmp.ne.s32.totalorder %s331_s26, %s10343_s19  ;;  %p10352_p7 = scmp.lt.s32.totalorder %s10343_s19, %s10343_s19 }
  0x45   : > { %p10346_p3 = pnand %p10344_p2, %p10626_p1  ;;  %p10353_p9 = por %p10352_p7, %p10351_p6 }
  0x47   : > { %p10347_p5 = pneg %p10346_p3 }
  0x49   : > { %p10354_p12 = pnand %p10353_p9, %p10347_p5 }
  0x4b   : > { %10357 = shalt.err (!%p10354_p12)
}
  0x4c   : > { %s10478_s17 = smov 64   ;;  %s10479_s22 = smov 4  }
  0x4d   : > { %9908 = dma.hbm_to_vmem [thread:$0]  (!%p10614_p13), %s13690_s4, 1024, %s331_s26, [#allocation4], %s10478_s17, %s10478_s17, %s10479_s22  }
  0x4e   : > { %s10480_s21 = smov [#allocation8]   ;;  %s10358_s28 = scalar_lea.hbm %s13695_s9, 4096 }
  0x4f   : > { %s365_s30 = sshll.u32 %s10480_s21, 4  ;;  %p10359_p4 = scmp.ne.s32.totalorder %s13695_s9, %s10358_s28  ;;  %s366_s30 = int_to_ptr.vmem [resolvable:$true] %s365_s30 }
  0x50   : > { %p10365_p11 = scmp.lt.u32.totalorder %s10358_s28, %s13695_s9 }
  0x51   : > { %p10361_p8 = pnand %p10359_p4, %p10626_p1 }
  0x53   : > { %p10362_p10 = pneg %p10361_p8 }
  0x55   : > { %p10367_p0 = pnand %p10365_p11, %p10362_p10 }
  0x57   : > { %10370 = shalt.err (!%p10367_p0)
}
  0x58   : > { %s10371_s26 = scalar_lea.vmem %s366_s30, 4096  ;;  %p10379_p6 = scmp.lt.s32.totalorder %s366_s30, %s366_s30 }
  0x59   : > { %p10372_p2 = scmp.ne.s32.totalorder %s366_s30, %s10371_s26  ;;  %p10380_p7 = scmp.lt.s32.totalorder %s10371_s26, %s10371_s26 }
  0x5b   : > { %p10374_p3 = pnand %p10372_p2, %p10626_p1  ;;  %p10381_p9 = por %p10380_p7, %p10379_p6 }
  0x5d   : > { %p10375_p5 = pneg %p10374_p3 }
  0x5f   : > { %p10382_p12 = pnand %p10381_p9, %p10375_p5 }
  0x61   : > { %10385 = shalt.err (!%p10382_p12)
}
  0x62   : > { %9914 = dma.hbm_to_vmem [thread:$0]  (!%p10614_p13), %s13695_s9, 4096, %s366_s30, [#allocation7], %s10478_s17, %s10478_s17, %s10479_s22  }
  0x63   : > { %p13761_p4 = scmp.ne.s32.totalorder %s13756_s12, 0 }
  0x65   : > { %403 = sbr.rel (%p13761_p4) target bundleno = 1665 (0x681), region = 64 }
  0x6c   : > { %p13762_p8 = scmp.ne.s32.totalorder %s13757_s13, 0 }
  0x6e   : > { %10439 = dma.done.wait (%p13762_p8), [#allocation4], 1024  }
  0x6f   : > { %10441 = vsyncadd (%p13762_p8), [#allocation4], 4294966272 }
  0x70   : > { %10443 = dma.done.wait (%p13762_p8), [#allocation7], 8192  }
  0x71   : > { %10445 = vsyncadd (%p13762_p8), [#allocation7], 4294959104  ;;  %p458_p1 = scmp.lt.s32.totalorder %s10464_s20, 1  ;;  %vm1195_vm0 = vcmask 1040384   ;;  %v13710_v0 = vmov 0   ;;  %vm1196_vm1 = vcmask 1041408  }
  0x72   : > { %9987 = vset.pattern.permute.xlu1 %v13710_v0  ;;  %9986 = vset.pattern.permute.xlu0 %v13710_v0  ;;  %v10482_v1 = vmov 65535   ;;  %v560_v4 = vld [vmem:[%s13689_s3 + $0x80] sm:$0xff]  ;;  %v561_v8 = vld [vmem:[%s13689_s3 + $0x88] sm:$0xff]  ;;  %vm1098_vm2 = vcmask 23552   ;;  %v562_v18 = vld [vmem:[%s13689_s3 + $0x90] sm:$0xff]  ;;  %vm7330_vm3 = vcmask 130112  }
  0x73   : > { %s10692_s7 = scalar_select %p458_p1, %s10464_s20, 1  ;;  %1237 = vmatprep.mubr.bf16.mxu0 %v13710_v0  ;;  %v1197_v2 = vsel %vm1195_vm0, 4294967295, %v10482_v1  ;;  %v544_v5 = vld [vmem:[%s13689_s3] sm:$0xff]  ;;  %691 = vperm.xlu1 %9987, %v560_v4   ;;  %v545_v11 = vld [vmem:[%s13689_s3 + $0x8] sm:$0xff]  ;;  %v546_v19 = vld [vmem:[%s13689_s3 + $0x10] sm:$0xff]  ;;  %vm7337_vm4 = vcmask 195712  }
  0x74   : > { %v1198_v3 = vsel %vm1196_vm1, %v1197_v2, 0  ;;  %611 = vperm.xlu0 %9986, %v544_v5   ;;  %v9988_v12 = vld [vmem:[%s13688_s2] sm:$0xff]   ;;  %v577_v13 = vld [vmem:[%s13689_s3 + $0x108] sm:$0xff]  ;;  %v594_v20 = vld [vmem:[%s13689_s3 + $0x190] sm:$0xff]  ;;  %vm7344_vm5 = vcmask 261312   ;;  %vm7351_vm6 = vcmask 326912  }
  0x75   : > { %s9817_s12 = sshll.u32 %s10692_s7, 2  ;;  %v576_v14 = vld [vmem:[%s13689_s3 + $0x100] sm:$0xff]  ;;  %v593_v15 = vld [vmem:[%s13689_s3 + $0x188] sm:$0xff]  ;;  %v578_v21 = vld [vmem:[%s13689_s3 + $0x110] sm:$0xff]  ;;  %vm7358_vm7 = vcmask 392512   ;;  %vm7365_vm8 = vcmask 458112   ;;  %s469_s23 = scalar_lea.vmem %s13687_s1, %s10692_s7 }
  0x76   : > { %s465_s14 = scalar_lea.vmem %s13686_s0, %s9817_s12  ;;  %v592_v16 = vld [vmem:[%s13689_s3 + $0x180] sm:$0xff]  ;;  %v9989_v17 = vld [vmem:[%s13688_s2 + $0x8] sm:$0xff]   ;;  %v9990_v22 = vld [vmem:[%s13688_s2 + $0x10] sm:$0xff]   ;;  %vm7372_vm9 = vcmask 523712   ;;  %vm7379_vm10 = vcmask 589312   ;;  %vm7386_vm11 = vcmask 654912  }
  0x77   : > { %v9581_v6 = vld.sshfl [vmem:[%s465_s14] sm:$0x33 pattern:$0x76325410]  ;;  %696 = vperm.xlu1 %9987, %v561_v8   ;;  %v563_v23 = vld [vmem:[%s13689_s3 + $0x98] sm:$0xff]  ;;  %v565_v33 = vld [vmem:[%s13689_s3 + $0xa8] sm:$0xff] }
  0x78   : > { %v1097_v7 = vcombine.high %v9581_v6, %v9581_v6  ;;  %v1200_v9 = vand.u32 %v9581_v6, %v1198_v3  ;;  %616 = vperm.xlu0 %9986, %v545_v11   ;;  %v547_v24 = vld [vmem:[%s13689_s3 + $0x18] sm:$0xff]  ;;  %v564_v28 = vld [vmem:[%s13689_s3 + $0xa0] sm:$0xff]  ;;  %v549_v34 = vld [vmem:[%s13689_s3 + $0x28] sm:$0xff]  ;;  %vm10485_vm12 = vmmov 0   ;;  %vm7393_vm13 = vcmask 720512   ;;  %s455_s16 = sand.u32 1, %s10456_s18  }
  0x79   : > { %v595_v25 = vld [vmem:[%s13689_s3 + $0x198] sm:$0xff]  ;;  %v548_v29 = vld [vmem:[%s13689_s3 + $0x20] sm:$0xff]  ;;  %v597_v35 = vld [vmem:[%s13689_s3 + $0x1a8] sm:$0xff]  ;;  %vm7400_vm14 = vcmask 786112   ;;  %vm7407_vm15 = vcmask 851712   ;;  %vm7414_vm0 = vcmask 917312  }
  0x7a   : > { %v1203_v10 = vand.u32 %v1198_v3, %v1097_v7  ;;  %v579_v26 = vld [vmem:[%s13689_s3 + $0x118] sm:$0xff]  ;;  %v596_v30 = vld [vmem:[%s13689_s3 + $0x1a0] sm:$0xff]  ;;  %v581_v36 = vld [vmem:[%s13689_s3 + $0x128] sm:$0xff]  ;;  %s9814_s22 = sshll.u32 %s10464_s20, 4  ;;  %s456_s21 = scalar_lea.vmem [#allocation9], %s455_s16 }
  0x7b   : > { %776 = vperm.xlu1 %9987, %v577_v13   ;;  %v9991_v27 = vld [vmem:[%s13688_s2 + $0x18] sm:$0xff]   ;;  %v580_v31 = vld [vmem:[%s13689_s3 + $0x120] sm:$0xff]  ;;  %v9993_v37 = vld [vmem:[%s13688_s2 + $0x28] sm:$0xff]   ;;  %s9427_s30 = sshll.u32 %s456_s21, 4  ;;  %s13834_s28 = sld [smem:[#allocation42_spill]]  ;;  %s13641_s30 = int_to_ptr.vmem [resolvable:$true] %s9427_s30 }
  0x7c   : > { %1205 = vmatprep.subr.bf16.mxu0 %v1203_v10  ;;  %771 = vperm.xlu0 %9986, %v576_v14   ;;  %v9992_v32 = vld [vmem:[%s13688_s2 + $0x20] sm:$0xff]   ;;  %v566_v38 = vld [vmem:[%s13689_s3 + $0xb0] sm:$0xff]  ;;  %v567_v43 = vld [vmem:[%s13689_s3 + $0xb8] sm:$0xff]  ;;  %s9415_s7 = scalar_lea.sflag [#allocation5], %s455_s16  ;;  %s10386_s20 = scalar_lea.vmem %s13641_s30, 16 }
  0x7d   : > { %1206 = vmatpush1.bf16.msra.mxu0 %v1200_v9  ;;  %v550_v39 = vld [vmem:[%s13689_s3 + $0x30] sm:$0xff]  ;;  %v551_v44 = vld [vmem:[%s13689_s3 + $0x38] sm:$0xff]  ;;  %v568_v48 = vld [vmem:[%s13689_s3 + $0xc0] sm:$0xff]  ;;  %p10387_p13 = scmp.ne.s32.totalorder %s13641_s30, %s10386_s20  ;;  %p13835_p10 = scmp.ne.s32.totalorder %s13752_s27, 0 }
  0x7e   : > { %v598_v40 = vld [vmem:[%s13689_s3 + $0x1b0] sm:$0xff]  ;;  %v599_v45 = vld [vmem:[%s13689_s3 + $0x1b8] sm:$0xff]  ;;  %v552_v49 = vld [vmem:[%s13689_s3 + $0x40] sm:$0xff]  ;;  %s10486_s25 = smov [#allocation9]  }
  0x7f   : > { %856 = vperm.xlu1 %9987, %v593_v15   ;;  %v582_v41 = vld [vmem:[%s13689_s3 + $0x130] sm:$0xff]  ;;  %v583_v46 = vld [vmem:[%s13689_s3 + $0x138] sm:$0xff]  ;;  %v600_v50 = vld [vmem:[%s13689_s3 + $0x1c0] sm:$0xff]  ;;  %p10388_p11 = pnand %p10387_p13, %p13835_p10  ;;  %s10390_s19 = sshll.u32 %s10486_s25, 4  ;;  %s10391_s19 = int_to_ptr.vmem [resolvable:$false] %s10390_s19 }
  0x80   : > { %9582 = vmatmul.mubr.msk.bf16.vlgmr.msra.gmra.mrb[0].mxu0 %vm1098_vm2, %v9988_v12  ;;  %851 = vperm.xlu0 %9986, %v592_v16   ;;  %v9994_v42 = vld [vmem:[%s13688_s2 + $0x30] sm:$0xff]   ;;  %v9995_v47 = vld [vmem:[%s13688_s2 + $0x38] sm:$0xff]   ;;  %v584_v51 = vld [vmem:[%s13689_s3 + $0x140] sm:$0xff]  ;;  %s10392_s26 = scalar_lea.vmem %s10391_s19, 32  ;;  %p10393_p2 = scmp.lt.s32.totalorder %s13641_s30, %s10391_s19 }
  0x81   : > { %1247 = vmatprep.mubr.bf16.mxu0 %v13710_v0  ;;  %v9996_v52 = vld [vmem:[%s13688_s2 + $0x40] sm:$0xff]   ;;  %v569_v53 = vld [vmem:[%s13689_s3 + $0xc8] sm:$0xff]  ;;  %v570_v58 = vld [vmem:[%s13689_s3 + $0xd0] sm:$0xff]  ;;  %p10389_p0 = pneg %p10388_p11  ;;  %p10394_p3 = scmp.lt.s32.totalorder %s10392_s26, %s10386_s20 }
  0x82   : > { %v553_v54 = vld [vmem:[%s13689_s3 + $0x48] sm:$0xff]  ;;  %v554_v59 = vld [vmem:[%s13689_s3 + $0x50] sm:$0xff]  ;;  %v571_v63 = vld [vmem:[%s13689_s3 + $0xd8] sm:$0xff] }
  0x83   : > { %701 = vperm.xlu1 %9987, %v562_v18   ;;  %v601_v55 = vld [vmem:[%s13689_s3 + $0x1c8] sm:$0xff]  ;;  %v602_v60 = vld [vmem:[%s13689_s3 + $0x1d0] sm:$0xff]  ;;  %v555_v1 = vld [vmem:[%s13689_s3 + $0x58] sm:$0xff]  ;;  %p10395_p5 = por %p10394_p3, %p10393_p2 }
  0x84   : > { %621 = vperm.xlu0 %9986, %v546_v19   ;;  %v585_v56 = vld [vmem:[%s13689_s3 + $0x148] sm:$0xff]  ;;  %v586_v61 = vld [vmem:[%s13689_s3 + $0x150] sm:$0xff]  ;;  %v603_v2 = vld [vmem:[%s13689_s3 + $0x1d8] sm:$0xff] }
  0x85   : > { %v9997_v57 = vld [vmem:[%s13688_s2 + $0x48] sm:$0xff]   ;;  %v9998_v62 = vld [vmem:[%s13688_s2 + $0x50] sm:$0xff]   ;;  %v587_v3 = vld [vmem:[%s13689_s3 + $0x158] sm:$0xff]  ;;  %p10396_p6 = pnand %p10395_p5, %p10389_p0 }
  0x86   : > { %v9999_v4 = vld [vmem:[%s13688_s2 + $0x58] sm:$0xff]   ;;  %v572_v5 = vld [vmem:[%s13689_s3 + $0xe0] sm:$0xff]  ;;  %v573_v10 = vld [vmem:[%s13689_s3 + $0xe8] sm:$0xff] }
  0x87   : > { %861 = vperm.xlu1 %9987, %v594_v20   ;;  %v556_v6 = vld [vmem:[%s13689_s3 + $0x60] sm:$0xff]  ;;  %v557_v11 = vld [vmem:[%s13689_s3 + $0x68] sm:$0xff]  ;;  %v574_v15 = vld [vmem:[%s13689_s3 + $0xf0] sm:$0xff] }
  0x88   : > { %9583 = vmatmul.mubr.msk.bf16.gmra.mrb[4].mxu0 %vm1098_vm2, %v9989_v17  ;;  %781 = vperm.xlu0 %9986, %v578_v21   ;;  %v604_v7 = vld [vmem:[%s13689_s3 + $0x1e0] sm:$0xff]  ;;  %v605_v12 = vld [vmem:[%s13689_s3 + $0x1e8] sm:$0xff]  ;;  %v558_v16 = vld [vmem:[%s13689_s3 + $0x70] sm:$0xff] }
  0x89   : > { %1257 = vmatprep.mubr.bf16.mxu0 %v13710_v0  ;;  %v588_v8 = vld [vmem:[%s13689_s3 + $0x160] sm:$0xff]  ;;  %v589_v13 = vld [vmem:[%s13689_s3 + $0x168] sm:$0xff]  ;;  %v606_v17 = vld [vmem:[%s13689_s3 + $0x1f0] sm:$0xff] }
  0x8a   : > { %v10000_v9 = vld [vmem:[%s13688_s2 + $0x60] sm:$0xff]   ;;  %v10001_v14 = vld [vmem:[%s13688_s2 + $0x68] sm:$0xff]   ;;  %v590_v18 = vld [vmem:[%s13689_s3 + $0x170] sm:$0xff] }
  0x8b   : > { %706 = vperm.xlu1 %9987, %v563_v23   ;;  %v10002_v19 = vld [vmem:[%s13688_s2 + $0x70] sm:$0xff]   ;;  %v575_v20 = vld [vmem:[%s13689_s3 + $0xf8] sm:$0xff] }
  0x8c   : > { %626 = vperm.xlu0 %9986, %v547_v24   ;;  %v559_v21 = vld [vmem:[%s13689_s3 + $0x78] sm:$0xff] }
  0x8d   : > { %v591_v23 = vld [vmem:[%s13689_s3 + $0x178] sm:$0xff] }
  0x8e   : > { %v10003_v24 = vld [vmem:[%s13688_s2 + $0x78] sm:$0xff]  }
  0x8f   : > { %866 = vperm.xlu1 %9987, %v595_v25  }
  0x90   : > { %9584 = vmatmul.mubr.msk.bf16.gmra.mrb[8].mxu0 %vm1098_vm2, %v9990_v22  ;;  %786 = vperm.xlu0 %9986, %v579_v26   ;;  %v607_v22 = vld [vmem:[%s13689_s3 + $0x1f8] sm:$0xff] }
  0x91   : > { %1267 = vmatprep.mubr.bf16.mxu0 %v13710_v0 }
  0x93   : > { %711 = vperm.xlu1 %9987, %v564_v28  }
  0x94   : > { %631 = vperm.xlu0 %9986, %v548_v29  }
  0x97   : > { %871 = vperm.xlu1 %9987, %v596_v30   ;;  %v10005_v30 = vld [vmem:[%s13688_s2 + $0x88] sm:$0xff]  }
  0x98   : > { %9585 = vmatmul.mubr.msk.bf16.gmra.mrb[12].mxu0 %vm1098_vm2, %v9991_v27  ;;  %791 = vperm.xlu0 %9986, %v580_v31   ;;  %v10004_v27 = vld [vmem:[%s13688_s2 + $0x80] sm:$0xff]  }
  0x99   : > { %1277 = vmatprep.mubr.bf16.mxu0 %v13710_v0 }
  0x9b   : > { %716 = vperm.xlu1 %9987, %v565_v33   ;;  %v10006_v33 = vld [vmem:[%s13688_s2 + $0x90] sm:$0xff]  }
  0x9c   : > { %636 = vperm.xlu0 %9986, %v549_v34  }
  0x9f   : > { %876 = vperm.xlu1 %9987, %v597_v35  }
  0xa0   : > { %9586 = vmatmul.mubr.msk.bf16.gmra.mrb[16].mxu0 %vm1098_vm2, %v9992_v32  ;;  %796 = vperm.xlu0 %9986, %v581_v36   ;;  %v10007_v36 = vld [vmem:[%s13688_s2 + $0x98] sm:$0xff]  }
  0xa1   : > { %1287 = vmatprep.mubr.bf16.mxu0 %v13710_v0 }
  0xa3   : > { %721 = vperm.xlu1 %9987, %v566_v38  }
  0xa4   : > { %641 = vperm.xlu0 %9986, %v550_v39  }
  0xa7   : > { %881 = vperm.xlu1 %9987, %v598_v40   ;;  %v10008_v40 = vld [vmem:[%s13688_s2 + $0xa0] sm:$0xff]  }
  0xa8   : > { %9587 = vmatmul.mubr.msk.bf16.gmra.mrb[20].mxu0 %vm1098_vm2, %v9993_v37  ;;  %801 = vperm.xlu0 %9986, %v582_v41  }
  0xa9   : > { %1297 = vmatprep.mubr.bf16.mxu0 %v13710_v0 }
  0xab   : > { %726 = vperm.xlu1 %9987, %v567_v43  }
  0xac   : > { %646 = vperm.xlu0 %9986, %v551_v44   ;;  %v10009_v44 = vld [vmem:[%s13688_s2 + $0xa8] sm:$0xff]  }
  0xaf   : > { %886 = vperm.xlu1 %9987, %v599_v45  }
  0xb0   : > { %9588 = vmatmul.mubr.msk.bf16.gmra.mrb[24].mxu0 %vm1098_vm2, %v9994_v42  ;;  %806 = vperm.xlu0 %9986, %v583_v46  }
  0xb1   : > { %1307 = vmatprep.mubr.bf16.mxu0 %v13710_v0 }
  0xb3   : > { %731 = vperm.xlu1 %9987, %v568_v48  }
  0xb4   : > { %651 = vperm.xlu0 %9986, %v552_v49   ;;  %v10010_v49 = vld [vmem:[%s13688_s2 + $0xb0] sm:$0xff]  }
  0xb7   : > { %891 = vperm.xlu1 %9987, %v600_v50  }
  0xb8   : > { %9589 = vmatmul.mubr.msk.bf16.gmra.mrb[28].mxu0 %vm1098_vm2, %v9995_v47  ;;  %811 = vperm.xlu0 %9986, %v584_v51  }
  0xb9   : > { %1317 = vmatprep.mubr.bf16.mxu0 %v13710_v0 }
  0xbb   : > { %736 = vperm.xlu1 %9987, %v569_v53   ;;  %v10011_v53 = vld [vmem:[%s13688_s2 + $0xb8] sm:$0xff]  }
  0xbc   : > { %656 = vperm.xlu0 %9986, %v553_v54  }
  0xbf   : > { %896 = vperm.xlu1 %9987, %v601_v55  }
  0xc0   : > { %9590 = vmatmul.mubr.msk.bf16.gmra.mrb[32].mxu0 %vm1098_vm2, %v9996_v52  ;;  %816 = vperm.xlu0 %9986, %v585_v56   ;;  %v10012_v56 = vld [vmem:[%s13688_s2 + $0xc0] sm:$0xff]  }
  0xc1   : > { %1327 = vmatprep.mubr.bf16.mxu0 %v13710_v0 }
  0xc3   : > { %741 = vperm.xlu1 %9987, %v570_v58  }
  0xc4   : > { %661 = vperm.xlu0 %9986, %v554_v59  }
  0xc7   : > { %901 = vperm.xlu1 %9987, %v602_v60   ;;  %v10013_v60 = vld [vmem:[%s13688_s2 + $0xc8] sm:$0xff]  }
  0xc8   : > { %9591 = vmatmul.mubr.msk.bf16.gmra.mrb[36].mxu0 %vm1098_vm2, %v9997_v57  ;;  %821 = vperm.xlu0 %9986, %v586_v61  }
  0xc9   : > { %1337 = vmatprep.mubr.bf16.mxu0 %v13710_v0 }
  0xcb   : > { %746 = vperm.xlu1 %9987, %v571_v63  }
  0xcc   : > { %666 = vperm.xlu0 %9986, %v555_v1   ;;  %v10014_v1 = vld [vmem:[%s13688_s2 + $0xd0] sm:$0xff]  }
  0xcf   : > { %906 = vperm.xlu1 %9987, %v603_v2  }
  0xd0   : > { %9592 = vmatmul.mubr.msk.bf16.gmra.mrb[40].mxu0 %vm1098_vm2, %v9998_v62  ;;  %826 = vperm.xlu0 %9986, %v587_v3  }
  0xd1   : > { %1347 = vmatprep.mubr.bf16.mxu0 %v13710_v0 }
  0xd3   : > { %751 = vperm.xlu1 %9987, %v572_v5  }
  0xd4   : > { %671 = vperm.xlu0 %9986, %v556_v6  }
  0xd7   : > { %911 = vperm.xlu1 %9987, %v604_v7   ;;  %v10015_v7 = vld [vmem:[%s13688_s2 + $0xd8] sm:$0xff]  }
  0xd8   : > { %9593 = vmatmul.mubr.msk.bf16.gmra.mrb[44].mxu0 %vm1098_vm2, %v9999_v4  ;;  %831 = vperm.xlu0 %9986, %v588_v8  }
  0xd9   : > { %1357 = vmatprep.mubr.bf16.mxu0 %v13710_v0 }
  0xdb   : > { %756 = vperm.xlu1 %9987, %v573_v10  }
  0xdc   : > { %676 = vperm.xlu0 %9986, %v557_v11  }
  0xdf   : > { %916 = vperm.xlu1 %9987, %v605_v12  }
  0xe0   : > { %9594 = vmatmul.mubr.msk.bf16.gmra.mrb[48].mxu0 %vm1098_vm2, %v10000_v9  ;;  %836 = vperm.xlu0 %9986, %v589_v13  }
  0xe1   : > { %1367 = vmatprep.mubr.bf16.mxu0 %v13710_v0 }
  0xe3   : > { %761 = vperm.xlu1 %9987, %v574_v15  }
  0xe4   : > { %681 = vperm.xlu0 %9986, %v558_v16  }
  0xe7   : > { %921 = vperm.xlu1 %9987, %v606_v17  }
  0xe8   : > { %9595 = vmatmul.mubr.msk.bf16.gmra.mrb[52].mxu0 %vm1098_vm2, %v10001_v14  ;;  %841 = vperm.xlu0 %9986, %v590_v18  }
  0xe9   : > { %1377 = vmatprep.mubr.bf16.mxu0 %v13710_v0 }
  0xeb   : > { %766 = vperm.xlu1 %9987, %v575_v20  }
  0xec   : > { %686 = vperm.xlu0 %9986, %v559_v21  }
  0xef   : > { %926 = vperm.xlu1 %9987, %v607_v22  }
  0xf0   : > { %9596 = vmatmul.mubr.msk.bf16.gmra.mrb[56].mxu0 %vm1098_vm2, %v10002_v19  ;;  %846 = vperm.xlu0 %9986, %v591_v23  }
  0xf1   : > { %1387 = vmatprep.mubr.bf16.mxu0 %v13710_v0 }
  0xf2   : > { %v11008_v38 = vpop.permute.xlu1 %691 }
  0xf3   : > { %v10969_v25 = vpop.permute.xlu0 %611 }
  0xf6   : > { %v11016_v41 = vpop.permute.xlu1 %696 }
  0xf7   : > { %v10973_v26 = vpop.permute.xlu0 %616 }
  0xf8   : > { %9597 = vmatmul.mubr.msk.bf16.gmra.mrb[60].mxu0 %vm1098_vm2, %v10003_v24 }
  0xf9   : > { %1397 = vmatprep.mubr.bf16.mxu0 %v13710_v0 }
  0xfa   : > { %v11027_v45 = vpop.permute.xlu1 %776 }
  0xfb   : > { %v10978_v28 = vpop.permute.xlu0 %771 }
  0xfe   : > { %v11033_v47 = vpop.permute.xlu1 %856 }
  0xff   : > { %v10982_v29 = vpop.permute.xlu0 %851 }
 0x100   : > { %9598 = vmatmul.mubr.msk.bf16.gmra.mrb[64].mxu0 %vm1098_vm2, %v10004_v27 }
 0x101   : > { %1407 = vmatprep.mubr.bf16.mxu0 %v13710_v0 }
 0x102   : > { %v11043_v51 = vpop.permute.xlu1 %701 }
 0x103   : > { %v10987_v31 = vpop.permute.xlu0 %621 }
 0x106   : > { %v11051_v54 = vpop.permute.xlu1 %861 }
 0x107   : > { %v10991_v32 = vpop.permute.xlu0 %781 }
 0x108   : > { %9599 = vmatmul.mubr.msk.bf16.gmra.mrb[68].mxu0 %vm1098_vm2, %v10005_v30 }
 0x109   : > { %1417 = vmatprep.mubr.bf16.mxu0 %v13710_v0 }
 0x10a   : > { %v11060_v57 = vpop.permute.xlu1 %706 }
 0x10b   : > { %v10996_v34 = vpop.permute.xlu0 %626 }
 0x10e   : > { %v11066_v59 = vpop.permute.xlu1 %866 }
 0x10f   : > { %v11000_v35 = vpop.permute.xlu0 %786 }
 0x110   : > { %9600 = vmatmul.mubr.msk.bf16.gmra.mrb[72].mxu0 %vm1098_vm2, %v10006_v33 }
 0x111   : > { %1427 = vmatprep.mubr.bf16.mxu0 %v13710_v0 }
 0x112   : > { %v11074_v62 = vpop.permute.xlu1 %711 }
 0x113   : > { %v11005_v37 = vpop.permute.xlu0 %631 }
 0x116   : > { %v11082_v2 = vpop.permute.xlu1 %871 }
 0x117   : > { %v11011_v39 = vpop.permute.xlu0 %791 }
 0x118   : > { %9601 = vmatmul.mubr.msk.bf16.gmra.mrb[76].mxu0 %vm1098_vm2, %v10007_v36 }
 0x119   : > { %1437 = vmatprep.mubr.bf16.mxu0 %v13710_v0 }
 0x11a   : > { %v11092_v8 = vpop.permute.xlu1 %716 }
 0x11b   : > { %v11018_v42 = vpop.permute.xlu0 %636 }
 0x11e   : > { %v11101_v20 = vpop.permute.xlu1 %876 }
 0x11f   : > { %v11022_v43 = vpop.permute.xlu0 %796 }
 0x120   : > { %9602 = vmatmul.mubr.msk.bf16.gmra.mrb[80].mxu0 %vm1098_vm2, %v10008_v40 }
 0x121   : > { %1447 = vmatprep.mubr.bf16.mxu0 %v13710_v0 }
 0x123   : > { %v11029_v46 = vpop.permute.xlu0 %641 }
 0x127   : > { %v11035_v48 = vpop.permute.xlu0 %801 }
 0x128   : > { %9603 = vmatmul.mubr.msk.bf16.gmra.mrb[84].mxu0 %vm1098_vm2, %v10009_v44 }
 0x129   : > { %1457 = vmatprep.mubr.bf16.mxu0 %v13710_v0 }
 0x12b   : > { %v11040_v50 = vpop.permute.xlu0 %646 }
 0x12f   : > { %v11046_v52 = vpop.permute.xlu0 %806 }
 0x130   : > { %9604 = vmatmul.mubr.msk.bf16.gmra.mrb[88].mxu0 %vm1098_vm2, %v10010_v49 }
 0x131   : > { %1467 = vmatprep.mubr.bf16.mxu0 %v13710_v0 }
 0x133   : > { %v11054_v55 = vpop.permute.xlu0 %651 }
 0x137   : > { %v11062_v58 = vpop.permute.xlu0 %811 }
 0x138   : > { %9605 = vmatmul.mubr.msk.bf16.gmra.mrb[92].mxu0 %vm1098_vm2, %v10011_v53 }
 0x139   : > { %1477 = vmatprep.mubr.bf16.mxu0 %v13710_v0 }
 0x13b   : > { %v11071_v61 = vpop.permute.xlu0 %656 }
 0x13f   : > { %v11077_v63 = vpop.permute.xlu0 %816 }
 0x140   : > { %9606 = vmatmul.mubr.msk.bf16.gmra.mrb[96].mxu0 %vm1098_vm2, %v10012_v56  ;;  %v11113_v56 = vpop.permute.xlu1 %721 }
 0x141   : > { %1487 = vmatprep.mubr.bf16.mxu0 %v13710_v0 }
 0x143   : > { %v11085_v3 = vpop.permute.xlu0 %661 }
 0x147   : > { %v11096_v14 = vpop.permute.xlu0 %821 }
 0x148   : > { %9607 = vmatmul.mubr.msk.bf16.gmra.mrb[100].mxu0 %vm1098_vm2, %v10013_v60 }
 0x149   : > { %1497 = vmatprep.mubr.bf16.mxu0 %v13710_v0 }
 0x150   : > { %9608 = vmatmul.mubr.msk.bf16.gmra.mrb[104].mxu0 %vm1098_vm2, %v10014_v1 }
 0x151   : > { %1507 = vmatprep.mubr.bf16.mxu0 %v13710_v0 }
 0x153   : > { %v1239_v4 = vpop.f32.mrb[0].mxu0 }
 0x154   : > { %v1240_v5 = vadd.f32 %v1239_v4, %v10969_v25  ;;  %v1241_v6 = vpop.f32.mrb[1].mxu0 }
 0x155   : > { %v1242_v9 = vadd.f32 %v1241_v6, %v10969_v25  ;;  %v1243_v10 = vpop.f32.mrb[2].mxu0  ;;  %v10016_v25 = vld [vmem:[%s13688_s2 + $0xe0] sm:$0xff]  }
 0x156   : > { %v1558_v11 = vmax.f32 %v1240_v5, 0.0  ;;  %v1244_v12 = vadd.f32 %v1243_v10, %v10973_v26  ;;  %v1245_v13 = vpop.f32.mrb[3].mxu0 }
 0x157   : > { %v1559_v15 = vmax.f32 %v1242_v9, 0.0  ;;  %v1246_v16 = vadd.f32 %v1245_v13, %v10973_v26  ;;  %v11107_v26 = vpop.permute.xlu0 %666 }
 0x158   : > { %v1560_v17 = vmax.f32 %v1244_v12, 0.0  ;;  %9609 = vmatmul.mubr.msk.bf16.gmra.mrb[108].mxu0 %vm1098_vm2, %v10015_v7 }
 0x159   : > { %v1561_v18 = vmax.f32 %v1246_v16, 0.0  ;;  %v1687_v19 = vadd.f32 %v1559_v15, %v1558_v11  ;;  %1517 = vmatprep.mubr.bf16.mxu0 %v13710_v0  ;;  %v11124_v15 = vpop.permute.xlu1 %881 }
 0x15b   : > { %v1249_v21 = vpop.f32.mrb[4].mxu0  ;;  %1688 = vadd.xlane.f32.xlu0 %v1687_v19  ;;  %v1690_v22 = vadd.f32 %v1561_v18, %v1560_v17  ;;  %v11116_v4 = vpop.permute.xlu0 %826 }
 0x15c   : > { %v1250_v23 = vadd.f32 %v1249_v21, %v10987_v31  ;;  %v1251_v24 = vpop.f32.mrb[5].mxu0 }
 0x15d   : > { %v1252_v27 = vadd.f32 %v1251_v24, %v10987_v31  ;;  %v1253_v30 = vpop.f32.mrb[6].mxu0  ;;  %1691 = vadd.xlane.f32.xlu1 %v1690_v22 }
 0x15e   : > { %v1562_v33 = vmax.f32 %v1250_v23, 0.0  ;;  %v1254_v36 = vadd.f32 %v1253_v30, %v10996_v34  ;;  %v1255_v40 = vpop.f32.mrb[7].mxu0 }
 0x15f   : > { %v1563_v44 = vmax.f32 %v1252_v27, 0.0  ;;  %v1256_v49 = vadd.f32 %v1255_v40, %v10996_v34  ;;  %v10017_v34 = vld [vmem:[%s13688_s2 + $0xe8] sm:$0xff]   ;;  %v11128_v19 = vpop.permute.xlu0 %671  ;;  %v11135_v27 = vpop.permute.xlu1 %726 }
 0x160   : > { %v1564_v53 = vmax.f32 %v1254_v36, 0.0  ;;  %9610 = vmatmul.mubr.msk.bf16.gmra.mrb[112].mxu0 %vm1098_vm2, %v10016_v25 }
 0x161   : > { %v1565_v60 = vmax.f32 %v1256_v49, 0.0  ;;  %v1693_v1 = vadd.f32 %v1563_v44, %v1562_v33  ;;  %1527 = vmatprep.mubr.bf16.mxu0 %v13710_v0 }
 0x163   : > { %v1259_v31 = vpop.f32.mrb[8].mxu0  ;;  %1694 = vadd.xlane.f32.xlu1 %v1693_v1  ;;  %v1696_v5 = vadd.f32 %v1565_v60, %v1564_v53  ;;  %v11139_v49 = vpop.permute.xlu0 %831 }
 0x164   : > { %v1260_v6 = vadd.f32 %v1259_v31, %v11005_v37  ;;  %v1261_v7 = vpop.f32.mrb[9].mxu0 }
 0x165   : > { %v1262_v9 = vadd.f32 %v1261_v7, %v11005_v37  ;;  %v1263_v10 = vpop.f32.mrb[10].mxu0 }
 0x166   : > { %v1566_v11 = vmax.f32 %v1260_v6, 0.0  ;;  %v1264_v12 = vadd.f32 %v1263_v10, %v11018_v42  ;;  %v1265_v13 = vpop.f32.mrb[11].mxu0  ;;  %v11144_v6 = vpop.permute.xlu1 %886 }
 0x167   : > { %v1567_v16 = vmax.f32 %v1262_v9, 0.0  ;;  %v1266_v17 = vadd.f32 %v1265_v13, %v11018_v42  ;;  %1697 = vadd.xlane.f32.xlu1 %v1696_v5  ;;  %v10018_v42 = vld [vmem:[%s13688_s2 + $0xf0] sm:$0xff]   ;;  %v677_v10 = vpop.permute.xlu0 %676 }
 0x168   : > { %v1568_v18 = vmax.f32 %v1264_v12, 0.0  ;;  %9611 = vmatmul.mubr.msk.bf16.gmra.mrb[116].mxu0 %vm1098_vm2, %v10017_v34 }
 0x169   : > { %v1569_v21 = vmax.f32 %v1266_v17, 0.0  ;;  %v1699_v22 = vadd.f32 %v1567_v16, %v1566_v11  ;;  %1537 = vmatprep.mubr.bf16.mxu0 %v13710_v0 }
 0x16b   : > { %v1269_v37 = vpop.f32.mrb[12].mxu0  ;;  %1700 = vadd.xlane.f32.xlu1 %v1699_v22  ;;  %v1702_v23 = vadd.f32 %v1569_v21, %v1568_v18 }
 0x16c   : > { %v1270_v24 = vadd.f32 %v1269_v37, %v11029_v46  ;;  %v1271_v25 = vpop.f32.mrb[13].mxu0  ;;  %v11154_v37 = vpop.permute.xlu1 %731 }
 0x16d   : > { %v1272_v30 = vadd.f32 %v1271_v25, %v11029_v46  ;;  %v1273_v33 = vpop.f32.mrb[14].mxu0  ;;  %v11156_v25 = vpop.permute.xlu0 %836 }
 0x16e   : > { %v1570_v36 = vmax.f32 %v1270_v24, 0.0  ;;  %v1274_v40 = vadd.f32 %v1273_v33, %v11040_v50  ;;  %v1275_v44 = vpop.f32.mrb[15].mxu0 }
 0x16f   : > { %v1571_v53 = vmax.f32 %v1272_v30, 0.0  ;;  %v1276_v60 = vadd.f32 %v1275_v44, %v11040_v50  ;;  %1703 = vadd.xlane.f32.xlu1 %v1702_v23  ;;  %v10019_v50 = vld [vmem:[%s13688_s2 + $0xf8] sm:$0xff]  }
 0x170   : > { %v1572_v1 = vmax.f32 %v1274_v40, 0.0  ;;  %9612 = vmatmul.mubr.msk.bf16.gmra.mrb[120].mxu0 %vm1098_vm2, %v10018_v42 }
 0x171   : > { %v1573_v31 = vmax.f32 %v1276_v60, 0.0  ;;  %v1705_v5 = vadd.f32 %v1571_v53, %v1570_v36  ;;  %1547 = vmatprep.mubr.bf16.mxu0 %v13710_v0  ;;  %v11161_v60 = vpop.permute.xlu1 %891 }
 0x173   : > { %v1279_v46 = vpop.f32.mrb[16].mxu0  ;;  %1706 = vadd.xlane.f32.xlu1 %v1705_v5  ;;  %v1708_v7 = vadd.f32 %v1573_v31, %v1572_v1 }
 0x174   : > { %v1280_v34 = vadd.f32 %v1279_v46, %v11054_v55  ;;  %v1281_v9 = vpop.f32.mrb[17].mxu0  ;;  %v682_v46 = vpop.permute.xlu0 %681 }
 0x175   : > { %v1282_v11 = vadd.f32 %v1281_v9, %v11054_v55  ;;  %v1283_v12 = vpop.f32.mrb[18].mxu0 }
 0x176   : > { %v1574_v13 = vmax.f32 %v1280_v34, 0.0  ;;  %v1284_v16 = vadd.f32 %v1283_v12, %v11071_v61  ;;  %v1285_v17 = vpop.f32.mrb[19].mxu0  ;;  %v11165_v12 = vpop.permute.xlu1 %736 }
 0x177   : > { %v1575_v18 = vmax.f32 %v1282_v11, 0.0  ;;  %v1286_v21 = vadd.f32 %v1285_v17, %v11071_v61  ;;  %1709 = vadd.xlane.f32.xlu1 %v1708_v7 }
 0x178   : > { %v1576_v22 = vmax.f32 %v1284_v16, 0.0  ;;  %9613 = vmatmul.mubr.msk.bf16.gmra.mrb[124].mxu0 %vm1098_vm2, %v10019_v50  ;;  %vm7421_vm2 = vcmask 982912  }
 0x179   : > { %v1577_v23 = vmax.f32 %v1286_v21, 0.0  ;;  %v1711_v24 = vadd.f32 %v1575_v18, %v1574_v13 }
 0x17b   : > { %v1289_v42 = vpop.f32.mrb[20].mxu0  ;;  %1712 = vadd.xlane.f32.xlu1 %v1711_v24  ;;  %v1714_v55 = vadd.f32 %v1577_v23, %v1576_v22 }
 0x17c   : > { %v1290_v30 = vadd.f32 %v1289_v42, %v11085_v3  ;;  %v1291_v33 = vpop.f32.mrb[21].mxu0 }
 0x17d   : > { %v1292_v36 = vadd.f32 %v1291_v33, %v11085_v3  ;;  %v1293_v40 = vpop.f32.mrb[22].mxu0 }
 0x17e   : > { %v1578_v61 = vmax.f32 %v1290_v30, 0.0  ;;  %v1294_v44 = vadd.f32 %v1293_v40, %v11107_v26  ;;  %v1295_v53 = vpop.f32.mrb[23].mxu0  ;;  %v11170_v30 = vpop.permute.xlu1 %896 }
 0x17f   : > { %v1579_v1 = vmax.f32 %v1292_v36, 0.0  ;;  %v1296_v31 = vadd.f32 %v1295_v53, %v11107_v26  ;;  %1715 = vadd.xlane.f32.xlu1 %v1714_v55  ;;  %v11168_v26 = vpop.permute.xlu0 %841 }
 0x180   : > { %v1580_v5 = vmax.f32 %v1294_v44, 0.0 }
 0x181   : > { %v1581_v7 = vmax.f32 %v1296_v31, 0.0  ;;  %v1717_v34 = vadd.f32 %v1579_v1, %v1578_v61 }
 0x183   : > { %v1299_v9 = vpop.f32.mrb[24].mxu0  ;;  %1718 = vadd.xlane.f32.xlu1 %v1717_v34  ;;  %v1720_v50 = vadd.f32 %v1581_v7, %v1580_v5 }
 0x184   : > { %v1300_v3 = vadd.f32 %v1299_v9, %v11128_v19  ;;  %v1301_v11 = vpop.f32.mrb[25].mxu0  ;;  %v11172_v9 = vpop.permute.xlu1 %741 }
 0x185   : > { %v1302_v13 = vadd.f32 %v1301_v11, %v11128_v19  ;;  %v1303_v16 = vpop.f32.mrb[26].mxu0  ;;  %v687_v19 = vpop.permute.xlu0 %686 }
 0x186   : > { %v1582_v17 = vmax.f32 %v1300_v3, 0.0  ;;  %v1304_v18 = vadd.f32 %v1303_v16, %v677_v10  ;;  %v1305_v21 = vpop.f32.mrb[27].mxu0 }
 0x187   : > { %v1583_v22 = vmax.f32 %v1302_v13, 0.0  ;;  %v1306_v23 = vadd.f32 %v1305_v21, %v677_v10  ;;  %1721 = vadd.xlane.f32.xlu1 %v1720_v50 }
 0x188   : > { %v1584_v24 = vmax.f32 %v1304_v18, 0.0 }
 0x189   : > { %v1585_v42 = vmax.f32 %v1306_v23, 0.0  ;;  %v1723_v55 = vadd.f32 %v1583_v22, %v1582_v17 }
 0x18b   : > { %v1309_v33 = vpop.f32.mrb[28].mxu0  ;;  %1724 = vadd.xlane.f32.xlu1 %v1723_v55  ;;  %v1726_v36 = vadd.f32 %v1585_v42, %v1584_v24  ;;  %v11177_v24 = vpop.permute.xlu1 %901 }
 0x18c   : > { %v1310_v40 = vadd.f32 %v1309_v33, %v682_v46  ;;  %v1311_v61 = vpop.f32.mrb[29].mxu0 }
 0x18d   : > { %v1312_v44 = vadd.f32 %v1311_v61, %v682_v46  ;;  %v1313_v53 = vpop.f32.mrb[30].mxu0 }
 0x18e   : > { %v1586_v1 = vmax.f32 %v1310_v40, 0.0  ;;  %v1314_v31 = vadd.f32 %v1313_v53, %v687_v19  ;;  %v1315_v5 = vpop.f32.mrb[31].mxu0 }
 0x18f   : > { %v1587_v7 = vmax.f32 %v1312_v44, 0.0  ;;  %v1316_v34 = vadd.f32 %v1315_v5, %v687_v19  ;;  %1727 = vadd.xlane.f32.xlu1 %v1726_v36  ;;  %v11181_v53 = vpop.permute.xlu1 %746 }
 0x190   : > { %v1588_v10 = vmax.f32 %v1314_v31, 0.0 }
 0x191   : > { %v1589_v50 = vmax.f32 %v1316_v34, 0.0  ;;  %v1729_v3 = vadd.f32 %v1587_v7, %v1586_v1 }
 0x193   : > { %v1319_v11 = vpop.f32.mrb[32].mxu0  ;;  %1730 = vadd.xlane.f32.xlu1 %v1729_v3  ;;  %v1732_v13 = vadd.f32 %v1589_v50, %v1588_v10 }
 0x194   : > { %v1320_v16 = vadd.f32 %v1319_v11, %v11008_v38  ;;  %v1321_v17 = vpop.f32.mrb[33].mxu0 }
 0x195   : > { %v1322_v46 = vadd.f32 %v1321_v17, %v11008_v38  ;;  %v1323_v18 = vpop.f32.mrb[34].mxu0 }
 0x196   : > { %v1590_v21 = vmax.f32 %v1320_v16, 0.0  ;;  %v1324_v22 = vadd.f32 %v1323_v18, %v11016_v41  ;;  %v1325_v23 = vpop.f32.mrb[35].mxu0 }
 0x197   : > { %v1591_v42 = vmax.f32 %v1322_v46, 0.0  ;;  %v1326_v55 = vadd.f32 %v1325_v23, %v11016_v41  ;;  %1733 = vadd.xlane.f32.xlu1 %v1732_v13  ;;  %v11186_v13 = vpop.permute.xlu1 %906 }
 0x198   : > { %v1592_v33 = vmax.f32 %v1324_v22, 0.0 }
 0x199   : > { %v1593_v36 = vmax.f32 %v1326_v55, 0.0  ;;  %v1735_v40 = vadd.f32 %v1591_v42, %v1590_v21 }
 0x19b   : > { %v1329_v61 = vpop.f32.mrb[36].mxu0  ;;  %1736 = vadd.xlane.f32.xlu0 %v1735_v40  ;;  %v1738_v19 = vadd.f32 %v1593_v36, %v1592_v33  ;;  %v752_v36 = vpop.permute.xlu1 %751 }
 0x19c   : > { %v1330_v44 = vadd.f32 %v1329_v61, %v11043_v51  ;;  %v1331_v38 = vpop.f32.mrb[37].mxu0 }
 0x19d   : > { %v1332_v1 = vadd.f32 %v1331_v38, %v11043_v51  ;;  %v1333_v31 = vpop.f32.mrb[38].mxu0 }
 0x19e   : > { %v1594_v5 = vmax.f32 %v1330_v44, 0.0  ;;  %v1334_v7 = vadd.f32 %v1333_v31, %v11060_v57  ;;  %v1335_v34 = vpop.f32.mrb[39].mxu0 }
 0x19f   : > { %v1595_v41 = vmax.f32 %v1332_v1, 0.0  ;;  %v1336_v10 = vadd.f32 %v1335_v34, %v11060_v57  ;;  %1739 = vadd.xlane.f32.xlu0 %v1738_v19 }
 0x1a0   : > { %v1596_v50 = vmax.f32 %v1334_v7, 0.0 }
 0x1a1   : > { %v1597_v3 = vmax.f32 %v1336_v10, 0.0  ;;  %v1741_v11 = vadd.f32 %v1595_v41, %v1594_v5  ;;  %v11195_v41 = vpop.permute.xlu1 %911 }
 0x1a3   : > { %v1339_v16 = vpop.f32.mrb[40].mxu0  ;;  %1742 = vadd.xlane.f32.xlu0 %v1741_v11  ;;  %v1744_v17 = vadd.f32 %v1597_v3, %v1596_v50 }
 0x1a4   : > { %v1340_v46 = vadd.f32 %v1339_v16, %v11074_v62  ;;  %v1341_v51 = vpop.f32.mrb[41].mxu0 }
 0x1a5   : > { %v1342_v18 = vadd.f32 %v1341_v51, %v11074_v62  ;;  %v1343_v21 = vpop.f32.mrb[42].mxu0  ;;  %v757_v51 = vpop.permute.xlu1 %756 }
 0x1a6   : > { %v1598_v22 = vmax.f32 %v1340_v46, 0.0  ;;  %v1344_v23 = vadd.f32 %v1343_v21, %v11092_v8  ;;  %v1345_v42 = vpop.f32.mrb[43].mxu0 }
 0x1a7   : > { %v1599_v57 = vmax.f32 %v1342_v18, 0.0  ;;  %v1346_v55 = vadd.f32 %v1345_v42, %v11092_v8  ;;  %1745 = vadd.xlane.f32.xlu0 %v1744_v17 }
 0x1a8   : > { %v1600_v33 = vmax.f32 %v1344_v23, 0.0 }
 0x1a9   : > { %v1601_v40 = vmax.f32 %v1346_v55, 0.0  ;;  %v1747_v61 = vadd.f32 %v1599_v57, %v1598_v22 }
 0x1ab   : > { %v1349_v19 = vpop.f32.mrb[44].mxu0  ;;  %1748 = vadd.xlane.f32.xlu0 %v1747_v61  ;;  %v1750_v44 = vadd.f32 %v1601_v40, %v1600_v33  ;;  %v11202_v61 = vpop.permute.xlu1 %916 }
 0x1ac   : > { %v1350_v38 = vadd.f32 %v1349_v19, %v11113_v56  ;;  %v1351_v1 = vpop.f32.mrb[45].mxu0 }
 0x1ad   : > { %v1352_v62 = vadd.f32 %v1351_v1, %v11113_v56  ;;  %v1353_v31 = vpop.f32.mrb[46].mxu0 }
 0x1ae   : > { %v1602_v5 = vmax.f32 %v1350_v38, 0.0  ;;  %v1354_v7 = vadd.f32 %v1353_v31, %v11135_v27  ;;  %v1355_v34 = vpop.f32.mrb[47].mxu0 }
 0x1af   : > { %v1603_v8 = vmax.f32 %v1352_v62, 0.0  ;;  %v1356_v10 = vadd.f32 %v1355_v34, %v11135_v27  ;;  %1751 = vadd.xlane.f32.xlu0 %v1750_v44 }
 0x1b0   : > { %v1604_v50 = vmax.f32 %v1354_v7, 0.0 }
 0x1b1   : > { %v1605_v3 = vmax.f32 %v1356_v10, 0.0  ;;  %v1753_v11 = vadd.f32 %v1603_v8, %v1602_v5  ;;  %v762_v10 = vpop.permute.xlu1 %761 }
 0x1b3   : > { %v1359_v16 = vpop.f32.mrb[48].mxu0  ;;  %1754 = vadd.xlane.f32.xlu0 %v1753_v11  ;;  %v1756_v17 = vadd.f32 %v1605_v3, %v1604_v50 }
 0x1b4   : > { %v1360_v46 = vadd.f32 %v1359_v16, %v11154_v37  ;;  %v1361_v56 = vpop.f32.mrb[49].mxu0 }
 0x1b5   : > { %v1362_v18 = vadd.f32 %v1361_v56, %v11154_v37  ;;  %v1363_v21 = vpop.f32.mrb[50].mxu0 }
 0x1b6   : > { %v1606_v22 = vmax.f32 %v1360_v46, 0.0  ;;  %v1364_v23 = vadd.f32 %v1363_v21, %v11165_v12  ;;  %v1365_v42 = vpop.f32.mrb[51].mxu0 }
 0x1b7   : > { %v1607_v57 = vmax.f32 %v1362_v18, 0.0  ;;  %v1366_v27 = vadd.f32 %v1365_v42, %v11165_v12  ;;  %1757 = vadd.xlane.f32.xlu0 %v1756_v17 }
 0x1b8   : > { %v1608_v55 = vmax.f32 %v1364_v23, 0.0  ;;  %v11208_v23 = vpop.permute.xlu1 %921 }
 0x1b9   : > { %v1609_v33 = vmax.f32 %v1366_v27, 0.0  ;;  %v1759_v40 = vadd.f32 %v1607_v57, %v1606_v22 }
 0x1bb   : > { %v1369_v19 = vpop.f32.mrb[52].mxu0  ;;  %1760 = vadd.xlane.f32.xlu0 %v1759_v40  ;;  %v1762_v44 = vadd.f32 %v1609_v33, %v1608_v55 }
 0x1bc   : > { %v1370_v38 = vadd.f32 %v1369_v19, %v11172_v9  ;;  %v1371_v37 = vpop.f32.mrb[53].mxu0 }
 0x1bd   : > { %v1372_v1 = vadd.f32 %v1371_v37, %v11172_v9  ;;  %v1373_v62 = vpop.f32.mrb[54].mxu0 }
 0x1be   : > { %v1610_v31 = vmax.f32 %v1370_v38, 0.0  ;;  %v1374_v5 = vadd.f32 %v1373_v62, %v11181_v53  ;;  %v1375_v7 = vpop.f32.mrb[55].mxu0  ;;  %v767_v38 = vpop.permute.xlu1 %766 }
 0x1bf   : > { %v1611_v12 = vmax.f32 %v1372_v1, 0.0  ;;  %v1376_v34 = vadd.f32 %v1375_v7, %v11181_v53  ;;  %1763 = vadd.xlane.f32.xlu0 %v1762_v44 }
 0x1c0   : > { %v1612_v8 = vmax.f32 %v1374_v5, 0.0 }
 0x1c1   : > { %v1613_v50 = vmax.f32 %v1376_v34, 0.0  ;;  %v1765_v3 = vadd.f32 %v1611_v12, %v1610_v31 }
 0x1c3   : > { %v1379_v11 = vpop.f32.mrb[56].mxu0  ;;  %1766 = vadd.xlane.f32.xlu0 %v1765_v3  ;;  %v1768_v16 = vadd.f32 %v1613_v50, %v1612_v8 }
 0x1c4   : > { %v1380_v17 = vadd.f32 %v1379_v11, %v752_v36  ;;  %v1381_v46 = vpop.f32.mrb[57].mxu0 }
 0x1c5   : > { %v1382_v56 = vadd.f32 %v1381_v46, %v752_v36  ;;  %v1383_v9 = vpop.f32.mrb[58].mxu0 }
 0x1c6   : > { %v1614_v18 = vmax.f32 %v1380_v17, 0.0  ;;  %v1384_v21 = vadd.f32 %v1383_v9, %v757_v51  ;;  %v1385_v22 = vpop.f32.mrb[59].mxu0 }
 0x1c7   : > { %v1615_v42 = vmax.f32 %v1382_v56, 0.0  ;;  %v1386_v57 = vadd.f32 %v1385_v22, %v757_v51  ;;  %1769 = vadd.xlane.f32.xlu0 %v1768_v16 }
 0x1c8   : > { %v1616_v53 = vmax.f32 %v1384_v21, 0.0 }
 0x1c9   : > { %v1617_v27 = vmax.f32 %v1386_v57, 0.0  ;;  %v1771_v55 = vadd.f32 %v1615_v42, %v1614_v18 }
 0x1cb   : > { %v1389_v33 = vpop.f32.mrb[60].mxu0  ;;  %1772 = vadd.xlane.f32.xlu0 %v1771_v55  ;;  %v1774_v40 = vadd.f32 %v1617_v27, %v1616_v53 }
 0x1cc   : > { %v1390_v19 = vadd.f32 %v1389_v33, %v762_v10  ;;  %v1391_v44 = vpop.f32.mrb[61].mxu0  ;;  %v13712_v33 = vlaneseq }
 0x1cd   : > { %v1392_v37 = vadd.f32 %v1391_v44, %v762_v10  ;;  %v1393_v36 = vpop.f32.mrb[62].mxu0 }
 0x1ce   : > { %v1618_v1 = vmax.f32 %v1390_v19, 0.0  ;;  %v1394_v62 = vadd.f32 %v1393_v36, %v767_v38  ;;  %v1395_v31 = vpop.f32.mrb[63].mxu0 }
 0x1cf   : > { %v1619_v5 = vmax.f32 %v1392_v37, 0.0  ;;  %v1396_v7 = vadd.f32 %v1395_v31, %v767_v38  ;;  %1775 = vadd.xlane.f32.xlu0 %v1774_v40 }
 0x1d0   : > { %v1620_v12 = vmax.f32 %v1394_v62, 0.0  ;;  %v10483_v62 = vmov 1966171168  }
 0x1d1   : > { %v1621_v51 = vmax.f32 %v1396_v7, 0.0  ;;  %v1777_v34 = vadd.f32 %v1619_v5, %v1618_v1  ;;  %v11219_v1 = vshrl.u32 %v13712_v33, 7  ;;  %v3996_v31 = vunpack.c.l.s4 %v10483_v62 }
 0x1d3   : > { %v1399_v8 = vpop.f32.mrb[64].mxu0  ;;  %1778 = vadd.xlane.f32.xlu0 %v1777_v34  ;;  %v1780_v50 = vadd.f32 %v1621_v51, %v1620_v12  ;;  %13763 = vst [vmem:[#allocation20_spill] sm:$0xff] %v11219_v1 }
 0x1d4   : > { %v1400_v3 = vadd.f32 %v1399_v8, %v10978_v28  ;;  %v1401_v11 = vpop.f32.mrb[65].mxu0 }
 0x1d5   : > { %v1402_v16 = vadd.f32 %v1401_v11, %v10978_v28  ;;  %v1403_v17 = vpop.f32.mrb[66].mxu0 }
 0x1d6   : > { %v1622_v10 = vmax.f32 %v1400_v3, 0.0  ;;  %v1404_v46 = vadd.f32 %v1403_v17, %v11027_v45  ;;  %v1405_v56 = vpop.f32.mrb[67].mxu0  ;;  %v11232_v17 = vsub.s32 2, %v11219_v1 }
 0x1d7   : > { %v1623_v9 = vmax.f32 %v1402_v16, 0.0  ;;  %v1406_v18 = vadd.f32 %v1405_v56, %v11027_v45  ;;  %1781 = vadd.xlane.f32.xlu0 %v1780_v50  ;;  %v11225_v50 = vsub.s32 0, %v11219_v1  ;;  %v11229_v16 = vsub.s32 1, %v11219_v1 }
 0x1d8   : > { %v1624_v21 = vmax.f32 %v1404_v46, 0.0  ;;  %v11237_v46 = vpop.permute.xlu1 %926 }
 0x1d9   : > { %v1625_v22 = vmax.f32 %v1406_v18, 0.0  ;;  %v1783_v42 = vadd.f32 %v1623_v9, %v1622_v10  ;;  %v11235_v10 = vsub.s32 3, %v11219_v1 }
 0x1db   : > { %v1786_v57 = vadd.f32 %v1625_v22, %v1624_v21  ;;  %v1409_v53 = vpop.f32.mrb[68].mxu0  ;;  %1784 = vadd.xlane.f32.xlu1 %v1783_v42  ;;  %v11241_v21 = vsub.s32 4, %v11219_v1 }
 0x1dc   : > { %v1410_v27 = vadd.f32 %v1409_v53, %v10991_v32  ;;  %v1411_v55 = vpop.f32.mrb[69].mxu0 }
 0x1dd   : > { %v1412_v28 = vadd.f32 %v1411_v55, %v10991_v32  ;;  %v1413_v40 = vpop.f32.mrb[70].mxu0  ;;  %1787 = vadd.xlane.f32.xlu0 %v1786_v57  ;;  %v11221_v32 = vpop.permute.xlu0 %846  ;;  %v11253_v55 = vsub.s32 7, %v11219_v1 }
 0x1de   : > { %v1626_v19 = vmax.f32 %v1410_v27, 0.0  ;;  %v1414_v44 = vadd.f32 %v1413_v40, %v11000_v35  ;;  %v1415_v38 = vpop.f32.mrb[71].mxu0  ;;  %v11250_v27 = vsub.s32 6, %v11219_v1 }
 0x1df   : > { %v1627_v45 = vmax.f32 %v1412_v28, 0.0  ;;  %v1416_v37 = vadd.f32 %v1415_v38, %v11000_v35  ;;  %v3997_v35 = vunpack.c.0.s8 %v3996_v31 }
 0x1e0   : > { %v1628_v36 = vmax.f32 %v1414_v44, 0.0 }
 0x1e1   : > { %v1629_v5 = vmax.f32 %v1416_v37, 0.0  ;;  %v1789_v7 = vadd.f32 %v1627_v45, %v1626_v19  ;;  %v11256_v28 = vsub.s32 %v3997_v35, %v11219_v1 }
 0x1e3   : > { %v1792_v12 = vadd.f32 %v1629_v5, %v1628_v36  ;;  %v1419_v51 = vpop.f32.mrb[72].mxu0  ;;  %1790 = vadd.xlane.f32.xlu1 %v1789_v7 }
 0x1e4   : > { %v1420_v34 = vadd.f32 %v1419_v51, %v11011_v39  ;;  %v1421_v8 = vpop.f32.mrb[73].mxu0 }
 0x1e5   : > { %v1422_v3 = vadd.f32 %v1421_v8, %v11011_v39  ;;  %v1423_v11 = vpop.f32.mrb[74].mxu0  ;;  %v11244_v39 = vsub.s32 5, %v11219_v1 }
 0x1e6   : > { %v1630_v56 = vmax.f32 %v1420_v34, 0.0  ;;  %v1424_v9 = vadd.f32 %v1423_v11, %v11022_v43  ;;  %v1425_v18 = vpop.f32.mrb[75].mxu0 }
 0x1e7   : > { %v1631_v22 = vmax.f32 %v1422_v3, 0.0  ;;  %v1426_v42 = vadd.f32 %v1425_v18, %v11022_v43  ;;  %1793 = vadd.xlane.f32.xlu1 %v1792_v12 }
 0x1e8   : > { %v1632_v57 = vmax.f32 %v1424_v9, 0.0  ;;  %v11247_v53 = vpop.xlane.xlu0 %1688 }
 0x1e9   : > { %v1795_v40 = vadd.f32 %v1631_v22, %v1630_v56  ;;  %v1633_v19 = vmax.f32 %v1426_v42, 0.0  ;;  %v1950_v43 = vrot.slane %v11247_v53, %v11229_v16 }
 0x1ea   : > { %v1692_v38 = vpop.xlane.xlu1 %1691 }
 0x1eb   : > { %v1798_v31 = vadd.f32 %v1633_v19, %v1632_v57  ;;  %v1429_v5 = vpop.f32.mrb[76].mxu0  ;;  %1796 = vadd.xlane.f32.xlu1 %v1795_v40  ;;  %v1978_v7 = vrot.slane %v1692_v38, %v11225_v50  ;;  %v1982_v12 = vrot.slane %v1692_v38, %v11229_v16  ;;  %v1986_v51 = vrot.slane %v1692_v38, %v11232_v17 }
 0x1ec   : > { %v1430_v34 = vadd.f32 %v1429_v5, %v11035_v48  ;;  %v1431_v8 = vpop.f32.mrb[77].mxu0  ;;  %v1990_v35 = vrot.slane %v1692_v38, %v11235_v10  ;;  %v1994_v3 = vrot.slane %v1692_v38, %v11241_v21  ;;  %v1998_v11 = vrot.slane %v1692_v38, %v11244_v39 }
 0x1ed   : > { %v1432_v56 = vadd.f32 %v1431_v8, %v11035_v48  ;;  %v1433_v9 = vpop.f32.mrb[78].mxu0  ;;  %v2002_v18 = vrot.slane %v1692_v38, %v11250_v27  ;;  %v2006_v22 = vrot.slane %v1692_v38, %v11253_v55  ;;  %v4040_v42 = vcombine.low %v1978_v7, %v1982_v12 }
 0x1ee   : > { %v1634_v57 = vmax.f32 %v1430_v34, 0.0  ;;  %v1434_v40 = vadd.f32 %v1433_v9, %v11046_v52  ;;  %v1435_v19 = vpop.f32.mrb[79].mxu0  ;;  %v4041_v5 = vcombine.low %v1986_v51, %v1990_v35  ;;  %v4042_v0 = vcombine.low %v1994_v3, %v1998_v11 }
 0x1ef   : > { %v1635_v33 = vmax.f32 %v1432_v56, 0.0  ;;  %v1436_v36 = vadd.f32 %v1435_v19, %v11046_v52  ;;  %1799 = vadd.xlane.f32.xlu1 %v1798_v31  ;;  %v4043_v62 = vcombine.low %v2002_v18, %v2006_v22  ;;  %v4050_v45 = vrot.slane %v4040_v42, %v11256_v28 }
 0x1f0   : > { %v1636_v48 = vmax.f32 %v1434_v40, 0.0  ;;  %v1695_v8 = vpop.xlane.xlu1 %1694  ;;  %v4057_v37 = vrot.slane %v4041_v5, %v11256_v28  ;;  %v4064_v38 = vrot.slane %v4042_v0, %v11256_v28 }
 0x1f1   : > { %v1801_v12 = vadd.f32 %v1635_v33, %v1634_v57  ;;  %v1637_v34 = vmax.f32 %v1436_v36, 0.0  ;;  %v4071_v51 = vrot.slane %v4043_v62, %v11256_v28  ;;  %v2010_v35 = vrot.slane %v1695_v8, %v11225_v50 }
 0x1f2   : > { %v4072_v52 = vcombine.low %v4050_v45, %v4057_v37  ;;  %v2014_v31 = vrot.slane %v1695_v8, %v11229_v16  ;;  %v2018_v3 = vrot.slane %v1695_v8, %v11232_v17  ;;  %v2022_v11 = vrot.slane %v1695_v8, %v11235_v10 }
 0x1f3   : > { %v1804_v56 = vadd.f32 %v1637_v34, %v1636_v48  ;;  %v1439_v9 = vpop.f32.mrb[80].mxu0  ;;  %1802 = vadd.xlane.f32.xlu1 %v1801_v12  ;;  %v4073_v0 = vcombine.low %v4064_v38, %v4071_v51  ;;  %v2026_v18 = vrot.slane %v1695_v8, %v11241_v21  ;;  %v2030_v33 = vrot.slane %v1695_v8, %v11244_v39 }
 0x1f4   : > { %v1440_v36 = vadd.f32 %v1439_v9, %v11062_v58  ;;  %v1441_v62 = vpop.f32.mrb[81].mxu0  ;;  %v4080_v22 = vrot.slane %v4072_v52, %v11256_v28  ;;  %v2034_v45 = vrot.slane %v1695_v8, %v11250_v27  ;;  %v2038_v37 = vrot.slane %v1695_v8, %v11253_v55  ;;  %v1698_v38 = vpop.xlane.xlu1 %1697 }
 0x1f5   : > { %v1442_v42 = vadd.f32 %v1441_v62, %v11062_v58  ;;  %v1443_v57 = vpop.f32.mrb[82].mxu0  ;;  %v4087_v40 = vrot.slane %v4073_v0, %v11256_v28  ;;  %v4089_v19 = vcombine.low %v2010_v35, %v2014_v31  ;;  %v4090_v5 = vcombine.low %v2018_v3, %v2022_v11 }
 0x1f6   : > { %v1638_v48 = vmax.f32 %v1440_v36, 0.0  ;;  %v1444_v12 = vadd.f32 %v1443_v57, %v11077_v63  ;;  %v1445_v34 = vpop.f32.mrb[83].mxu0  ;;  %v4091_v51 = vcombine.low %v2026_v18, %v2030_v33  ;;  %v4092_v9 = vcombine.low %v2034_v45, %v2038_v37 }
 0x1f7   : > { %v1639_v7 = vmax.f32 %v1442_v42, 0.0  ;;  %v1446_v52 = vadd.f32 %v1445_v34, %v11077_v63  ;;  %1805 = vadd.xlane.f32.xlu1 %v1804_v56  ;;  %v4088_v44 = vcombine.low %v4080_v22, %v4087_v40  ;;  %v4099_v8 = vrot.slane %v4089_v19, %v11256_v28 }
 0x1f8   : > { %v1640_v58 = vmax.f32 %v1444_v12, 0.0  ;;  %v4106_v62 = vrot.slane %v4090_v5, %v11256_v28  ;;  %v4113_v35 = vrot.slane %v4091_v51, %v11256_v28  ;;  %v4120_v31 = vrot.slane %v4092_v9, %v11256_v28 }
 0x1f9   : > { %v11306_v3 = vadd.f32 %v1639_v7, %v1638_v48  ;;  %v1641_v11 = vmax.f32 %v1446_v52, 0.0  ;;  %7131 = vperm.xlu0 %9986, %v4088_v44   ;;  %v2042_v0 = vrot.slane %v1698_v38, %v11225_v50  ;;  %v2046_v18 = vrot.slane %v1698_v38, %v11229_v16  ;;  %v1701_v48 = vpop.xlane.xlu1 %1700 }
 0x1fa   : > { %v4121_v63 = vcombine.low %v4099_v8, %v4106_v62  ;;  %v4122_v56 = vcombine.low %v4113_v35, %v4120_v31  ;;  %v2050_v33 = vrot.slane %v1698_v38, %v11232_v17  ;;  %v2054_v36 = vrot.slane %v1698_v38, %v11235_v10 }
 0x1fb   : > { %v11312_v22 = vadd.f32 %v1641_v11, %v1640_v58  ;;  %v1449_v45 = vpop.f32.mrb[84].mxu0  ;;  %v2058_v37 = vrot.slane %v1698_v38, %v11241_v21  ;;  %v2062_v7 = vrot.slane %v1698_v38, %v11244_v39  ;;  %v2066_v42 = vrot.slane %v1698_v38, %v11250_v27 }
 0x1fc   : > { %v1450_v44 = vadd.f32 %v1449_v45, %v11096_v14  ;;  %v1451_v57 = vpop.f32.mrb[85].mxu0  ;;  %v4129_v40 = vrot.slane %v4121_v63, %v11256_v28  ;;  %v4136_v19 = vrot.slane %v4122_v56, %v11256_v28  ;;  %v2070_v5 = vrot.slane %v1698_v38, %v11253_v55 }
 0x1fd   : > { %v1452_v12 = vadd.f32 %v1451_v57, %v11096_v14  ;;  %v1453_v34 = vpop.f32.mrb[86].mxu0  ;;  %v4138_v51 = vcombine.low %v2042_v0, %v2046_v18  ;;  %v4139_v9 = vcombine.low %v2050_v33, %v2054_v36  ;;  %v4140_v52 = vcombine.low %v2058_v37, %v2062_v7 }
 0x1fe   : > { %v1642_v8 = vmax.f32 %v1450_v44, 0.0  ;;  %v1454_v58 = vadd.f32 %v1453_v34, %v11116_v4  ;;  %v4137_v62 = vcombine.low %v4129_v40, %v4136_v19  ;;  %v1455_v35 = vpop.f32.mrb[87].mxu0  ;;  %v4141_v31 = vcombine.low %v2066_v42, %v2070_v5 }
 0x1ff   : > { %v1643_v11 = vmax.f32 %v1452_v12, 0.0  ;;  %v1456_v63 = vadd.f32 %v1455_v35, %v11116_v4  ;;  %v4148_v56 = vrot.slane %v4138_v51, %v11256_v28  ;;  %v4155_v38 = vrot.slane %v4139_v9, %v11256_v28 }
 0x200   : > { %v1644_v45 = vmax.f32 %v1454_v58, 0.0  ;;  %7134 = vperm.xlu0 %9986, %v4137_v62   ;;  %v4162_v14 = vrot.slane %v4140_v52, %v11256_v28  ;;  %v4169_v0 = vrot.slane %v4141_v31, %v11256_v28  ;;  %v2074_v18 = vrot.slane %v1701_v48, %v11225_v50 }
 0x201   : > { %v11329_v33 = vadd.f32 %v1643_v11, %v1642_v8  ;;  %v1645_v36 = vmax.f32 %v1456_v63, 0.0  ;;  %v4170_v37 = vcombine.low %v4148_v56, %v4155_v38  ;;  %v2078_v7 = vrot.slane %v1701_v48, %v11229_v16 }
 0x202   : > { %v4171_v42 = vcombine.low %v4162_v14, %v4169_v0  ;;  %v2082_v4 = vrot.slane %v1701_v48, %v11232_v17  ;;  %v2086_v44 = vrot.slane %v1701_v48, %v11235_v10  ;;  %v2090_v57 = vrot.slane %v1701_v48, %v11241_v21 }
 0x203   : > { %v11335_v40 = vadd.f32 %v1645_v36, %v1644_v45  ;;  %v4178_v19 = vrot.slane %v4170_v37, %v11256_v28  ;;  %v1459_v5 = vpop.f32.mrb[88].mxu0  ;;  %v2094_v12 = vrot.slane %v1701_v48, %v11244_v39  ;;  %v2098_v34 = vrot.slane %v1701_v48, %v11250_v27 }
 0x204   : > { %v4185_v51 = vrot.slane %v4171_v42, %v11256_v28  ;;  %v1460_v9 = vadd.f32 %v1459_v5, %v11139_v49  ;;  %v1461_v52 = vpop.f32.mrb[89].mxu0  ;;  %v2102_v8 = vrot.slane %v1701_v48, %v11253_v55  ;;  %v4187_v58 = vcombine.low %v2074_v18, %v2078_v7 }
 0x205   : > { %v1462_v62 = vadd.f32 %v1461_v52, %v11139_v49  ;;  %v1463_v35 = vpop.f32.mrb[90].mxu0  ;;  %v4188_v31 = vcombine.low %v2082_v4, %v2086_v44  ;;  %v4189_v11 = vcombine.low %v2090_v57, %v2094_v12  ;;  %v1974_v63 = vrot.slane %v11247_v53, %v11253_v55  ;;  %v1704_v49 = vpop.xlane.xlu1 %1703 }
 0x206   : > { %v4186_v56 = vcombine.low %v4178_v19, %v4185_v51  ;;  %v1646_v38 = vmax.f32 %v1460_v9, 0.0  ;;  %v1464_v45 = vadd.f32 %v1463_v35, %v11156_v25  ;;  %v4190_v14 = vcombine.low %v2098_v34, %v2102_v8  ;;  %v1465_v0 = vpop.f32.mrb[91].mxu0 }
 0x207   : > { %v1647_v36 = vmax.f32 %v1462_v62, 0.0  ;;  %v4197_v37 = vrot.slane %v4187_v58, %v11256_v28  ;;  %v4204_v48 = vrot.slane %v4188_v31, %v11256_v28  ;;  %v4211_v18 = vrot.slane %v4189_v11, %v11256_v28 }
 0x208   : > { %7137 = vperm.xlu0 %9986, %v4186_v56   ;;  %v1648_v7 = vmax.f32 %v1464_v45, 0.0  ;;  %v4218_v42 = vrot.slane %v4190_v14, %v11256_v28  ;;  %v1466_v4 = vadd.f32 %v1465_v0, %v11156_v25  ;;  %v13764_v44 = vrot.slane %v11247_v53, %v11225_v50 }
 0x209   : > { %v11358_v19 = vadd.f32 %v1647_v36, %v1646_v38  ;;  %v4219_v5 = vcombine.low %v4197_v37, %v4204_v48  ;;  %v13765_v12 = vrot.slane %v11247_v53, %v11235_v10  ;;  %v13766_v34 = vrot.slane %v11247_v53, %v11232_v17 }
 0x20a   : > { %v3991_v57 = vcombine.low %v13764_v44, %v1950_v43  ;;  %v13767_v25 = vrot.slane %v11247_v53, %v11244_v39  ;;  %v13768_v9 = vrot.slane %v11247_v53, %v11241_v21  ;;  %v4220_v8 = vcombine.low %v4211_v18, %v4218_v42  ;;  %v1707_v44 = vpop.xlane.xlu1 %1706 }
 0x20b   : > { %v3992_v51 = vcombine.low %v13766_v34, %v13765_v12  ;;  %v1649_v58 = vmax.f32 %v1466_v4, 0.0  ;;  %v13769_v43 = vrot.slane %v11247_v53, %v11250_v27  ;;  %v4227_v31 = vrot.slane %v4219_v5, %v11256_v28  ;;  %v1469_v45 = vpop.f32.mrb[92].mxu0 }
 0x20c   : > { %v3993_v52 = vcombine.low %v13768_v9, %v13767_v25  ;;  %v4001_v35 = vrot.slane %v3991_v57, %v11256_v28  ;;  %v2106_v38 = vrot.slane %v1704_v49, %v11225_v50  ;;  %v4234_v14 = vrot.slane %v4220_v8, %v11256_v28 }
 0x20d   : > { %v3994_v62 = vcombine.low %v13769_v43, %v1974_v63  ;;  %v4008_v11 = vrot.slane %v3992_v51, %v11256_v28  ;;  %v11381_v0 = vadd.f32 %v1649_v58, %v1648_v7  ;;  %v2110_v53 = vrot.slane %v1704_v49, %v11229_v16  ;;  %v1471_v63 = vpop.f32.mrb[93].mxu0 }
 0x20e   : > { %v4015_v56 = vrot.slane %v3993_v52, %v11256_v28  ;;  %v2114_v48 = vrot.slane %v1704_v49, %v11232_v17  ;;  %v2118_v18 = vrot.slane %v1704_v49, %v11235_v10  ;;  %v2122_v42 = vrot.slane %v1704_v49, %v11241_v21  ;;  %v1473_v4 = vpop.f32.mrb[94].mxu0 }
 0x20f   : > { %v4022_v36 = vrot.slane %v3994_v62, %v11256_v28  ;;  %v4023_v37 = vcombine.low %v4001_v35, %v4008_v11  ;;  %v4235_v57 = vcombine.low %v4227_v31, %v4234_v14  ;;  %v2126_v12 = vrot.slane %v1704_v49, %v11244_v39  ;;  %v1475_v34 = vpop.f32.mrb[95].mxu0 }
 0x210   : > { %v2130_v7 = vrot.slane %v1704_v49, %v11250_v27  ;;  %v2134_v25 = vrot.slane %v1704_v49, %v11253_v55  ;;  %v4236_v9 = vcombine.low %v2106_v38, %v2110_v53  ;;  %v4237_v52 = vcombine.low %v2114_v48, %v2118_v18 }
 0x211   : > { %v4024_v5 = vcombine.low %v4015_v56, %v4022_v36  ;;  %v4031_v51 = vrot.slane %v4023_v37, %v11256_v28  ;;  %7140 = vperm.xlu0 %9986, %v4235_v57   ;;  %v4238_v58 = vcombine.low %v2122_v42, %v2126_v12  ;;  %v1470_v43 = vadd.f32 %v1469_v45, %v11168_v26 }
 0x212   : > { %v1472_v62 = vadd.f32 %v1471_v63, %v11168_v26  ;;  %v4239_v35 = vcombine.low %v2130_v7, %v2134_v25  ;;  %v4246_v31 = vrot.slane %v4236_v9, %v11256_v28  ;;  %v4253_v11 = vrot.slane %v4237_v52, %v11256_v28  ;;  %v1710_v26 = vpop.xlane.xlu1 %1709 }
 0x213   : > { %v4038_v8 = vrot.slane %v4024_v5, %v11256_v28  ;;  %v1474_v56 = vadd.f32 %v1473_v4, %v11221_v32  ;;  %v4260_v49 = vrot.slane %v4238_v58, %v11256_v28  ;;  %v1650_v38 = vmax.f32 %v1470_v43, 0.0  ;;  %v1479_v18 = vpop.f32.mrb[96].mxu0 }
 0x214   : > { %v1651_v36 = vmax.f32 %v1472_v62, 0.0  ;;  %v4267_v53 = vrot.slane %v4239_v35, %v11256_v28  ;;  %v4268_v37 = vcombine.low %v4246_v31, %v4253_v11  ;;  %v2138_v45 = vrot.slane %v1707_v44, %v11225_v50  ;;  %v1481_v5 = vpop.f32.mrb[97].mxu0 }
 0x215   : > { %v4039_v14 = vcombine.low %v4031_v51, %v4038_v8  ;;  %v1652_v48 = vmax.f32 %v1474_v56, 0.0  ;;  %v2142_v42 = vrot.slane %v1707_v44, %v11229_v16  ;;  %v2146_v4 = vrot.slane %v1707_v44, %v11232_v17  ;;  %v1483_v9 = vpop.f32.mrb[98].mxu0 }
 0x216   : > { %v11401_v63 = vadd.f32 %v1651_v36, %v1650_v38  ;;  %v2150_v57 = vrot.slane %v1707_v44, %v11235_v10  ;;  %v4269_v12 = vcombine.low %v4260_v49, %v4267_v53  ;;  %v4276_v7 = vrot.slane %v4268_v37, %v11256_v28  ;;  %v11411_v62 = vpop.f32.mrb[99].mxu0 }
 0x217   : > { %7128 = vperm.xlu1 %9987, %v4039_v14   ;;  %v2154_v51 = vrot.slane %v1707_v44, %v11241_v21  ;;  %v2158_v25 = vrot.slane %v1707_v44, %v11244_v39  ;;  %v2162_v52 = vrot.slane %v1707_v44, %v11250_v27  ;;  %v2166_v8 = vrot.slane %v1707_v44, %v11253_v55 }
 0x218   : > { %v4285_v58 = vcombine.low %v2138_v45, %v2142_v42  ;;  %v4286_v43 = vcombine.low %v2146_v4, %v2150_v57  ;;  %v4283_v35 = vrot.slane %v4269_v12, %v11256_v28  ;;  %v1476_v11 = vadd.f32 %v1475_v34, %v11221_v32  ;;  %v1713_v57 = vpop.xlane.xlu1 %1712 }
 0x219   : > { %v4287_v31 = vcombine.low %v2154_v51, %v2158_v25  ;;  %v2170_v56 = vrot.slane %v1710_v26, %v11225_v50  ;;  %v4288_v14 = vcombine.low %v2162_v52, %v2166_v8  ;;  %v2174_v36 = vrot.slane %v1710_v26, %v11229_v16 }
 0x21a   : > { %v4295_v49 = vrot.slane %v4285_v58, %v11256_v28  ;;  %v4302_v38 = vrot.slane %v4286_v43, %v11256_v28  ;;  %v4284_v53 = vcombine.low %v4276_v7, %v4283_v35  ;;  %v1653_v37 = vmax.f32 %v1476_v11, 0.0 }
 0x21b   : > { %v4309_v44 = vrot.slane %v4287_v31, %v11256_v28  ;;  %v2178_v45 = vrot.slane %v1710_v26, %v11232_v17  ;;  %v4316_v42 = vrot.slane %v4288_v14, %v11256_v28  ;;  %v2182_v32 = vrot.slane %v1710_v26, %v11235_v10  ;;  %v11429_v52 = vpop.f32.mrb[100].mxu0 }
 0x21c   : > { %v4317_v4 = vcombine.low %v4295_v49, %v4302_v38  ;;  %v2186_v34 = vrot.slane %v1710_v26, %v11241_v21  ;;  %7143 = vperm.xlu0 %9986, %v4284_v53   ;;  %v11424_v12 = vadd.f32 %v1653_v37, %v1652_v48  ;;  %v2190_v51 = vrot.slane %v1710_v26, %v11244_v39  ;;  %v11432_v31 = vpop.f32.mrb[101].mxu0 }
 0x21d   : > { %v2194_v7 = vrot.slane %v1710_v26, %v11250_v27  ;;  %v2198_v25 = vrot.slane %v1710_v26, %v11253_v55  ;;  %v4318_v8 = vcombine.low %v4309_v44, %v4316_v42  ;;  %v4334_v43 = vcombine.low %v2170_v56, %v2174_v36  ;;  %v11436_v38 = vpop.f32.mrb[102].mxu0 }
 0x21e   : > { %v4325_v58 = vrot.slane %v4317_v4, %v11256_v28  ;;  %v4335_v35 = vcombine.low %v2178_v45, %v2182_v32  ;;  %v4336_v11 = vcombine.low %v2186_v34, %v2190_v51  ;;  %v1480_v48 = vadd.f32 %v1479_v18, %v10982_v29  ;;  %v11442_v56 = vpop.f32.mrb[103].mxu0  ;;  %v1716_v34 = vpop.xlane.xlu1 %1715 }
 0x21f   : > { %v4337_v14 = vcombine.low %v2194_v7, %v2198_v25  ;;  %v1482_v49 = vadd.f32 %v1481_v5, %v10982_v29  ;;  %v4332_v53 = vrot.slane %v4318_v8, %v11256_v28  ;;  %v4344_v26 = vrot.slane %v4334_v43, %v11256_v28 }
 0x220   : > { %v4351_v44 = vrot.slane %v4335_v35, %v11256_v28  ;;  %v1484_v37 = vadd.f32 %v1483_v9, %v11033_v47  ;;  %v4358_v36 = vrot.slane %v4336_v11, %v11256_v28  ;;  %v1654_v42 = vmax.f32 %v1480_v48, 0.0 }
 0x221   : > { %v4365_v45 = vrot.slane %v4337_v14, %v11256_v28  ;;  %v1655_v18 = vmax.f32 %v1482_v49, 0.0  ;;  %v4333_v4 = vcombine.low %v4325_v58, %v4332_v53  ;;  %v2202_v32 = vrot.slane %v1713_v57, %v11225_v50 }
 0x222   : > { %v4366_v29 = vcombine.low %v4344_v26, %v4351_v44  ;;  %v1656_v5 = vmax.f32 %v1484_v37, 0.0  ;;  %v2206_v25 = vrot.slane %v1713_v57, %v11229_v16  ;;  %v2210_v9 = vrot.slane %v1713_v57, %v11232_v17 }
 0x223   : > { %v4367_v51 = vcombine.low %v4358_v36, %v4365_v45  ;;  %v11447_v7 = vadd.f32 %v1655_v18, %v1654_v42  ;;  %7146 = vperm.xlu0 %9986, %v4333_v4   ;;  %v2214_v43 = vrot.slane %v1713_v57, %v11235_v10  ;;  %v2218_v35 = vrot.slane %v1713_v57, %v11241_v21  ;;  %v1499_v53 = vpop.f32.mrb[104].mxu0 }
 0x224   : > { %v4374_v8 = vrot.slane %v4366_v29, %v11256_v28  ;;  %v2222_v58 = vrot.slane %v1713_v57, %v11244_v39  ;;  %v2226_v14 = vrot.slane %v1713_v57, %v11250_v27  ;;  %v2230_v48 = vrot.slane %v1713_v57, %v11253_v55  ;;  %v1501_v45 = vpop.f32.mrb[105].mxu0 }
 0x225   : > { %13770 = vst [vmem:[#allocation21_spill] sm:$0xff] %v11447_v7  ;;  %v4381_v11 = vrot.slane %v4367_v51, %v11256_v28  ;;  %v4383_v49 = vcombine.low %v2202_v32, %v2206_v25  ;;  %v4384_v26 = vcombine.low %v2210_v9, %v2214_v43  ;;  %v1486_v37 = vadd.f32 %v11411_v62, %v11033_v47  ;;  %v1503_v51 = vpop.f32.mrb[106].mxu0 }
 0x226   : > { %v4385_v44 = vcombine.low %v2218_v35, %v2222_v58  ;;  %v2234_v36 = vrot.slane %v1716_v34, %v11225_v50  ;;  %v4386_v18 = vcombine.low %v2226_v14, %v2230_v48  ;;  %v2238_v29 = vrot.slane %v1716_v34, %v11229_v16  ;;  %v1505_v9 = vpop.f32.mrb[107].mxu0 }
 0x227   : > { %v4382_v42 = vcombine.low %v4374_v8, %v4381_v11  ;;  %v4393_v4 = vrot.slane %v4383_v49, %v11256_v28  ;;  %v4400_v1 = vrot.slane %v4384_v26, %v11256_v28  ;;  %v1657_v32 = vmax.f32 %v1486_v37, 0.0 }
 0x228   : > { %v4407_v57 = vrot.slane %v4385_v44, %v11256_v28  ;;  %v2242_v25 = vrot.slane %v1716_v34, %v11232_v17  ;;  %v4414_v47 = vrot.slane %v4386_v18, %v11256_v28  ;;  %v2246_v62 = vrot.slane %v1716_v34, %v11235_v10  ;;  %v11474_v48 = vpop.xlane.xlu0 %1736 }
 0x229   : > { %7149 = vperm.xlu0 %9986, %v4382_v42   ;;  %v2250_v8 = vrot.slane %v1716_v34, %v11241_v21  ;;  %v2254_v43 = vrot.slane %v1716_v34, %v11244_v39  ;;  %v4415_v35 = vcombine.low %v4393_v4, %v4400_v1  ;;  %v11470_v58 = vadd.f32 %v1657_v32, %v1656_v5 }
 0x22a   : > { %v2258_v11 = vrot.slane %v1716_v34, %v11250_v27  ;;  %v2262_v14 = vrot.slane %v1716_v34, %v11253_v55  ;;  %v4416_v49 = vcombine.low %v4407_v57, %v4414_v47  ;;  %v4432_v26 = vcombine.low %v2234_v36, %v2238_v29 }
 0x22b   : > { %v4433_v44 = vcombine.low %v2242_v25, %v2246_v62  ;;  %v4434_v37 = vcombine.low %v2250_v8, %v2254_v43  ;;  %v4423_v42 = vrot.slane %v4415_v35, %v11256_v28  ;;  %v1490_v7 = vadd.f32 %v11429_v52, %v11051_v54  ;;  %v1509_v36 = vpop.f32.mrb[108].mxu0 }
 0x22c   : > { %v4435_v18 = vcombine.low %v2258_v11, %v2262_v14  ;;  %v1492_v1 = vadd.f32 %v11432_v31, %v11051_v54  ;;  %v4430_v5 = vrot.slane %v4416_v49, %v11256_v28  ;;  %v4442_v4 = vrot.slane %v4432_v26, %v11256_v28  ;;  %v1511_v52 = vpop.f32.mrb[109].mxu0  ;;  %v11488_v62 = vpop.xlane.xlu0 %1739 }
 0x22d   : > { %v4449_v34 = vrot.slane %v4433_v44, %v11256_v28  ;;  %v4456_v57 = vrot.slane %v4434_v37, %v11256_v28  ;;  %v1658_v32 = vmax.f32 %v1490_v7, 0.0  ;;  %v1494_v47 = vadd.f32 %v11436_v38, %v11066_v59  ;;  %v1513_v35 = vpop.f32.mrb[110].mxu0 }
 0x22e   : > { %v4463_v29 = vrot.slane %v4435_v18, %v11256_v28  ;;  %v1659_v25 = vmax.f32 %v1492_v1, 0.0  ;;  %v4431_v54 = vcombine.low %v4423_v42, %v4430_v5  ;;  %v1496_v8 = vadd.f32 %v11442_v56, %v11066_v59  ;;  %v1515_v26 = vpop.f32.mrb[111].mxu0  ;;  %v1719_v18 = vpop.xlane.xlu1 %1718 }
 0x22f   : > { %v4464_v31 = vcombine.low %v4442_v4, %v4449_v34  ;;  %v1500_v43 = vadd.f32 %v1499_v53, %v11082_v2  ;;  %v1660_v49 = vmax.f32 %v1494_v47, 0.0  ;;  %v1502_v7 = vadd.f32 %v1501_v45, %v11082_v2 }
 0x230   : > { %v4465_v11 = vcombine.low %v4456_v57, %v4463_v29  ;;  %v11493_v14 = vadd.f32 %v1659_v25, %v1658_v32  ;;  %7152 = vperm.xlu0 %9986, %v4431_v54   ;;  %v1661_v44 = vmax.f32 %v1496_v8, 0.0  ;;  %v1504_v42 = vadd.f32 %v1503_v51, %v11101_v20  ;;  %v11501_v5 = vpop.xlane.xlu0 %1742 }
 0x231   : > { %v4472_v38 = vrot.slane %v4464_v31, %v11256_v28  ;;  %v1662_v37 = vmax.f32 %v1500_v43, 0.0  ;;  %v1663_v56 = vmax.f32 %v1502_v7, 0.0  ;;  %v1506_v53 = vadd.f32 %v1505_v9, %v11101_v20 }
 0x232   : > { %v4479_v59 = vrot.slane %v4465_v11, %v11256_v28  ;;  %v1510_v1 = vadd.f32 %v1509_v36, %v11124_v15  ;;  %v11503_v4 = vadd.f32 %v1661_v44, %v1660_v49  ;;  %v1664_v2 = vmax.f32 %v1504_v42, 0.0 }
 0x233   : > { %v1512_v45 = vadd.f32 %v1511_v52, %v11124_v15  ;;  %v1514_v34 = vadd.f32 %v1513_v35, %v11144_v6  ;;  %v11507_v29 = vadd.f32 %v1663_v56, %v1662_v37  ;;  %v1665_v51 = vmax.f32 %v1506_v53, 0.0  ;;  %v1519_v9 = vpop.f32.mrb[112].mxu0 }
 0x234   : > { %v4480_v57 = vcombine.low %v4472_v38, %v4479_v59  ;;  %v1666_v32 = vmax.f32 %v1510_v1, 0.0  ;;  %v1516_v20 = vadd.f32 %v1515_v26, %v11144_v6  ;;  %v2266_v36 = vrot.slane %v1719_v18, %v11225_v50  ;;  %v1521_v15 = vpop.f32.mrb[113].mxu0  ;;  %v11514_v52 = vpop.xlane.xlu0 %1745 }
 0x235   : > { %v1667_v25 = vmax.f32 %v1512_v45, 0.0  ;;  %v1668_v47 = vmax.f32 %v1514_v34, 0.0  ;;  %v11511_v54 = vadd.f32 %v1665_v51, %v1664_v2  ;;  %v1520_v31 = vadd.f32 %v1519_v9, %v11161_v60  ;;  %v1523_v49 = vpop.f32.mrb[114].mxu0  ;;  %v1722_v59 = vpop.xlane.xlu1 %1721 }
 0x236   : > { %7155 = vperm.xlu0 %9986, %v4480_v57   ;;  %v2270_v8 = vrot.slane %v1719_v18, %v11229_v16  ;;  %v2274_v43 = vrot.slane %v1719_v18, %v11232_v17  ;;  %v1669_v11 = vmax.f32 %v1516_v20, 0.0  ;;  %v1522_v6 = vadd.f32 %v1521_v15, %v11161_v60  ;;  %v1525_v44 = vpop.f32.mrb[115].mxu0 }
 0x237   : > { %v11518_v35 = vadd.f32 %v1667_v25, %v1666_v32  ;;  %v2278_v7 = vrot.slane %v1719_v18, %v11235_v10  ;;  %v1670_v26 = vmax.f32 %v1520_v31, 0.0  ;;  %v1524_v38 = vadd.f32 %v1523_v49, %v11170_v30 }
 0x238   : > { %v2282_v37 = vrot.slane %v1719_v18, %v11241_v21  ;;  %v2286_v42 = vrot.slane %v1719_v18, %v11244_v39  ;;  %v11525_v56 = vadd.f32 %v1669_v11, %v1668_v47  ;;  %v1671_v53 = vmax.f32 %v1522_v6, 0.0  ;;  %v11530_v45 = vpop.xlane.xlu0 %1748 }
 0x239   : > { %v1526_v1 = vadd.f32 %v1525_v44, %v11170_v30  ;;  %v2290_v2 = vrot.slane %v1719_v18, %v11250_v27  ;;  %v1672_v60 = vmax.f32 %v1524_v38, 0.0  ;;  %v2294_v34 = vrot.slane %v1719_v18, %v11253_v55 }
 0x23a   : > { %v4481_v57 = vcombine.low %v2266_v36, %v2270_v8  ;;  %v4482_v51 = vcombine.low %v2274_v43, %v2278_v7  ;;  %v11533_v32 = vadd.f32 %v1671_v53, %v1670_v26  ;;  %v4483_v20 = vcombine.low %v2282_v37, %v2286_v42 }
 0x23b   : > { %1808 = vadd.xlane.f32.xlu1 %v11306_v3  ;;  %v1673_v25 = vmax.f32 %v1526_v1, 0.0  ;;  %v4484_v47 = vcombine.low %v2290_v2, %v2294_v34  ;;  %v2298_v9 = vrot.slane %v1722_v59, %v11225_v50  ;;  %v1529_v30 = vpop.f32.mrb[116].mxu0  ;;  %v2302_v15 = vrot.slane %v1722_v59, %v11229_v16 }
 0x23c   : > { %v2306_v3 = vrot.slane %v1722_v59, %v11232_v17  ;;  %v2310_v11 = vrot.slane %v1722_v59, %v11235_v10  ;;  %v1530_v18 = vadd.f32 %v1529_v30, %v11177_v24  ;;  %v1531_v36 = vpop.f32.mrb[117].mxu0  ;;  %v11543_v8 = vpop.xlane.xlu0 %1751  ;;  %v4491_v43 = vrot.slane %v4481_v57, %v11256_v28 }
 0x23d   : > { %v11536_v31 = vadd.f32 %v1673_v25, %v1672_v60  ;;  %v4498_v6 = vrot.slane %v4482_v51, %v11256_v28  ;;  %v2314_v49 = vrot.slane %v1722_v59, %v11241_v21  ;;  %v1532_v7 = vadd.f32 %v1531_v36, %v11177_v24  ;;  %v1533_v26 = vpop.f32.mrb[118].mxu0 }
 0x23e   : > { %v2318_v38 = vrot.slane %v1722_v59, %v11244_v39  ;;  %v2322_v44 = vrot.slane %v1722_v59, %v11250_v27  ;;  %v1674_v37 = vmax.f32 %v1530_v18, 0.0  ;;  %v1534_v42 = vadd.f32 %v1533_v26, %v11186_v13  ;;  %v1535_v53 = vpop.f32.mrb[119].mxu0 }
 0x23f   : > { %1811 = vadd.xlane.f32.xlu1 %v11312_v22  ;;  %v2326_v22 = vrot.slane %v1722_v59, %v11253_v55  ;;  %v4505_v1 = vrot.slane %v4483_v20, %v11256_v28  ;;  %v4512_v2 = vrot.slane %v4484_v47, %v11256_v28  ;;  %v1675_v60 = vmax.f32 %v1532_v7, 0.0 }
 0x240   : > { %v1536_v34 = vadd.f32 %v1535_v53, %v11186_v13  ;;  %v4530_v57 = vcombine.low %v2298_v9, %v2302_v15  ;;  %v4531_v24 = vcombine.low %v2306_v3, %v2310_v11  ;;  %v1676_v51 = vmax.f32 %v1534_v42, 0.0  ;;  %v11559_v18 = vpop.xlane.xlu0 %1754 }
 0x241   : > { %v4532_v25 = vcombine.low %v2314_v49, %v2318_v38  ;;  %v11557_v30 = vadd.f32 %v1675_v60, %v1674_v37  ;;  %v4533_v36 = vcombine.low %v2322_v44, %v2326_v22  ;;  %v11561_v26 = vcombine.low %v4491_v43, %v4498_v6 }
 0x242   : > { %v1677_v59 = vmax.f32 %v1536_v34, 0.0  ;;  %v11563_v20 = vcombine.low %v4505_v1, %v4512_v2  ;;  %v4540_v47 = vrot.slane %v4530_v57, %v11256_v28  ;;  %v4547_v13 = vrot.slane %v4531_v24, %v11256_v28 }
 0x243   : > { %1814 = vadd.xlane.f32.xlu1 %v11329_v33  ;;  %13771 = vst [vmem:[#allocation22_spill] sm:$0xff] %v11557_v30  ;;  %v1539_v15 = vpop.f32.mrb[120].mxu0  ;;  %v2458_v33 = vrot.slane %v11474_v48, %v11225_v50  ;;  %v2462_v3 = vrot.slane %v11474_v48, %v11229_v16  ;;  %v2466_v11 = vrot.slane %v11474_v48, %v11232_v17  ;;  %v13789_v30 = vmov 0.0  }
 0x244   : > { %v11567_v9 = vadd.f32 %v1677_v59, %v1676_v51  ;;  %v1540_v43 = vadd.f32 %v1539_v15, %v11195_v41  ;;  %v1541_v6 = vpop.f32.mrb[121].mxu0  ;;  %v4554_v49 = vrot.slane %v4532_v25, %v11256_v28  ;;  %v2470_v7 = vrot.slane %v11474_v48, %v11235_v10  ;;  %9887 = vmatprep.mubr.msk.bf16.mxu1 %vm10485_vm12, %v13789_v30 }
 0x245   : > { %v2474_v38 = vrot.slane %v11474_v48, %v11241_v21  ;;  %v1542_v44 = vadd.f32 %v1541_v6, %v11195_v41  ;;  %v1543_v22 = vpop.f32.mrb[122].mxu0  ;;  %v4561_v37 = vrot.slane %v4533_v36, %v11256_v28  ;;  %v2478_v42 = vrot.slane %v11474_v48, %v11244_v39  ;;  %v11593_v41 = vpop.xlane.xlu0 %1757 }
 0x246   : > { %13772 = vst [vmem:[#allocation23_spill] sm:$0xff] %v11567_v9  ;;  %v1678_v53 = vmax.f32 %v1540_v43, 0.0  ;;  %v1544_v1 = vadd.f32 %v1543_v22, %v11202_v61  ;;  %v1545_v2 = vpop.f32.mrb[123].mxu0  ;;  %v11589_v60 = vcombine.low %v4540_v47, %v4547_v13  ;;  %v2486_v34 = vrot.slane %v11474_v48, %v11253_v55 }
 0x247   : > { %1817 = vadd.xlane.f32.xlu1 %v11335_v40  ;;  %v2482_v40 = vrot.slane %v11474_v48, %v11250_v27  ;;  %v1679_v57 = vmax.f32 %v1542_v44, 0.0  ;;  %v1546_v24 = vadd.f32 %v1545_v2, %v11202_v61  ;;  %v4775_v51 = vcombine.low %v2458_v33, %v2462_v3 }
 0x248   : > { %v4776_v25 = vcombine.low %v2466_v11, %v2470_v7  ;;  %v1680_v59 = vmax.f32 %v1544_v1, 0.0  ;;  %v4521_v36 = vrot.slane %v11561_v26, %v11256_v28  ;;  %v4528_v47 = vrot.slane %v11563_v20, %v11256_v28 }
 0x249   : > { %v4777_v13 = vcombine.low %v2474_v38, %v2478_v42  ;;  %v11601_v15 = vadd.f32 %v1679_v57, %v1678_v53  ;;  %v1681_v48 = vmax.f32 %v1546_v24, 0.0  ;;  %v4563_v43 = vcombine.low %v4554_v49, %v4561_v37 }
 0x24a   : > { %v4778_v6 = vcombine.low %v2482_v40, %v2486_v34  ;;  %v4570_v61 = vrot.slane %v11589_v60, %v11256_v28  ;;  %v4785_v33 = vrot.slane %v4775_v51, %v11256_v28  ;;  %v2494_v26 = vrot.slane %v11488_v62, %v11229_v16  ;;  %v11624_v40 = vpop.xlane.xlu0 %1760 }
 0x24b   : > { %1820 = vadd.xlane.f32.xlu1 %v11358_v19  ;;  %13773 = vst [vmem:[#allocation24_spill] sm:$0xff] %v11601_v15  ;;  %v2490_v19 = vrot.slane %v11488_v62, %v11225_v50  ;;  %v11610_v3 = vadd.f32 %v1681_v48, %v1680_v59  ;;  %v1549_v20 = vpop.f32.mrb[124].mxu0  ;;  %v4792_v11 = vrot.slane %v4776_v25, %v11256_v28  ;;  %vm7428_vm12 = vcmask 1048512  }
 0x24c   : > { %v2498_v49 = vrot.slane %v11488_v62, %v11232_v17  ;;  %v2502_v7 = vrot.slane %v11488_v62, %v11235_v10  ;;  %v1550_v38 = vadd.f32 %v1549_v20, %v11208_v23  ;;  %v1551_v44 = vpop.f32.mrb[125].mxu0  ;;  %v4799_v22 = vrot.slane %v4777_v13, %v11256_v28 }
 0x24d   : > { %13774 = vst [vmem:[#allocation25_spill] sm:$0xff] %v11610_v3  ;;  %v2506_v37 = vrot.slane %v11488_v62, %v11241_v21  ;;  %v2510_v42 = vrot.slane %v11488_v62, %v11244_v39  ;;  %v1552_v53 = vadd.f32 %v1551_v44, %v11208_v23  ;;  %v1553_v1 = vpop.f32.mrb[126].mxu0  ;;  %v4806_v2 = vrot.slane %v4778_v6, %v11256_v28 }
 0x24e   : > { %v2518_v60 = vrot.slane %v11488_v62, %v11253_v55  ;;  %v1682_v34 = vmax.f32 %v1550_v38, 0.0  ;;  %v1554_v57 = vadd.f32 %v1553_v1, %v11237_v46  ;;  %v1555_v24 = vpop.f32.mrb[127].mxu0  ;;  %v4577_v51 = vrot.slane %v4563_v43, %v11256_v28 }
 0x24f   : > { %1823 = vadd.xlane.f32.xlu1 %v11381_v0  ;;  %v2514_v0 = vrot.slane %v11488_v62, %v11250_v27  ;;  %v4824_v25 = vcombine.low %v2490_v19, %v2494_v26  ;;  %v1683_v59 = vmax.f32 %v1552_v53, 0.0  ;;  %v1556_v13 = vadd.f32 %v1555_v24, %v11237_v46  ;;  %v11652_v26 = vpop.xlane.xlu0 %1763 }
 0x250   : > { %v4825_v23 = vcombine.low %v2498_v49, %v2502_v7  ;;  %v4826_v48 = vcombine.low %v2506_v37, %v2510_v42  ;;  %v1684_v6 = vmax.f32 %v1554_v57, 0.0  ;;  %v11636_v20 = vcombine.low %v4785_v33, %v4792_v11  ;;  %v11672_v57 = vpop.xlane.xlu1 %1724 }
 0x251   : > { %v4827_v44 = vcombine.low %v2514_v0, %v2518_v60  ;;  %v4834_v62 = vrot.slane %v4824_v25, %v11256_v28  ;;  %v11639_v38 = vadd.f32 %v1683_v59, %v1682_v34  ;;  %v1685_v1 = vmax.f32 %v1556_v13, 0.0 }
 0x252   : > { %v11641_v3 = vcombine.low %v4799_v22, %v4806_v2  ;;  %v4841_v43 = vrot.slane %v4825_v23, %v11256_v28  ;;  %v4848_v19 = vrot.slane %v4826_v48, %v11256_v28  ;;  %v2522_v46 = vrot.slane %v11501_v5, %v11225_v50 }
 0x253   : > { %1826 = vadd.xlane.f32.xlu1 %v11401_v63  ;;  %13775 = vst [vmem:[#allocation26_spill] sm:$0xff] %v11639_v38  ;;  %v2526_v63 = vrot.slane %v11501_v5, %v11229_v16  ;;  %v2530_v33 = vrot.slane %v11501_v5, %v11232_v17  ;;  %v11654_v11 = vadd.f32 %v1685_v1, %v1684_v6 }
 0x254   : > { %v4855_v49 = vrot.slane %v4827_v44, %v11256_v28  ;;  %v2534_v7 = vrot.slane %v11501_v5, %v11235_v10  ;;  %v2538_v22 = vrot.slane %v11501_v5, %v11241_v21  ;;  %v4856_v37 = vcombine.low %v4834_v62, %v4841_v43 }
 0x255   : > { %1835 = vadd.xlane.f32.xlu0 %v11470_v58  ;;  %13776 = vst [vmem:[#allocation27_spill] sm:$0xff] %v11654_v11  ;;  %v2542_v42 = vrot.slane %v11501_v5, %v11244_v39  ;;  %v2546_v58 = vrot.slane %v11501_v5, %v11250_v27  ;;  %v2550_v53 = vrot.slane %v11501_v5, %v11253_v55 }
 0x256   : > { %v11668_v2 = vcombine.low %v4521_v36, %v4528_v47  ;;  %v11670_v0 = vcombine.low %v4570_v61, %v4577_v51  ;;  %v4873_v60 = vcombine.low %v2522_v46, %v2526_v63  ;;  %v4874_v34 = vcombine.low %v2530_v33, %v2534_v7  ;;  %v13777_v61 = vld [vmem:[#allocation21_spill] sm:$0xff] }
 0x257   : > { %1829 = vadd.xlane.f32.xlu1 %v11424_v12  ;;  %v4875_v24 = vcombine.low %v2538_v22, %v2542_v42  ;;  %v4876_v12 = vcombine.low %v2546_v58, %v2550_v53  ;;  %v2554_v25 = vrot.slane %v11514_v52, %v11225_v50  ;;  %v2558_v59 = vrot.slane %v11514_v52, %v11229_v16 }
 0x258   : > { %v4815_v13 = vrot.slane %v11636_v20, %v11256_v28  ;;  %v4822_v5 = vrot.slane %v11641_v3, %v11256_v28  ;;  %v2562_v36 = vrot.slane %v11514_v52, %v11232_v17  ;;  %v2566_v47 = vrot.slane %v11514_v52, %v11235_v10  ;;  %v11691_v20 = vpop.xlane.xlu0 %1766 }
 0x259   : > { %v4857_v51 = vcombine.low %v4848_v19, %v4855_v49  ;;  %v4864_v23 = vrot.slane %v4856_v37, %v11256_v28  ;;  %v4883_v48 = vrot.slane %v4873_v60, %v11256_v28  ;;  %v2570_v6 = vrot.slane %v11514_v52, %v11241_v21  ;;  %v11706_v37 = vpop.xlane.xlu1 %1727 }
 0x25a   : > { %v4890_v3 = vrot.slane %v4874_v34, %v11256_v28  ;;  %v2574_v44 = vrot.slane %v11514_v52, %v11244_v39  ;;  %v2578_v62 = vrot.slane %v11514_v52, %v11250_v27  ;;  %v2582_v1 = vrot.slane %v11514_v52, %v11253_v55 }
 0x25b   : > { %1832 = vadd.xlane.f32.xlu1 %v13777_v61  ;;  %v4897_v43 = vrot.slane %v4875_v24, %v11256_v28  ;;  %v4904_v19 = vrot.slane %v4876_v12, %v11256_v28  ;;  %v4922_v46 = vcombine.low %v2554_v25, %v2558_v59  ;;  %v4923_v63 = vcombine.low %v2562_v36, %v2566_v47 }
 0x25c   : > { %v4924_v33 = vcombine.low %v2570_v6, %v2574_v44  ;;  %v4925_v49 = vcombine.low %v2578_v62, %v2582_v1  ;;  %v2586_v7 = vrot.slane %v11530_v45, %v11225_v50  ;;  %v2590_v22 = vrot.slane %v11530_v45, %v11229_v16  ;;  %v11723_v61 = vpop.xlane.xlu0 %1769 }
 0x25d   : > { %v4871_v42 = vrot.slane %v4857_v51, %v11256_v28  ;;  %v4932_v52 = vrot.slane %v4922_v46, %v11256_v28  ;;  %v4939_v58 = vrot.slane %v4923_v63, %v11256_v28  ;;  %v2594_v53 = vrot.slane %v11530_v45, %v11232_v17 }
 0x25e   : > { %v4946_v60 = vrot.slane %v4924_v33, %v11256_v28  ;;  %v4953_v34 = vrot.slane %v4925_v49, %v11256_v28  ;;  %v2598_v24 = vrot.slane %v11530_v45, %v11235_v10  ;;  %v2602_v12 = vrot.slane %v11530_v45, %v11241_v21  ;;  %v11732_v49 = vpop.xlane.xlu1 %1730 }
 0x25f   : > { %v4905_v25 = vcombine.low %v4883_v48, %v4890_v3  ;;  %v4906_v59 = vcombine.low %v4897_v43, %v4904_v19  ;;  %v2606_v36 = vrot.slane %v11530_v45, %v11244_v39  ;;  %v2610_v47 = vrot.slane %v11530_v45, %v11250_v27  ;;  %13778 = vst [vmem:[#allocation21_spill] sm:$0xff] %v11732_v49 }
 0x260   : > { %v4954_v51 = vcombine.low %v4932_v52, %v4939_v58  ;;  %v2614_v6 = vrot.slane %v11530_v45, %v11253_v55  ;;  %v4971_v44 = vcombine.low %v2586_v7, %v2590_v22  ;;  %v4972_v62 = vcombine.low %v2594_v53, %v2598_v24  ;;  %v11750_v24 = vpop.xlane.xlu0 %1772 }
 0x261   : > { %v4823_v1 = vcombine.low %v4815_v13, %v4822_v5  ;;  %v4872_v46 = vcombine.low %v4864_v23, %v4871_v42  ;;  %v2618_v48 = vrot.slane %v11543_v8, %v11225_v50  ;;  %v2622_v3 = vrot.slane %v11543_v8, %v11229_v16 }
 0x262   : > { %v4955_v43 = vcombine.low %v4946_v60, %v4953_v34  ;;  %v4973_v19 = vcombine.low %v2602_v12, %v2606_v36  ;;  %v4974_v63 = vcombine.low %v2610_v47, %v2614_v6  ;;  %v4981_v33 = vrot.slane %v4971_v44, %v11256_v28 }
 0x263   : > { %v4988_v52 = vrot.slane %v4972_v62, %v11256_v28  ;;  %v2626_v45 = vrot.slane %v11543_v8, %v11232_v17  ;;  %v2630_v13 = vrot.slane %v11543_v8, %v11235_v10  ;;  %v2634_v5 = vrot.slane %v11543_v8, %v11241_v21 }
 0x264   : > { %v4913_v23 = vrot.slane %v4905_v25, %v11256_v28  ;;  %v4920_v7 = vrot.slane %v4906_v59, %v11256_v28  ;;  %v4962_v22 = vrot.slane %v4954_v51, %v11256_v28  ;;  %v2638_v42 = vrot.slane %v11543_v8, %v11244_v39 }
 0x265   : > { %v2642_v58 = vrot.slane %v11543_v8, %v11250_v27  ;;  %v2646_v53 = vrot.slane %v11543_v8, %v11253_v55  ;;  %v5020_v60 = vcombine.low %v2618_v48, %v2622_v3  ;;  %v5021_v34 = vcombine.low %v2626_v45, %v2630_v13 }
 0x266   : > { %v4969_v12 = vrot.slane %v4955_v43, %v11256_v28  ;;  %v4995_v25 = vrot.slane %v4973_v19, %v11256_v28  ;;  %v5002_v59 = vrot.slane %v4974_v63, %v11256_v28  ;;  %v5022_v36 = vcombine.low %v2634_v5, %v2638_v42  ;;  %v11767_v43 = vpop.xlane.xlu1 %1733 }
 0x267   : > { %v11755_v47 = vcombine.low %v4981_v33, %v4988_v52  ;;  %v5023_v51 = vcombine.low %v2642_v58, %v2646_v53  ;;  %v2650_v6 = vrot.slane %v11559_v18, %v11225_v50  ;;  %v2654_v8 = vrot.slane %v11559_v18, %v11229_v16  ;;  %13779 = vst [vmem:[#allocation28_spill] sm:$0xff] %v11767_v43  ;;  %v11780_v53 = vpop.xlane.xlu0 %1775 }
 0x268   : > { %v5030_v44 = vrot.slane %v5020_v60, %v11256_v28  ;;  %v5037_v62 = vrot.slane %v5021_v34, %v11256_v28  ;;  %v2658_v48 = vrot.slane %v11559_v18, %v11232_v17  ;;  %v2662_v3 = vrot.slane %v11559_v18, %v11235_v10 }
 0x269   : > { %v4921_v19 = vcombine.low %v4913_v23, %v4920_v7  ;;  %v5044_v63 = vrot.slane %v5022_v36, %v11256_v28  ;;  %v2666_v33 = vrot.slane %v11559_v18, %v11241_v21  ;;  %v2670_v52 = vrot.slane %v11559_v18, %v11244_v39 }
 0x26a   : > { %v5051_v45 = vrot.slane %v5023_v51, %v11256_v28  ;;  %v2674_v13 = vrot.slane %v11559_v18, %v11250_v27  ;;  %v2678_v5 = vrot.slane %v11559_v18, %v11253_v55  ;;  %v4970_v23 = vcombine.low %v4962_v22, %v4969_v12  ;;  %v11784_v36 = vpop.xlane.xlu1 %1784 }
 0x26b   : > { %7158 = vperm.xlu0 %9986, %v11668_v2   ;;  %v5004_v7 = vcombine.low %v4995_v25, %v5002_v59  ;;  %v5069_v42 = vcombine.low %v2650_v6, %v2654_v8  ;;  %v5070_v58 = vcombine.low %v2658_v48, %v2662_v3  ;;  %v5011_v60 = vrot.slane %v11755_v47, %v11256_v28 }
 0x26c   : > { %7176 = vperm.xlu1 %9987, %v4823_v1   ;;  %v5052_v34 = vcombine.low %v5030_v44, %v5037_v62  ;;  %v5071_v2 = vcombine.low %v2666_v33, %v2670_v52  ;;  %v5072_v1 = vcombine.low %v2674_v13, %v2678_v5  ;;  %v2682_v18 = vrot.slane %v11593_v41, %v11225_v50  ;;  %v11814_v5 = vpop.xlane.xlu0 %1778 }
 0x26d   : > { %v5079_v51 = vrot.slane %v5069_v42, %v11256_v28  ;;  %v5086_v43 = vrot.slane %v5070_v58, %v11256_v28  ;;  %v2686_v22 = vrot.slane %v11593_v41, %v11229_v16  ;;  %v5053_v12 = vcombine.low %v5044_v63, %v5051_v45 }
 0x26e   : > { %v5093_v25 = vrot.slane %v5071_v2, %v11256_v28  ;;  %v5100_v59 = vrot.slane %v5072_v1, %v11256_v28  ;;  %v13780_v47 = vlaneseq  ;;  %v5018_v8 = vrot.slane %v5004_v7, %v11256_v28 }
 0x26f   : > { %7161 = vperm.xlu0 %9986, %v11670_v0   ;;  %v5101_v44 = vcombine.low %v5079_v51, %v5086_v43  ;;  %v2690_v62 = vrot.slane %v11593_v41, %v11232_v17  ;;  %v2694_v48 = vrot.slane %v11593_v41, %v11235_v10  ;;  %v2698_v0 = vrot.slane %v11593_v41, %v11241_v21 }
 0x270   : > { %7179 = vperm.xlu1 %9987, %v4872_v46   ;;  %v11796_v6 = vand.u32 127, %v13780_v47  ;;  %v5102_v3 = vcombine.low %v5093_v25, %v5100_v59  ;;  %v2702_v46 = vrot.slane %v11593_v41, %v11244_v39  ;;  %v2706_v63 = vrot.slane %v11593_v41, %v11250_v27  ;;  %v11809_v33 = vpop.xlane.xlu1 %1790  ;;  %v11846_v47 = vpop.xlane.xlu0 %1781 }
 0x271   : > { %v5060_v43 = vrot.slane %v5052_v34, %v11256_v28  ;;  %v2710_v52 = vrot.slane %v11593_v41, %v11253_v55  ;;  %v5118_v45 = vcombine.low %v2682_v18, %v2686_v22  ;;  %v5119_v13 = vcombine.low %v2690_v62, %v2694_v48 }
 0x272   : > { %v5067_v7 = vrot.slane %v5053_v12, %v11256_v28  ;;  %v7325_v42 = vadd.s32 4294967288, %v11796_v6  ;;  %v5120_v58 = vcombine.low %v2698_v0, %v2702_v46  ;;  %v2714_v2 = vrot.slane %v11624_v40, %v11225_v50 }
 0x273   : > { %v5109_v1 = vrot.slane %v5101_v44, %v11256_v28  ;;  %v5116_v34 = vrot.slane %v5102_v3, %v11256_v28  ;;  %v5121_v51 = vcombine.low %v2706_v63, %v2710_v52  ;;  %v2718_v41 = vrot.slane %v11624_v40, %v11229_v16 }
 0x274   : > { %7182 = vperm.xlu1 %9987, %v4921_v19   ;;  %v5128_v18 = vrot.slane %v5118_v45, %v11256_v28  ;;  %v5135_v19 = vrot.slane %v5119_v13, %v11256_v28  ;;  %v2722_v22 = vrot.slane %v11624_v40, %v11232_v17  ;;  %v2726_v12 = vrot.slane %v11624_v40, %v11235_v10  ;;  %v11836_v48 = vpop.xlane.xlu1 %1793  ;;  %v13781_v45 = vld [vmem:[#allocation20_spill] sm:$0xff] }
 0x275   : > { %v5142_v25 = vrot.slane %v5120_v58, %v11256_v28  ;;  %v5149_v59 = vrot.slane %v5121_v51, %v11256_v28  ;;  %v2730_v44 = vrot.slane %v11624_v40, %v11241_v21  ;;  %v2734_v62 = vrot.slane %v11624_v40, %v11244_v39 }
 0x276   : > { %v2738_v3 = vrot.slane %v11624_v40, %v11250_v27  ;;  %v2742_v0 = vrot.slane %v11624_v40, %v11253_v55  ;;  %v5167_v46 = vcombine.low %v2714_v2, %v2718_v41  ;;  %v5168_v63 = vcombine.low %v2722_v22, %v2726_v12  ;;  %v11864_v12 = vpop.xlane.xlu0 %1787 }
 0x277   : > { %v5019_v52 = vcombine.low %v5011_v60, %v5018_v8  ;;  %v11843_v13 = vsub.s32 %v7325_v42, %v13781_v45  ;;  %v7332_v58 = vadd.s32 4294967280, %v11796_v6  ;;  %v5169_v51 = vcombine.low %v2730_v44, %v2734_v62 }
 0x278   : > { %7185 = vperm.xlu1 %9987, %v4970_v23   ;;  %v5150_v23 = vcombine.low %v5128_v18, %v5135_v19  ;;  %v5170_v49 = vcombine.low %v2738_v3, %v2742_v0  ;;  %v5177_v11 = vrot.slane %v5167_v46, %v11256_v28  ;;  %v5184_v38 = vrot.slane %v5168_v63, %v11256_v28  ;;  %v11866_v44 = vpop.xlane.xlu1 %1796 }
 0x279   : > { %13782 = vst [vmem:[#allocation20_spill] sm:$0xff] %v11843_v13  ;;  %v5068_v15 = vcombine.low %v5060_v43, %v5067_v7  ;;  %v5191_v40 = vrot.slane %v5169_v51, %v11256_v28  ;;  %v2746_v60 = vrot.slane %v11652_v26, %v11225_v50  ;;  %v2750_v8 = vrot.slane %v11652_v26, %v11229_v16 }
 0x27a   : > { %v5117_v42 = vcombine.low %v5109_v1, %v5116_v34  ;;  %v5151_v2 = vcombine.low %v5142_v25, %v5149_v59  ;;  %v5198_v41 = vrot.slane %v5170_v49, %v11256_v28  ;;  %v2754_v18 = vrot.slane %v11652_v26, %v11232_v17 }
 0x27b   : > { %v5199_v19 = vcombine.low %v5177_v11, %v5184_v38  ;;  %v2758_v43 = vrot.slane %v11652_v26, %v11235_v10  ;;  %v2762_v7 = vrot.slane %v11652_v26, %v11241_v21  ;;  %v2766_v22 = vrot.slane %v11652_v26, %v11244_v39 }
 0x27c   : > { %7188 = vperm.xlu1 %9987, %v5019_v52   ;;  %v5158_v1 = vrot.slane %v5150_v23, %v11256_v28  ;;  %v7339_v49 = vadd.s32 4294967272, %v11796_v6  ;;  %v2770_v38 = vrot.slane %v11652_v26, %v11250_v27  ;;  %v2774_v11 = vrot.slane %v11652_v26, %v11253_v55 }
 0x27d   : > { %v5200_v34 = vcombine.low %v5191_v40, %v5198_v41  ;;  %v5216_v25 = vcombine.low %v2746_v60, %v2750_v8  ;;  %v5217_v59 = vcombine.low %v2754_v18, %v2758_v43  ;;  %v5218_v62 = vcombine.low %v2762_v7, %v2766_v22  ;;  %v11883_v40 = vpop.permute.xlu0 %7131  ;;  %v11896_v7 = vpop.xlane.xlu1 %1799 }
 0x27e   : > { %v5165_v3 = vrot.slane %v5151_v2, %v11256_v28  ;;  %v5219_v0 = vcombine.low %v2770_v38, %v2774_v11  ;;  %v2778_v46 = vrot.slane %v11691_v20, %v11225_v50  ;;  %v2782_v63 = vrot.slane %v11691_v20, %v11229_v16 }
 0x27f   : > { %v5207_v52 = vrot.slane %v5199_v19, %v11256_v28  ;;  %v5226_v51 = vrot.slane %v5216_v25, %v11256_v28  ;;  %v5233_v26 = vrot.slane %v5217_v59, %v11256_v28  ;;  %v5240_v23 = vrot.slane %v5218_v62, %v11256_v28 }
 0x280   : > { %7191 = vperm.xlu1 %9987, %v5068_v15   ;;  %v5247_v15 = vrot.slane %v5219_v0, %v11256_v28  ;;  %v7346_v60 = vadd.s32 4294967264, %v11796_v6  ;;  %v2786_v8 = vrot.slane %v11691_v20, %v11232_v17  ;;  %v2790_v2 = vrot.slane %v11691_v20, %v11235_v10 }
 0x281   : > { %v5214_v41 = vrot.slane %v5200_v34, %v11256_v28  ;;  %v5248_v18 = vcombine.low %v5226_v51, %v5233_v26  ;;  %v2794_v19 = vrot.slane %v11691_v20, %v11241_v21  ;;  %v2798_v43 = vrot.slane %v11691_v20, %v11244_v39  ;;  %v11905_v51 = vpop.permute.xlu0 %7134 }
 0x282   : > { %v5249_v22 = vcombine.low %v5240_v23, %v5247_v15  ;;  %v2802_v38 = vrot.slane %v11691_v20, %v11250_v27  ;;  %v2806_v11 = vrot.slane %v11691_v20, %v11253_v55  ;;  %v5265_v25 = vcombine.low %v2778_v46, %v2782_v63 }
 0x283   : > { %v11903_v34 = vsub.s32 %v7332_v58, %v13781_v45  ;;  %v5266_v59 = vcombine.low %v2786_v8, %v2790_v2  ;;  %v5267_v62 = vcombine.low %v2794_v19, %v2798_v43  ;;  %v5166_v0 = vcombine.low %v5158_v1, %v5165_v3  ;;  %v11927_v19 = vpop.xlane.xlu1 %1802 }
 0x284   : > { %7194 = vperm.xlu1 %9987, %v5117_v42   ;;  %v11908_v42 = vsub.s32 %v7339_v49, %v13781_v45  ;;  %v5268_v26 = vcombine.low %v2802_v38, %v2806_v11  ;;  %v5275_v23 = vrot.slane %v5265_v25, %v11256_v28  ;;  %v5256_v15 = vrot.slane %v5248_v18, %v11256_v28 }
 0x285   : > { %13783 = vst [vmem:[#allocation29_spill] sm:$0xff] %v11903_v34  ;;  %v5263_v9 = vrot.slane %v5249_v22, %v11256_v28  ;;  %v5282_v20 = vrot.slane %v5266_v59, %v11256_v28  ;;  %v5289_v58 = vrot.slane %v5267_v62, %v11256_v28  ;;  %v5215_v1 = vcombine.low %v5207_v52, %v5214_v41 }
 0x286   : > { %13784 = vst [vmem:[#allocation30_spill] sm:$0xff] %v11908_v42  ;;  %v11918_v3 = vsub.s32 %v7346_v60, %v13781_v45  ;;  %v5296_v49 = vrot.slane %v5268_v26, %v11256_v28  ;;  %v2810_v2 = vrot.slane %v11723_v61, %v11225_v50  ;;  %v2814_v18 = vrot.slane %v11723_v61, %v11229_v16 }
 0x287   : > { %v5297_v8 = vcombine.low %v5275_v23, %v5282_v20  ;;  %v11931_v52 = vsub.s32 %v11796_v6, %v13781_v45  ;;  %v2818_v60 = vrot.slane %v11723_v61, %v11232_v17  ;;  %v2822_v41 = vrot.slane %v11723_v61, %v11235_v10  ;;  %v10020_v20 = vld [vmem:[#allocation3] sm:$0xff]  }
 0x288   : > { %7197 = vperm.xlu1 %9987, %v5166_v0   ;;  %13785 = vst [vmem:[#allocation31_spill] sm:$0xff] %v11918_v3  ;;  %v5298_v43 = vcombine.low %v5289_v58, %v5296_v49  ;;  %v5264_v22 = vcombine.low %v5256_v15, %v5263_v9  ;;  %v7353_v38 = vadd.s32 4294967256, %v11796_v6  ;;  %v2826_v11 = vrot.slane %v11723_v61, %v11241_v21 }
 0x289   : > { %13786 = vst [vmem:[#allocation32_spill] sm:$0xff] %v11931_v52  ;;  %v2830_v25 = vrot.slane %v11723_v61, %v11244_v39  ;;  %v5305_v59 = vrot.slane %v5297_v8, %v11256_v28  ;;  %v2834_v62 = vrot.slane %v11723_v61, %v11250_v27  ;;  %v2838_v0 = vrot.slane %v11723_v61, %v11253_v55  ;;  %v11955_v61 = vpop.permute.xlu0 %7137 }
 0x28a   : > { %v5314_v26 = vcombine.low %v2810_v2, %v2814_v18  ;;  %v5315_v23 = vcombine.low %v2818_v60, %v2822_v41  ;;  %v2330_v15 = vrot.slane %v11672_v57, %v11225_v50  ;;  %v5312_v58 = vrot.slane %v5298_v43, %v11256_v28  ;;  %v11963_v41 = vpop.xlane.xlu1 %1805 }
 0x28b   : > { %v5316_v9 = vcombine.low %v2826_v11, %v2830_v25  ;;  %v5317_v49 = vcombine.low %v2834_v62, %v2838_v0  ;;  %v13718_v8 = vmov 0.0   ;;  %v2334_v63 = vrot.slane %v11672_v57, %v11229_v16  ;;  %13787 = vst [vmem:[#allocation33_spill] sm:$0xff] %v11963_v41 }
 0x28c   : > { %7200 = vperm.xlu1 %9987, %v5215_v1   ;;  %v5324_v1 = vrot.slane %v5314_v26, %v11256_v28  ;;  %9871 = vmatprep.subr.bf16.mxu1 %v13718_v8  ;;  %v5331_v2 = vrot.slane %v5315_v23, %v11256_v28  ;;  %v2338_v43 = vrot.slane %v11672_v57, %v11232_v17 }
 0x28d   : > { %v5338_v18 = vrot.slane %v5316_v9, %v11256_v28  ;;  %v2342_v60 = vrot.slane %v11672_v57, %v11235_v10  ;;  %v5345_v11 = vrot.slane %v5317_v49, %v11256_v28  ;;  %v2350_v25 = vrot.slane %v11672_v57, %v11244_v39  ;;  %9872 = vmatpush3.bf16.msra.mxu1 %v10020_v20  ;;  %v10021_v9 = vld [vmem:[#allocation3 + $0x8] sm:$0xff]  }
 0x28e   : > { %1838 = vadd.xlane.f32.xlu0 %v11493_v14  ;;  %v2346_v14 = vrot.slane %v11672_v57, %v11241_v21  ;;  %v2354_v62 = vrot.slane %v11672_v57, %v11250_v27  ;;  %v5346_v0 = vcombine.low %v5324_v1, %v5331_v2  ;;  %v2358_v26 = vrot.slane %v11672_v57, %v11253_v55 }
 0x28f   : > { %v4580_v23 = vcombine.low %v2338_v43, %v2342_v60  ;;  %v5313_v46 = vcombine.low %v5305_v59, %v5312_v58  ;;  %v11975_v49 = vsub.s32 %v7353_v38, %v13781_v45  ;;  %v5347_v8 = vcombine.low %v5338_v18, %v5345_v11  ;;  %9873 = vmatprep.subr.bf16.mxu1 %v13789_v30 }
 0x290   : > { %7203 = vperm.xlu1 %9987, %v5264_v22   ;;  %v4579_v22 = vcombine.low %v2330_v15, %v2334_v63  ;;  %v4581_v41 = vcombine.low %v2346_v14, %v2350_v25  ;;  %v7343_v1 = vrot.slane %v11955_v61, %v11908_v42  ;;  %v5354_v2 = vrot.slane %v5346_v0, %v11256_v28  ;;  %v7141_v58 = vpop.permute.xlu0 %7140 }
 0x291   : > { %13788 = vst [vmem:[#allocation34_spill] sm:$0xff] %v11975_v49  ;;  %v4582_v57 = vcombine.low %v2354_v62, %v2358_v26  ;;  %v5361_v59 = vrot.slane %v5347_v8, %v11256_v28  ;;  %v4596_v38 = vrot.slane %v4580_v23, %v11256_v28  ;;  %v7360_v20 = vadd.s32 4294967248, %v11796_v6  ;;  %9874 = vmatpush3.bf16.msra.mxu1 %v10021_v9  ;;  %v10022_v8 = vld [vmem:[#allocation3 + $0x10] sm:$0xff]  }
 0x292   : > { %1841 = vadd.xlane.f32.xlu0 %v11503_v4  ;;  %v4589_v63 = vrot.slane %v4579_v22, %v11256_v28  ;;  %v4603_v15 = vrot.slane %v4581_v41, %v11256_v28  ;;  %v2842_v61 = vrot.slane %v11750_v24, %v11225_v50  ;;  %v2846_v18 = vrot.slane %v11750_v24, %v11229_v16 }
 0x293   : > { %v4610_v4 = vrot.slane %v4582_v57, %v11256_v28  ;;  %v5362_v60 = vcombine.low %v5354_v2, %v5361_v59  ;;  %v2854_v11 = vrot.slane %v11750_v24, %v11235_v10  ;;  %v2858_v14 = vrot.slane %v11750_v24, %v11241_v21  ;;  %9875 = vmatprep.subr.bf16.mxu1 %v13789_v30 }
 0x294   : > { %7206 = vperm.xlu1 %9987, %v5313_v46   ;;  %v2850_v46 = vrot.slane %v11750_v24, %v11232_v17  ;;  %v4611_v41 = vcombine.low %v4589_v63, %v4596_v38  ;;  %v2862_v0 = vrot.slane %v11750_v24, %v11244_v39  ;;  %v2866_v26 = vrot.slane %v11750_v24, %v11250_v27 }
 0x295   : > { %v4612_v62 = vcombine.low %v4603_v15, %v4610_v4  ;;  %v7350_v22 = vrot.slane %v7141_v58, %v11918_v3  ;;  %v2870_v23 = vrot.slane %v11750_v24, %v11253_v55  ;;  %v5363_v9 = vcombine.low %v2842_v61, %v2846_v18  ;;  %9876 = vmatpush3.bf16.msra.mxu1 %v10022_v8  ;;  %v10023_v4 = vld [vmem:[#allocation3 + $0x18] sm:$0xff]  }
 0x296   : > { %v7129_v43 = vpop.permute.xlu1 %7128  ;;  %v5364_v2 = vcombine.low %v2850_v46, %v2854_v11  ;;  %v13790_v57 = vrot.slane %v11883_v40, %v11843_v13  ;;  %v4619_v59 = vrot.slane %v4611_v41, %v11256_v28  ;;  %v5365_v15 = vcombine.low %v2858_v14, %v2862_v0  ;;  %9877 = vmatprep.subr.bf16.mxu1 %v13789_v30 }
 0x297   : > { %v7324_v25 = vrot.slane %v7129_v43, %v11931_v52  ;;  %v4626_v38 = vrot.slane %v4612_v62, %v11256_v28  ;;  %v13791_v58 = vrot.slane %v11905_v51, %v11903_v34  ;;  %v5366_v24 = vcombine.low %v2866_v26, %v2870_v23 }
 0x298   : > { %7209 = vperm.xlu1 %9987, %v5362_v60   ;;  %v5373_v61 = vrot.slane %v5363_v9, %v11256_v28  ;;  %v5380_v18 = vrot.slane %v5364_v2, %v11256_v28  ;;  %v5387_v46 = vrot.slane %v5365_v15, %v11256_v28  ;;  %v2362_v8 = vrot.slane %v11706_v37, %v11225_v50 }
 0x299   : > { %v7331_v63 = vsel %vm7330_vm3, %v13790_v57, %v7324_v25  ;;  %v2366_v60 = vrot.slane %v11706_v37, %v11229_v16  ;;  %v5394_v41 = vrot.slane %v5366_v24, %v11256_v28  ;;  %v2370_v14 = vrot.slane %v11706_v37, %v11232_v17  ;;  %9878 = vmatpush3.bf16.msra.mxu1 %v10023_v4 }
 0x29a   : > { %v7338_v43 = vsel %vm7337_vm4, %v13791_v58, %v7331_v63  ;;  %v5395_v11 = vcombine.low %v5373_v61, %v5380_v18  ;;  %v2378_v62 = vrot.slane %v11706_v37, %v11241_v21  ;;  %v2382_v0 = vrot.slane %v11706_v37, %v11244_v39  ;;  %9879 = vmatprep.subr.bf16.mxu1 %v13789_v30 }
 0x29b   : > { %v7345_v40 = vsel %vm7344_vm5, %v7343_v1, %v7338_v43  ;;  %v7144_v25 = vpop.permute.xlu0 %7143  ;;  %v2374_v1 = vrot.slane %v11706_v37, %v11235_v10  ;;  %v2386_v26 = vrot.slane %v11706_v37, %v11250_v27  ;;  %v5396_v9 = vcombine.low %v5387_v46, %v5394_v41 }
 0x29c   : > { %v7352_v51 = vsel %vm7351_vm6, %v7350_v22, %v7345_v40  ;;  %v10024_v22 = vld [vmem:[#allocation3 + $0x20] sm:$0xff]   ;;  %v7357_v23 = vrot.slane %v7144_v25, %v11975_v49  ;;  %v5403_v2 = vrot.slane %v5395_v11, %v11256_v28  ;;  %v2390_v57 = vrot.slane %v11706_v37, %v11253_v55 }
 0x29d   : > { %v12044_v63 = vsub.s32 %v7360_v20, %v13781_v45  ;;  %v4628_v15 = vcombine.low %v2362_v8, %v2366_v60  ;;  %v4629_v58 = vcombine.low %v2370_v14, %v2374_v1  ;;  %v4630_v43 = vcombine.low %v2378_v62, %v2382_v0  ;;  %9880 = vmatpush3.bf16.msra.mxu1 %v10024_v22  ;;  %v10025_v20 = vld [vmem:[#allocation3 + $0x28] sm:$0xff]  }
 0x29e   : > { %v7359_v24 = vsel %vm7358_vm7, %v7357_v23, %v7352_v51  ;;  %v4627_v4 = vcombine.low %v4619_v59, %v4626_v38  ;;  %v5410_v61 = vrot.slane %v5396_v9, %v11256_v28  ;;  %v4631_v18 = vcombine.low %v2386_v26, %v2390_v57  ;;  %9881 = vmatprep.subr.bf16.mxu1 %v13789_v30 }
 0x29f   : > { %13792 = vst [vmem:[#allocation35_spill] sm:$0xff] %v12044_v63  ;;  %v4638_v40 = vrot.slane %v4628_v15, %v11256_v28  ;;  %v4645_v46 = vrot.slane %v4629_v58, %v11256_v28  ;;  %v4652_v37 = vrot.slane %v4630_v43, %v11256_v28  ;;  %v7367_v41 = vadd.s32 4294967240, %v11796_v6 }
 0x2a0   : > { %v5411_v11 = vcombine.low %v5403_v2, %v5410_v61  ;;  %v4659_v8 = vrot.slane %v4631_v18, %v11256_v28  ;;  %v2874_v60 = vrot.slane %v11780_v53, %v11225_v50  ;;  %v2878_v59 = vrot.slane %v11780_v53, %v11229_v16  ;;  %v10026_v18 = vld [vmem:[#allocation3 + $0x30] sm:$0xff]  }
 0x2a1   : > { %v4660_v38 = vcombine.low %v4638_v40, %v4645_v46  ;;  %v2882_v51 = vrot.slane %v11780_v53, %v11232_v17  ;;  %v2886_v14 = vrot.slane %v11780_v53, %v11235_v10  ;;  %v2890_v25 = vrot.slane %v11780_v53, %v11241_v21  ;;  %9882 = vmatpush3.bf16.msra.mxu1 %v10025_v20 }
 0x2a2   : > { %v7147_v1 = vpop.permute.xlu0 %7146  ;;  %7212 = vperm.xlu1 %9987, %v5411_v11   ;;  %v4661_v62 = vcombine.low %v4652_v37, %v4659_v8  ;;  %v2894_v0 = vrot.slane %v11780_v53, %v11244_v39  ;;  %v2898_v26 = vrot.slane %v11780_v53, %v11250_v27  ;;  %v2902_v22 = vrot.slane %v11780_v53, %v11253_v55 }
 0x2a3   : > { %v7364_v23 = vrot.slane %v7147_v1, %v12044_v63  ;;  %v4668_v9 = vrot.slane %v4660_v38, %v11256_v28  ;;  %v5412_v2 = vcombine.low %v2874_v60, %v2878_v59  ;;  %v5413_v57 = vcombine.low %v2882_v51, %v2886_v14  ;;  %9883 = vmatprep.subr.bf16.mxu1 %v13789_v30  ;;  %v10027_v1 = vld [vmem:[#allocation3 + $0x38] sm:$0xff]  }
 0x2a4   : > { %v4675_v15 = vrot.slane %v4661_v62, %v11256_v28  ;;  %v12074_v58 = vsub.s32 %v7367_v41, %v13781_v45  ;;  %v5414_v43 = vcombine.low %v2890_v25, %v2894_v0  ;;  %v5415_v61 = vcombine.low %v2898_v26, %v2902_v22 }
 0x2a5   : > { %v7366_v40 = vsel %vm7365_vm8, %v7364_v23, %v7359_v24  ;;  %v5422_v53 = vrot.slane %v5412_v2, %v11256_v28  ;;  %v5429_v46 = vrot.slane %v5413_v57, %v11256_v28  ;;  %v7374_v41 = vadd.s32 4294967232, %v11796_v6  ;;  %9884 = vmatpush3.bf16.msra.mxu1 %v10026_v18 }
 0x2a6   : > { %13793 = vst [vmem:[#allocation36_spill] sm:$0xff] %v12074_v58  ;;  %v4676_v37 = vcombine.low %v4668_v9, %v4675_v15  ;;  %v5436_v20 = vrot.slane %v5414_v43, %v11256_v28  ;;  %v5443_v11 = vrot.slane %v5415_v61, %v11256_v28  ;;  %v3002_v59 = vrot.slane %v11864_v12, %v11225_v50 }
 0x2a7   : > { %v5444_v60 = vcombine.low %v5422_v53, %v5429_v46  ;;  %v3006_v24 = vrot.slane %v11864_v12, %v11229_v16  ;;  %v3010_v38 = vrot.slane %v11864_v12, %v11232_v17  ;;  %v3014_v25 = vrot.slane %v11864_v12, %v11235_v10  ;;  %9885 = vmatprep.subr.bf16.mxu1 %v13789_v30 }
 0x2a8   : > { %7164 = vperm.xlu0 %9986, %v4627_v4   ;;  %v7150_v8 = vpop.permute.xlu0 %7149  ;;  %v5445_v14 = vcombine.low %v5436_v20, %v5443_v11  ;;  %v3018_v4 = vrot.slane %v11864_v12, %v11241_v21  ;;  %v3022_v0 = vrot.slane %v11864_v12, %v11244_v39  ;;  %v3026_v26 = vrot.slane %v11864_v12, %v11250_v27 }
 0x2a9   : > { %v7371_v51 = vrot.slane %v7150_v8, %v12074_v58  ;;  %v5452_v62 = vrot.slane %v5444_v60, %v11256_v28  ;;  %v3030_v22 = vrot.slane %v11864_v12, %v11253_v55  ;;  %v5608_v2 = vcombine.low %v3002_v59, %v3006_v24  ;;  %9886 = vmatpush3.bf16.msra.mxu1 %v10027_v1 }
 0x2aa   : > { %v5459_v9 = vrot.slane %v5445_v14, %v11256_v28  ;;  %v5609_v57 = vcombine.low %v3010_v38, %v3014_v25  ;;  %v12105_v15 = vsub.s32 %v7374_v41, %v13781_v45  ;;  %v5610_v43 = vcombine.low %v3018_v4, %v3022_v0 }
 0x2ab   : > { %v7373_v23 = vsel %vm7372_vm9, %v7371_v51, %v7366_v40  ;;  %v5611_v61 = vcombine.low %v3026_v26, %v3030_v22  ;;  %v7381_v18 = vadd.s32 4294967224, %v11796_v6  ;;  %v5618_v46 = vrot.slane %v5608_v2, %v11256_v28 }
 0x2ac   : > { %7167 = vperm.xlu0 %9986, %v4676_v37   ;;  %13794 = vst [vmem:[#allocation37_spill] sm:$0xff] %v12105_v15  ;;  %v5460_v53 = vcombine.low %v5452_v62, %v5459_v9  ;;  %v5625_v12 = vrot.slane %v5609_v57, %v11256_v28  ;;  %v2906_v40 = vrot.slane %v11814_v5, %v11225_v50 }
 0x2ad   : > { %v5632_v20 = vrot.slane %v5610_v43, %v11256_v28  ;;  %v5639_v37 = vrot.slane %v5611_v61, %v11256_v28  ;;  %v12115_v11 = vsub.s32 %v7381_v18, %v13781_v45  ;;  %v2910_v41 = vrot.slane %v11814_v5, %v11229_v16 }
 0x2ae   : > { %7215 = vperm.xlu1 %9987, %v5460_v53   ;;  %v5640_v8 = vcombine.low %v5618_v46, %v5625_v12  ;;  %v2914_v60 = vrot.slane %v11814_v5, %v11232_v17  ;;  %v2918_v59 = vrot.slane %v11814_v5, %v11235_v10  ;;  %v2922_v24 = vrot.slane %v11814_v5, %v11241_v21 }
 0x2af   : > { %13795 = vst [vmem:[#allocation38_spill] sm:$0xff] %v12115_v11  ;;  %v7153_v38 = vpop.permute.xlu0 %7152  ;;  %v5641_v51 = vcombine.low %v5632_v20, %v5639_v37  ;;  %v2926_v14 = vrot.slane %v11814_v5, %v11244_v39  ;;  %v2930_v25 = vrot.slane %v11814_v5, %v11250_v27  ;;  %v2934_v4 = vrot.slane %v11814_v5, %v11253_v55 }
 0x2b0   : > { %v7378_v1 = vrot.slane %v7153_v38, %v12105_v15  ;;  %v5648_v62 = vrot.slane %v5640_v8, %v11256_v28  ;;  %v5461_v0 = vcombine.low %v2906_v40, %v2910_v41  ;;  %v5462_v26 = vcombine.low %v2914_v60, %v2918_v59 }
 0x2b1   : > { %v5655_v22 = vrot.slane %v5641_v51, %v11256_v28  ;;  %v5463_v9 = vcombine.low %v2922_v24, %v2926_v14  ;;  %v5464_v2 = vcombine.low %v2930_v25, %v2934_v4  ;;  %v2938_v57 = vrot.slane %v11846_v47, %v11225_v50 }
 0x2b2   : > { %v7380_v43 = vsel %vm7379_vm10, %v7378_v1, %v7373_v23  ;;  %v5471_v61 = vrot.slane %v5461_v0, %v11256_v28  ;;  %v5478_v5 = vrot.slane %v5462_v26, %v11256_v28  ;;  %v2942_v18 = vrot.slane %v11846_v47, %v11229_v16  ;;  %v7703_v1 = vld [vmem:[%s469_s23] sm:$0x1]  ;;  %s13639_s23 = scalar_lea.hbm %s13834_s28, %s9814_s22 }
 0x2b3   : > { %v5656_v53 = vcombine.low %v5648_v62, %v5655_v22  ;;  %v5485_v46 = vrot.slane %v5463_v9, %v11256_v28  ;;  %v5492_v12 = vrot.slane %v5464_v2, %v11256_v28  ;;  %v2946_v40 = vrot.slane %v11846_v47, %v11232_v17  ;;  %9888 = vmatmul.mubr.bf16.vlgmr.msra.gmra.mrb[0].mxu1 %v7703_v1 }
 0x2b4   : > { %v5493_v20 = vcombine.low %v5471_v61, %v5478_v5  ;;  %v2950_v37 = vrot.slane %v11846_v47, %v11235_v10  ;;  %v2954_v41 = vrot.slane %v11846_v47, %v11241_v21  ;;  %v2958_v8 = vrot.slane %v11846_v47, %v11244_v39 }
 0x2b5   : > { %v7156_v23 = vpop.permute.xlu0 %7155  ;;  %7227 = vperm.xlu1 %9987, %v5656_v53   ;;  %v5494_v59 = vcombine.low %v5485_v46, %v5492_v12  ;;  %v2962_v24 = vrot.slane %v11846_v47, %v11250_v27  ;;  %v2966_v38 = vrot.slane %v11846_v47, %v11253_v55  ;;  %v5510_v14 = vcombine.low %v2938_v57, %v2942_v18 }
 0x2b6   : > { %v7385_v60 = vrot.slane %v7156_v23, %v12115_v11  ;;  %v5501_v51 = vrot.slane %v5493_v20, %v11256_v28  ;;  %v5511_v25 = vcombine.low %v2946_v40, %v2950_v37  ;;  %v5512_v4 = vcombine.low %v2954_v41, %v2958_v8 }
 0x2b7   : > { %v5508_v0 = vrot.slane %v5494_v59, %v11256_v28  ;;  %v5513_v26 = vcombine.low %v2962_v24, %v2966_v38  ;;  %v5520_v22 = vrot.slane %v5510_v14, %v11256_v28  ;;  %v13796_v5 = vmov 0  }
 0x2b8   : > { %v12162_v62 = vsel %vm7386_vm11, %v7385_v60, %v7380_v43  ;;  %v5527_v9 = vrot.slane %v5511_v25, %v11256_v28  ;;  %v5534_v2 = vrot.slane %v5512_v4, %v11256_v28  ;;  %8188 = vmatprep.mubr.bf16.mxu1 %v13796_v5  ;;  %v2970_v12 = vrot.slane %v11784_v36, %v11225_v50 }
 0x2b9   : > { %v5509_v47 = vcombine.low %v5501_v51, %v5508_v0  ;;  %v5541_v57 = vrot.slane %v5513_v26, %v11256_v28  ;;  %v2974_v40 = vrot.slane %v11784_v36, %v11229_v16  ;;  %v2978_v23 = vrot.slane %v11784_v36, %v11232_v17 }
 0x2ba   : > { %v5542_v61 = vcombine.low %v5520_v22, %v5527_v9  ;;  %v2982_v20 = vrot.slane %v11784_v36, %v11235_v10  ;;  %v2986_v37 = vrot.slane %v11784_v36, %v11241_v21  ;;  %v2990_v41 = vrot.slane %v11784_v36, %v11244_v39 }
 0x2bb   : > { %7218 = vperm.xlu1 %9987, %v5509_v47   ;;  %v5543_v43 = vcombine.low %v5534_v2, %v5541_v57  ;;  %v2994_v8 = vrot.slane %v11784_v36, %v11250_v27  ;;  %v2998_v60 = vrot.slane %v11784_v36, %v11253_v55  ;;  %v3034_v24 = vrot.slane %v11809_v33, %v11225_v50 }
 0x2bc   : > { %v5550_v18 = vrot.slane %v5542_v61, %v11256_v28  ;;  %v3038_v38 = vrot.slane %v11809_v33, %v11229_v16  ;;  %v3042_v51 = vrot.slane %v11809_v33, %v11232_v17  ;;  %v3046_v14 = vrot.slane %v11809_v33, %v11235_v10 }
 0x2bd   : > { %v5557_v53 = vrot.slane %v5543_v43, %v11256_v28  ;;  %v3050_v25 = vrot.slane %v11809_v33, %v11241_v21  ;;  %v3054_v36 = vrot.slane %v11809_v33, %v11244_v39  ;;  %v3058_v4 = vrot.slane %v11809_v33, %v11250_v27 }
 0x2be   : > { %v3062_v1 = vrot.slane %v11809_v33, %v11253_v55  ;;  %v5559_v0 = vcombine.low %v2970_v12, %v2974_v40  ;;  %v5560_v26 = vcombine.low %v2978_v23, %v2982_v20  ;;  %v5561_v22 = vcombine.low %v2986_v37, %v2990_v41 }
 0x2bf   : > { %v5558_v46 = vcombine.low %v5550_v18, %v5557_v53  ;;  %v5562_v9 = vcombine.low %v2994_v8, %v2998_v60  ;;  %v5657_v47 = vcombine.low %v3034_v24, %v3038_v38  ;;  %v5658_v57 = vcombine.low %v3042_v51, %v3046_v14 }
 0x2c0   : > { %v5659_v61 = vcombine.low %v3050_v25, %v3054_v36  ;;  %v5660_v43 = vcombine.low %v3058_v4, %v3062_v1  ;;  %v5569_v18 = vrot.slane %v5559_v0, %v11256_v28  ;;  %v5576_v53 = vrot.slane %v5560_v26, %v11256_v28 }
 0x2c1   : > { %7221 = vperm.xlu1 %9987, %v5558_v46   ;;  %v5583_v46 = vrot.slane %v5561_v22, %v11256_v28  ;;  %v5590_v33 = vrot.slane %v5562_v9, %v11256_v28  ;;  %v3066_v12 = vrot.slane %v11836_v48, %v11225_v50  ;;  %v3074_v40 = vrot.slane %v11836_v48, %v11232_v17 }
 0x2c2   : > { %v3078_v23 = vrot.slane %v11836_v48, %v11235_v10  ;;  %v3082_v37 = vrot.slane %v11836_v48, %v11241_v21  ;;  %v3086_v41 = vrot.slane %v11836_v48, %v11244_v39  ;;  %v3090_v8 = vrot.slane %v11836_v48, %v11250_v27 }
 0x2c3   : > { %v3094_v60 = vrot.slane %v11836_v48, %v11253_v55  ;;  %v5667_v24 = vrot.slane %v5657_v47, %v11256_v28  ;;  %v5674_v38 = vrot.slane %v5658_v57, %v11256_v28  ;;  %v5688_v51 = vrot.slane %v5660_v43, %v11256_v28 }
 0x2c4   : > { %v3098_v14 = vrot.slane %v11866_v44, %v11225_v50  ;;  %v3102_v25 = vrot.slane %v11866_v44, %v11229_v16  ;;  %v3106_v36 = vrot.slane %v11866_v44, %v11232_v17  ;;  %v3114_v4 = vrot.slane %v11866_v44, %v11241_v21 }
 0x2c5   : > { %v3118_v1 = vrot.slane %v11866_v44, %v11244_v39  ;;  %v3122_v0 = vrot.slane %v11866_v44, %v11250_v27  ;;  %v3126_v26 = vrot.slane %v11866_v44, %v11253_v55  ;;  %v5707_v47 = vcombine.low %v3074_v40, %v3078_v23 }
 0x2c6   : > { %v5708_v57 = vcombine.low %v3082_v37, %v3086_v41  ;;  %v5591_v43 = vcombine.low %v5569_v18, %v5576_v53  ;;  %v5592_v5 = vcombine.low %v5583_v46, %v5590_v33  ;;  %v5755_v30 = vcombine.low %v3098_v14, %v3102_v25 }
 0x2c7   : > { %v5689_v15 = vcombine.low %v5667_v24, %v5674_v38  ;;  %v5757_v63 = vcombine.low %v3114_v4, %v3118_v1  ;;  %v5758_v49 = vcombine.low %v3122_v0, %v3126_v26  ;;  %v7388_v18 = vadd.s32 4294967216, %v11796_v6 }
 0x2c8   : > { %v12189_v59 = vpop.xlane.xlu1 %1808  ;;  %v7395_v53 = vadd.s32 4294967208, %v11796_v6  ;;  %v5599_v46 = vrot.slane %v5591_v43, %v11256_v28  ;;  %v5765_v33 = vrot.slane %v5755_v30, %v11256_v28  ;;  %v5606_v40 = vrot.slane %v5592_v5, %v11256_v28 }
 0x2c9   : > { %v5697_v23 = vrot.slane %v5689_v15, %v11256_v28  ;;  %v5779_v37 = vrot.slane %v5757_v63, %v11256_v28  ;;  %v5786_v41 = vrot.slane %v5758_v49, %v11256_v28  ;;  %v3130_v30 = vrot.slane %v11896_v7, %v11225_v50 }
 0x2ca   : > { %v3138_v15 = vrot.slane %v11896_v7, %v11232_v17  ;;  %v3142_v49 = vrot.slane %v11896_v7, %v11235_v10  ;;  %v3154_v5 = vrot.slane %v11896_v7, %v11250_v27  ;;  %v12294_v14 = vsub.s32 %v7388_v18, %v13781_v45 }
 0x2cb   : > { %1844 = vadd.xlane.f32.xlu0 %v11507_v29  ;;  %v3070_v29 = vrot.slane %v11836_v48, %v11229_v16  ;;  %v3110_v48 = vrot.slane %v11866_v44, %v11235_v10  ;;  %v5723_v44 = vrot.slane %v5707_v47, %v11256_v28 }
 0x2cc   : > { %v12208_v2 = vpop.xlane.xlu1 %1811  ;;  %v5805_v26 = vcombine.low %v3138_v15, %v3142_v49  ;;  %v3186_v49 = vrot.slane %v11927_v19, %v11250_v27 }
 0x2cd   : > { %v5706_v9 = vcombine.low %v3066_v12, %v3070_v29  ;;  %v5756_v11 = vcombine.low %v3106_v36, %v3110_v48  ;;  %v5730_v12 = vrot.slane %v5708_v57, %v11256_v28  ;;  %v12299_v36 = vsub.s32 %v7395_v53, %v13781_v45 }
 0x2ce   : > { %v12301_v48 = vcombine.low %v5599_v46, %v5606_v40  ;;  %v3162_v57 = vrot.slane %v11927_v19, %v11225_v50 }
 0x2cf   : > { %1847 = vadd.xlane.f32.xlu0 %v11511_v54  ;;  %v5681_v54 = vrot.slane %v5659_v61, %v11256_v28  ;;  %v5709_v61 = vcombine.low %v3090_v8, %v3094_v60 }
 0x2d0   : > { %v12223_v20 = vpop.xlane.xlu1 %1814 }
 0x2d1   : > { %13797 = vst [vmem:[#allocation39_spill] sm:$0xff] %v12223_v20  ;;  %v5690_v58 = vcombine.low %v5681_v54, %v5688_v51  ;;  %v5737_v29 = vrot.slane %v5709_v61, %v11256_v28  ;;  %v3158_v54 = vrot.slane %v11896_v7, %v11253_v55  ;;  %v5788_v51 = vcombine.low %v5779_v37, %v5786_v41 }
 0x2d3   : > { %1850 = vadd.xlane.f32.xlu0 %v11518_v35  ;;  %v5716_v35 = vrot.slane %v5706_v9, %v11256_v28  ;;  %v5704_v60 = vrot.slane %v5690_v58, %v11256_v28  ;;  %v5739_v38 = vcombine.low %v5730_v12, %v5737_v29  ;;  %v3150_v58 = vrot.slane %v11896_v7, %v11244_v39  ;;  %v13799_v29 = vld [vmem:[#allocation22_spill] sm:$0xff] }
 0x2d4   : > { %v12254_v22 = vpop.xlane.xlu1 %1817  ;;  %v5807_v47 = vcombine.low %v3154_v5, %v3158_v54  ;;  %v5802_v43 = vrot.slane %v5788_v51, %v11256_v28  ;;  %v3174_v12 = vrot.slane %v11927_v19, %v11235_v10 }
 0x2d5   : > { %v5738_v24 = vcombine.low %v5716_v35, %v5723_v44  ;;  %v12303_v4 = vcombine.low %v5697_v23, %v5704_v60  ;;  %v5753_v0 = vrot.slane %v5739_v38, %v11256_v28  ;;  %v3166_v35 = vrot.slane %v11927_v19, %v11229_v16 }
 0x2d6   : > { %v3170_v44 = vrot.slane %v11927_v19, %v11232_v17  ;;  %v3178_v38 = vrot.slane %v11927_v19, %v11241_v21 }
 0x2d7   : > { %1853 = vadd.xlane.f32.xlu0 %v11525_v56  ;;  %v5772_v56 = vrot.slane %v5756_v11, %v11256_v28  ;;  %v3134_v11 = vrot.slane %v11896_v7, %v11229_v16  ;;  %v5746_v1 = vrot.slane %v5738_v24, %v11256_v28 }
 0x2d8   : > { %v12257_v20 = vpop.xlane.xlu1 %1820 }
 0x2d9   : > { %v5787_v63 = vcombine.low %v5765_v33, %v5772_v56 }
 0x2db   : > { %1856 = vadd.xlane.f32.xlu0 %v11533_v32  ;;  %v3146_v32 = vrot.slane %v11896_v7, %v11241_v21  ;;  %v5804_v7 = vcombine.low %v3130_v30, %v3134_v11  ;;  %v3182_v30 = vrot.slane %v11927_v19, %v11244_v39 }
 0x2dc   : > { %v12273_v8 = vpop.xlane.xlu1 %1823 }
 0x2dd   : > { %v5806_v9 = vcombine.low %v3146_v32, %v3150_v58  ;;  %v3190_v32 = vrot.slane %v11927_v19, %v11253_v55  ;;  %v5814_v51 = vrot.slane %v5804_v7, %v11256_v28  ;;  %v5855_v7 = vcombine.low %v3178_v38, %v3182_v30 }
 0x2df   : > { %1859 = vadd.xlane.f32.xlu0 %v11536_v31  ;;  %v5795_v31 = vrot.slane %v5787_v63, %v11256_v28  ;;  %v13801_v63 = vld [vmem:[#allocation23_spill] sm:$0xff]  ;;  %v5828_v19 = vrot.slane %v5806_v9, %v11256_v28  ;;  %v13803_v9 = vld [vmem:[#allocation33_spill] sm:$0xff] }
 0x2e0   : > { %v12296_v25 = vpop.xlane.xlu1 %1826 }
 0x2e1   : > { %13798 = vst [vmem:[#allocation40_spill] sm:$0xff] %v12296_v25 }
 0x2e2   : > { %v1836_v61 = vpop.xlane.xlu0 %1835 }
 0x2e3   : > { %1862 = vadd.xlane.f32.xlu0 %v13799_v29  ;;  %v3514_v18 = vrot.slane %v1836_v61, %v11225_v50  ;;  %v3518_v53 = vrot.slane %v1836_v61, %v11229_v16  ;;  %v3522_v46 = vrot.slane %v1836_v61, %v11232_v17  ;;  %v3526_v33 = vrot.slane %v1836_v61, %v11235_v10 }
 0x2e4   : > { %v12322_v56 = vpop.xlane.xlu1 %1829  ;;  %v3530_v40 = vrot.slane %v1836_v61, %v11241_v21  ;;  %v3534_v23 = vrot.slane %v1836_v61, %v11244_v39  ;;  %v3538_v37 = vrot.slane %v1836_v61, %v11250_v27  ;;  %v3542_v41 = vrot.slane %v1836_v61, %v11253_v55 }
 0x2e5   : > { %13800 = vst [vmem:[#allocation22_spill] sm:$0xff] %v12322_v56  ;;  %v6392_v60 = vcombine.low %v3514_v18, %v3518_v53  ;;  %v6393_v24 = vcombine.low %v3522_v46, %v3526_v33  ;;  %v5821_v61 = vrot.slane %v5805_v26, %v11256_v28  ;;  %v12345_v53 = vcombine.low %v5746_v1, %v5753_v0 }
 0x2e6   : > { %v6394_v11 = vcombine.low %v3530_v40, %v3534_v23  ;;  %v6395_v15 = vcombine.low %v3538_v37, %v3542_v41  ;;  %v5835_v33 = vrot.slane %v5807_v47, %v11256_v28  ;;  %v5853_v40 = vcombine.low %v3162_v57, %v3166_v35 }
 0x2e7   : > { %1865 = vadd.xlane.f32.xlu0 %v13801_v63  ;;  %v6402_v58 = vrot.slane %v6392_v60, %v11256_v28  ;;  %v6409_v5 = vrot.slane %v6393_v24, %v11256_v28  ;;  %v5854_v23 = vcombine.low %v3170_v44, %v3174_v12  ;;  %v12349_v60 = vcombine.low %v5795_v31, %v5802_v43 }
 0x2e8   : > { %v12339_v54 = vpop.xlane.xlu1 %1832  ;;  %v6416_v29 = vrot.slane %v6394_v11, %v11256_v28  ;;  %v6423_v18 = vrot.slane %v6395_v15, %v11256_v28  ;;  %v5856_v24 = vcombine.low %v3186_v49, %v3190_v32  ;;  %v13802_v11 = vld [vmem:[#allocation24_spill] sm:$0xff]  ;;  %v12354_v15 = vcombine.low %v5814_v51, %v5821_v61  ;;  %v13804_v61 = vld [vmem:[#allocation25_spill] sm:$0xff] }
 0x2e9   : > { %v6424_v46 = vcombine.low %v6402_v58, %v6409_v5  ;;  %v3194_v47 = vrot.slane %v13803_v9, %v11225_v50  ;;  %v3198_v31 = vrot.slane %v13803_v9, %v11229_v16  ;;  %v3202_v43 = vrot.slane %v13803_v9, %v11232_v17 }
 0x2ea   : > { %v7159_v37 = vpop.permute.xlu0 %7158  ;;  %v6425_v41 = vcombine.low %v6416_v29, %v6423_v18  ;;  %v3206_v35 = vrot.slane %v13803_v9, %v11235_v10  ;;  %v12367_v12 = vcombine.low %v5828_v19, %v5835_v33  ;;  %v5863_v38 = vrot.slane %v5853_v40, %v11256_v28 }
 0x2eb   : > { %v7392_v26 = vrot.slane %v7159_v37, %v12294_v14  ;;  %1868 = vadd.xlane.f32.xlu0 %v13802_v11  ;;  %v6432_v1 = vrot.slane %v6424_v46, %v11256_v28  ;;  %v5870_v30 = vrot.slane %v5854_v23, %v11256_v28  ;;  %v5877_v63 = vrot.slane %v5855_v7, %v11256_v28 }
 0x2ec   : > { %v7177_v0 = vpop.permute.xlu1 %7176  ;;  %v6439_v57 = vrot.slane %v6425_v41, %v11256_v28  ;;  %v5884_v58 = vrot.slane %v5856_v24, %v11256_v28  ;;  %v3210_v5 = vrot.slane %v13803_v9, %v11241_v21  ;;  %v3214_v29 = vrot.slane %v13803_v9, %v11244_v39 }
 0x2ed   : > { %v7394_v44 = vsel %vm7393_vm13, %v7392_v26, %v12162_v62  ;;  %v3218_v18 = vrot.slane %v13803_v9, %v11250_v27  ;;  %v3222_v19 = vrot.slane %v13803_v9, %v11253_v55  ;;  %v7433_v46 = vrot.slane %v7177_v0, %v11931_v52  ;;  %v13806_v9 = vld [vmem:[#allocation26_spill] sm:$0xff] }
 0x2ee   : > { %v7162_v49 = vpop.permute.xlu0 %7161  ;;  %v6440_v32 = vcombine.low %v6432_v1, %v6439_v57  ;;  %v5902_v40 = vcombine.low %v3194_v47, %v3198_v31  ;;  %v5903_v23 = vcombine.low %v3202_v43, %v3206_v35  ;;  %v5844_v41 = vrot.slane %v12354_v15, %v11256_v28 }
 0x2ef   : > { %v7399_v51 = vrot.slane %v7162_v49, %v12299_v36  ;;  %1871 = vadd.xlane.f32.xlu0 %v13804_v61  ;;  %v3226_v7 = vrot.slane %v12189_v59, %v11225_v50  ;;  %v3230_v24 = vrot.slane %v12189_v59, %v11229_v16  ;;  %v5851_v11 = vrot.slane %v12367_v12, %v11256_v28 }
 0x2f0   : > { %v7180_v62 = vpop.permute.xlu1 %7179  ;;  %7275 = vperm.xlu1 %9987, %v6440_v32   ;;  %v3234_v1 = vrot.slane %v12189_v59, %v11232_v17  ;;  %v3238_v0 = vrot.slane %v12189_v59, %v11235_v10  ;;  %v12402_v47 = vcombine.low %v5863_v38, %v5870_v30  ;;  %v12404_v57 = vcombine.low %v5877_v63, %v5884_v58 }
 0x2f1   : > { %v7437_v33 = vrot.slane %v7180_v62, %v11843_v13  ;;  %v12386_v37 = vsel %vm7400_vm14, %v7399_v51, %v7394_v44  ;;  %v5904_v31 = vcombine.low %v3210_v5, %v3214_v29  ;;  %v5905_v43 = vcombine.low %v3218_v18, %v3222_v19  ;;  %v13807_v62 = vld [vmem:[#allocation27_spill] sm:$0xff] }
 0x2f2   : > { %13805 = vst [vmem:[#allocation23_spill] sm:$0xff] %v12386_v37  ;;  %v5912_v44 = vrot.slane %v5902_v40, %v11256_v28  ;;  %v5919_v12 = vrot.slane %v5903_v23, %v11256_v28  ;;  %v3242_v49 = vrot.slane %v12189_v59, %v11241_v21  ;;  %v3246_v32 = vrot.slane %v12189_v59, %v11244_v39 }
 0x2f3   : > { %v7438_v26 = vsel %vm7330_vm3, %v7437_v33, %v7433_v46  ;;  %1874 = vadd.xlane.f32.xlu0 %v13806_v9  ;;  %v3250_v38 = vrot.slane %v12189_v59, %v11250_v27  ;;  %v3254_v30 = vrot.slane %v12189_v59, %v11253_v55  ;;  %v5951_v63 = vcombine.low %v3226_v7, %v3230_v24 }
 0x2f4   : > { %v7183_v15 = vpop.permute.xlu1 %7182  ;;  %v5952_v5 = vcombine.low %v3234_v1, %v3238_v0  ;;  %v3258_v51 = vrot.slane %v12208_v2, %v11225_v50  ;;  %v3262_v61 = vrot.slane %v12208_v2, %v11229_v16  ;;  %v3266_v18 = vrot.slane %v12208_v2, %v11232_v17 }
 0x2f5   : > { %v7442_v35 = vrot.slane %v7183_v15, %v11903_v34  ;;  %v3270_v19 = vrot.slane %v12208_v2, %v11235_v10  ;;  %v3274_v59 = vrot.slane %v12208_v2, %v11241_v21  ;;  %v3278_v46 = vrot.slane %v12208_v2, %v11244_v39 }
 0x2f6   : > { %v5926_v40 = vrot.slane %v5904_v31, %v11256_v28  ;;  %v5933_v23 = vrot.slane %v5905_v43, %v11256_v28  ;;  %v12434_v7 = vcombine.low %v5912_v44, %v5919_v12  ;;  %v5953_v24 = vcombine.low %v3242_v49, %v3246_v32 }
 0x2f7   : > { %v7443_v58 = vsel %vm7337_vm4, %v7442_v35, %v7438_v26  ;;  %1877 = vadd.xlane.f32.xlu0 %v13807_v62  ;;  %v5954_v26 = vcombine.low %v3250_v38, %v3254_v30  ;;  %v3282_v1 = vrot.slane %v12208_v2, %v11250_v27  ;;  %v3286_v0 = vrot.slane %v12208_v2, %v11253_v55 }
 0x2f8   : > { %v7186_v29 = vpop.permute.xlu1 %7185  ;;  %v5961_v15 = vrot.slane %v5951_v63, %v11256_v28  ;;  %v5968_v35 = vrot.slane %v5952_v5, %v11256_v28  ;;  %v6000_v62 = vcombine.low %v3258_v51, %v3262_v61  ;;  %v6001_v44 = vcombine.low %v3266_v18, %v3270_v19  ;;  %v13808_v61 = vld [vmem:[#allocation39_spill] sm:$0xff] }
 0x2f9   : > { %v7447_v33 = vrot.slane %v7186_v29, %v11908_v42  ;;  %v12443_v29 = vcombine.low %v5844_v41, %v5851_v11  ;;  %v6002_v12 = vcombine.low %v3274_v59, %v3278_v46  ;;  %v12450_v32 = vcombine.low %v5926_v40, %v5933_v23  ;;  %v13809_v23 = vld [vmem:[#allocation34_spill] sm:$0xff] }
 0x2fa   : > { %v12453_v38 = vadd.s32 4294967200, %v11796_v6  ;;  %v5975_v41 = vrot.slane %v5953_v24, %v11256_v28  ;;  %v5982_v11 = vrot.slane %v5954_v26, %v11256_v28  ;;  %v6003_v63 = vcombine.low %v3282_v1, %v3286_v0 }
 0x2fb   : > { %v7448_v9 = vsel %vm7344_vm5, %v7447_v33, %v7443_v58  ;;  %v12460_v5 = vcombine.low %v5961_v15, %v5968_v35  ;;  %v6010_v51 = vrot.slane %v6000_v62, %v11256_v28  ;;  %v3290_v18 = vrot.slane %v13808_v61, %v11225_v50 }
 0x2fc   : > { %v7189_v31 = vpop.permute.xlu1 %7188  ;;  %v6017_v59 = vrot.slane %v6001_v44, %v11256_v28  ;;  %v6024_v46 = vrot.slane %v6002_v12, %v11256_v28  ;;  %v3294_v33 = vrot.slane %v13808_v61, %v11229_v16  ;;  %v3298_v40 = vrot.slane %v13808_v61, %v11232_v17 }
 0x2fd   : > { %v7452_v49 = vrot.slane %v7189_v31, %v11918_v3  ;;  %v3302_v26 = vrot.slane %v13808_v61, %v11235_v10  ;;  %v3306_v1 = vrot.slane %v13808_v61, %v11241_v21  ;;  %v3310_v0 = vrot.slane %v13808_v61, %v11244_v39 }
 0x2fe   : > { %v3314_v15 = vrot.slane %v13808_v61, %v11250_v27  ;;  %v3318_v35 = vrot.slane %v13808_v61, %v11253_v55  ;;  %v3322_v62 = vrot.slane %v12254_v22, %v11225_v50  ;;  %v3326_v44 = vrot.slane %v12254_v22, %v11229_v16 }
 0x2ff   : > { %v7453_v58 = vsel %vm7351_vm6, %v7452_v49, %v7448_v9  ;;  %v6031_v9 = vrot.slane %v6003_v63, %v11256_v28  ;;  %v3330_v12 = vrot.slane %v12254_v22, %v11232_v17  ;;  %v3334_v49 = vrot.slane %v12254_v22, %v11235_v10 }
 0x300   : > { %v7192_v19 = vpop.permute.xlu1 %7191  ;;  %v3342_v61 = vrot.slane %v12254_v22, %v11244_v39  ;;  %v3346_v30 = vrot.slane %v12254_v22, %v11250_v27  ;;  %v6049_v2 = vcombine.low %v3290_v18, %v3294_v33  ;;  %v6051_v3 = vcombine.low %v3306_v1, %v3310_v0 }
 0x301   : > { %v7457_v24 = vrot.slane %v7192_v19, %v13809_v23  ;;  %v3338_v19 = vrot.slane %v12254_v22, %v11241_v21  ;;  %v6050_v23 = vcombine.low %v3298_v40, %v3302_v26  ;;  %v5949_v42 = vrot.slane %v12450_v32, %v11256_v28 }
 0x302   : > { %v12503_v34 = vcombine.low %v5975_v41, %v5982_v11  ;;  %v12508_v52 = vadd.s32 4294967192, %v11796_v6  ;;  %v6052_v25 = vcombine.low %v3314_v15, %v3318_v35  ;;  %v6099_v37 = vcombine.low %v3330_v12, %v3334_v49  ;;  %v13811_v41 = vld [vmem:[#allocation36_spill] sm:$0xff] }
 0x303   : > { %v7458_v31 = vsel %vm7358_vm7, %v7457_v24, %v7453_v58  ;;  %v3350_v58 = vrot.slane %v12254_v22, %v11253_v55  ;;  %v13810_v24 = vld [vmem:[#allocation35_spill] sm:$0xff]  ;;  %v6098_v22 = vcombine.low %v3322_v62, %v3326_v44  ;;  %v12511_v18 = vcombine.low %v6010_v51, %v6017_v59  ;;  %v13812_v44 = vld [vmem:[#allocation37_spill] sm:$0xff] }
 0x304   : > { %v7195_v63 = vpop.permute.xlu1 %7194  ;;  %v12513_v33 = vcombine.low %v6024_v46, %v6031_v9  ;;  %v6100_v40 = vcombine.low %v3338_v19, %v3342_v61  ;;  %v6059_v1 = vrot.slane %v6049_v2, %v11256_v28  ;;  %v6066_v0 = vrot.slane %v6050_v23, %v11256_v28 }
 0x305   : > { %v7462_v43 = vrot.slane %v7195_v63, %v13810_v24  ;;  %v6101_v26 = vcombine.low %v3346_v30, %v3350_v58  ;;  %v6073_v13 = vrot.slane %v6051_v3, %v11256_v28  ;;  %v3358_v15 = vrot.slane %v12257_v20, %v11229_v16 }
 0x306   : > { %v3362_v51 = vrot.slane %v12257_v20, %v11232_v17  ;;  %v3366_v30 = vrot.slane %v12257_v20, %v11235_v10  ;;  %v6080_v2 = vrot.slane %v6052_v25, %v11256_v28  ;;  %v6108_v46 = vrot.slane %v6098_v22, %v11256_v28 }
 0x307   : > { %v7463_v56 = vsel %vm7365_vm8, %v7462_v43, %v7458_v31  ;;  %v3354_v43 = vrot.slane %v12257_v20, %v11225_v50  ;;  %v6115_v3 = vrot.slane %v6099_v37, %v11256_v28  ;;  %v5998_v9 = vrot.slane %v12503_v34, %v11256_v28 }
 0x308   : > { %v7198_v63 = vpop.permute.xlu1 %7197  ;;  %v6122_v35 = vrot.slane %v6100_v40, %v11256_v28  ;;  %v6129_v62 = vrot.slane %v6101_v26, %v11256_v28  ;;  %v3370_v31 = vrot.slane %v12257_v20, %v11241_v21  ;;  %v3374_v25 = vrot.slane %v12257_v20, %v11244_v39 }
 0x309   : > { %v7467_v11 = vrot.slane %v7198_v63, %v13811_v41  ;;  %v3382_v37 = vrot.slane %v12257_v20, %v11253_v55  ;;  %v6040_v34 = vrot.slane %v12511_v18, %v11256_v28  ;;  %v6047_v49 = vrot.slane %v12513_v33, %v11256_v28  ;;  %v13813_v33 = vld [vmem:[#allocation38_spill] sm:$0xff] }
 0x30a   : > { %v6147_v19 = vcombine.low %v3354_v43, %v3358_v15  ;;  %v6148_v61 = vcombine.low %v3362_v51, %v3366_v30  ;;  %v6081_v22 = vcombine.low %v6059_v1, %v6066_v0  ;;  %v6082_v63 = vcombine.low %v6073_v13, %v6080_v2 }
 0x30b   : > { %v7468_v59 = vsel %vm7372_vm9, %v7467_v11, %v7463_v56  ;;  %v3378_v56 = vrot.slane %v12257_v20, %v11250_v27  ;;  %v6130_v40 = vcombine.low %v6108_v46, %v6115_v3  ;;  %v3386_v11 = vrot.slane %v12273_v8, %v11225_v50 }
 0x30c   : > { %v7201_v23 = vpop.permute.xlu1 %7200  ;;  %v3390_v20 = vrot.slane %v12273_v8, %v11229_v16  ;;  %v3398_v18 = vrot.slane %v12273_v8, %v11235_v10  ;;  %v6131_v15 = vcombine.low %v6122_v35, %v6129_v62  ;;  %v6149_v51 = vcombine.low %v3370_v31, %v3374_v25 }
 0x30d   : > { %v7472_v12 = vrot.slane %v7201_v23, %v13812_v44  ;;  %7224 = vperm.xlu0 %9986, %v12301_v48   ;;  %v3394_v48 = vrot.slane %v12273_v8, %v11232_v17  ;;  %v6150_v1 = vcombine.low %v3378_v56, %v3382_v37  ;;  %v6157_v13 = vrot.slane %v6147_v19, %v11256_v28 }
 0x30e   : > { %v6164_v0 = vrot.slane %v6148_v61, %v11256_v28  ;;  %v3402_v30 = vrot.slane %v12273_v8, %v11241_v21  ;;  %v6089_v46 = vrot.slane %v6081_v22, %v11256_v28  ;;  %v3410_v3 = vrot.slane %v12273_v8, %v11250_v27 }
 0x30f   : > { %v7473_v58 = vsel %vm7379_vm10, %v7472_v12, %v7468_v59  ;;  %v3406_v59 = vrot.slane %v12273_v8, %v11244_v39  ;;  %v6096_v35 = vrot.slane %v6082_v63, %v11256_v28  ;;  %v6138_v62 = vrot.slane %v6130_v40, %v11256_v28 }
 0x310   : > { %v7204_v26 = vpop.permute.xlu1 %7203  ;;  %v6196_v31 = vcombine.low %v3386_v11, %v3390_v20  ;;  %v6197_v12 = vcombine.low %v3394_v48, %v3398_v18  ;;  %v6145_v56 = vrot.slane %v6131_v15, %v11256_v28  ;;  %v6171_v37 = vrot.slane %v6149_v51, %v11256_v28  ;;  %v10028_v11 = vld [vmem:[#allocation6] ss:$16 sps:$4 sm:$0xff]   ;;  %v10030_v20 = vld [vmem:[#allocation6 + $0x4] ss:$16 sps:$4 sm:$0xff]  }
 0x311   : > { %v7477_v43 = vrot.slane %v7204_v26, %v13813_v33  ;;  %7230 = vperm.xlu0 %9986, %v12303_v4   ;;  %v3414_v4 = vrot.slane %v12273_v8, %v11253_v55  ;;  %v6178_v19 = vrot.slane %v6150_v1, %v11256_v28  ;;  %v13814_v8 = vrot.slane %v12404_v57, %v11256_v28 }
 0x312   : > { %v13815_v61 = vrot.slane %v12402_v47, %v11256_v28  ;;  %v12587_v22 = vsub.s32 %v12453_v38, %v13781_v45  ;;  %v12589_v63 = vcombine.low %v6157_v13, %v6164_v0  ;;  %v12591_v40 = vcombine.low %v3402_v30, %v3406_v59  ;;  %8156 = vmatprep.subr.bf16.mxu1 %v10030_v20 }
 0x313   : > { %v7478_v2 = vsel %vm7386_vm11, %v7477_v43, %v7473_v58  ;;  %v12604_v47 = vsub.s32 %v12508_v52, %v13781_v45  ;;  %v12606_v38 = vcombine.low %v3410_v3, %v3414_v4  ;;  %v13817_v18 = vrot.slane %v12460_v5, %v11256_v28  ;;  %8157 = vmatpush1.bf16.msra.mxu1 %v10028_v11 }
 0x314   : > { %v7207_v23 = vpop.permute.xlu1 %7206  ;;  %v5901_v58 = vcombine.low %v13815_v61, %v13814_v8  ;;  %v12613_v32 = vcombine.low %v6040_v34, %v6047_v49  ;;  %v12618_v52 = vcombine.low %v6089_v46, %v6096_v35  ;;  %v12620_v51 = vcombine.low %v6138_v62, %v6145_v56 }
 0x315   : > { %v7482_v25 = vrot.slane %v7207_v23, %v12294_v14  ;;  %7233 = vperm.xlu0 %9986, %v12345_v53   ;;  %v13816_v53 = vrot.slane %v12434_v7, %v11256_v28  ;;  %v12611_v43 = vcombine.low %v13817_v18, %v5998_v9  ;;  %v6206_v7 = vrot.slane %v6196_v31, %v11256_v28 }
 0x316   : > { %v12622_v1 = vcombine.low %v6171_v37, %v6178_v19  ;;  %v6187_v5 = vrot.slane %v12589_v63, %v11256_v28  ;;  %v6220_v9 = vrot.slane %v12591_v40, %v11256_v28  ;;  %v3482_v34 = vrot.slane %v12339_v54, %v11225_v50 }
 0x317   : > { %v7483_v26 = vsel %vm7393_vm13, %v7482_v25, %v7478_v2  ;;  %v12600_v57 = vcombine.low %v13816_v53, %v5949_v42  ;;  %v6213_v42 = vrot.slane %v6197_v12, %v11256_v28  ;;  %v3486_v49 = vrot.slane %v12339_v54, %v11229_v16  ;;  %v10031_v12 = vld [vmem:[#allocation6 + $0x20] ss:$16 sps:$4 sm:$0xff]   ;;  %v10033_v25 = vld [vmem:[#allocation6 + $0x24] ss:$16 sps:$4 sm:$0xff]  }
 0x318   : > { %v7210_v48 = vpop.permute.xlu1 %7209  ;;  %v6227_v0 = vrot.slane %v12606_v38, %v11256_v28  ;;  %v3494_v30 = vrot.slane %v12339_v54, %v11235_v10  ;;  %v3498_v46 = vrot.slane %v12339_v54, %v11241_v21  ;;  %v3502_v3 = vrot.slane %v12339_v54, %v11244_v39  ;;  %8158 = vmatprep.subr.bf16.mxu1 %v10033_v25  ;;  %v10039_v25 = vld [vmem:[#allocation6 + $0x64] ss:$16 sps:$4 sm:$0xff]  }
 0x319   : > { %v7487_v15 = vrot.slane %v7210_v48, %v12299_v36  ;;  %7236 = vperm.xlu0 %9986, %v12349_v60   ;;  %v3490_v60 = vrot.slane %v12339_v54, %v11232_v17  ;;  %v12642_v2 = vcombine.low %v6206_v7, %v6213_v42  ;;  %v3506_v4 = vrot.slane %v12339_v54, %v11250_v27 }
 0x31a   : > { %v3510_v53 = vrot.slane %v12339_v54, %v11253_v55  ;;  %v12661_v11 = vcombine.low %v3482_v34, %v3486_v49  ;;  %v12665_v7 = vcombine.low %v3498_v46, %v3502_v3  ;;  %8159 = vmatpush1.bf16.msra.mxu1 %v10031_v12  ;;  %v10036_v46 = vld [vmem:[#allocation6 + $0x44] ss:$16 sps:$4 sm:$0xff]  }
 0x31b   : > { %v12634_v13 = vsel %vm7400_vm14, %v7487_v15, %v7483_v26  ;;  %v1839_v59 = vpop.xlane.xlu0 %1838  ;;  %8160 = vmatprep.subr.bf16.mxu1 %v10036_v46 }
 0x31c   : > { %v3546_v23 = vrot.slane %v1839_v59, %v11225_v50  ;;  %v3550_v35 = vrot.slane %v1839_v59, %v11229_v16  ;;  %v3554_v62 = vrot.slane %v1839_v59, %v11232_v17  ;;  %v3558_v31 = vrot.slane %v1839_v59, %v11235_v10 }
 0x31d   : > { %7239 = vperm.xlu0 %9986, %v12443_v29   ;;  %v3562_v56 = vrot.slane %v1839_v59, %v11241_v21  ;;  %v3566_v37 = vrot.slane %v1839_v59, %v11244_v39  ;;  %v3570_v19 = vrot.slane %v1839_v59, %v11250_v27  ;;  %v3574_v8 = vrot.slane %v1839_v59, %v11253_v55 }
 0x31e   : > { %v6441_v61 = vcombine.low %v3546_v23, %v3550_v35  ;;  %v6442_v26 = vcombine.low %v3554_v62, %v3558_v31  ;;  %v12663_v29 = vcombine.low %v3490_v60, %v3494_v30  ;;  %v10034_v30 = vld [vmem:[#allocation6 + $0x40] ss:$16 sps:$4 sm:$0xff]  }
 0x31f   : > { %v1842_v20 = vpop.xlane.xlu0 %1841  ;;  %v6443_v48 = vcombine.low %v3562_v56, %v3566_v37  ;;  %v6444_v18 = vcombine.low %v3570_v19, %v3574_v8  ;;  %8161 = vmatpush1.bf16.msra.mxu1 %v10034_v30 }
 0x320   : > { %v6451_v42 = vrot.slane %v6441_v61, %v11256_v28  ;;  %v6458_v15 = vrot.slane %v6442_v26, %v11256_v28  ;;  %v3578_v59 = vrot.slane %v1842_v20, %v11225_v50  ;;  %v3582_v23 = vrot.slane %v1842_v20, %v11229_v16  ;;  %8162 = vmatprep.subr.bf16.mxu1 %v10039_v25 }
 0x321   : > { %7242 = vperm.xlu0 %9986, %v5901_v58   ;;  %v6465_v54 = vrot.slane %v6443_v48, %v11256_v28  ;;  %v6472_v34 = vrot.slane %v6444_v18, %v11256_v28  ;;  %v3586_v49 = vrot.slane %v1842_v20, %v11232_v17  ;;  %v3590_v60 = vrot.slane %v1842_v20, %v11235_v10  ;;  %v7213_v35 = vpop.permute.xlu1 %7212  ;;  %v10037_v18 = vld [vmem:[#allocation6 + $0x60] ss:$16 sps:$4 sm:$0xff]  }
 0x322   : > { %v6473_v3 = vcombine.low %v6451_v42, %v6458_v15  ;;  %v3594_v62 = vrot.slane %v1842_v20, %v11241_v21  ;;  %v3598_v31 = vrot.slane %v1842_v20, %v11244_v39  ;;  %v3602_v12 = vrot.slane %v1842_v20, %v11250_v27 }
 0x323   : > { %v6474_v58 = vcombine.low %v6465_v54, %v6472_v34  ;;  %v7492_v56 = vrot.slane %v7213_v35, %v12587_v22  ;;  %v3606_v37 = vrot.slane %v1842_v20, %v11253_v55  ;;  %v6490_v19 = vcombine.low %v3578_v59, %v3582_v23  ;;  %8163 = vmatpush1.bf16.msra.mxu1 %v10037_v18 }
 0x324   : > { %v6481_v8 = vrot.slane %v6473_v3, %v11256_v28  ;;  %v6491_v61 = vcombine.low %v3586_v49, %v3590_v60  ;;  %v6492_v26 = vcombine.low %v3594_v62, %v3598_v31  ;;  %v12681_v48 = vcombine.low %v3506_v4, %v3510_v53  ;;  %v13818_v4 = vld [vmem:[#allocation21_spill] sm:$0xff] }
 0x325   : > { %7245 = vperm.xlu0 %9986, %v12600_v57   ;;  %v6488_v42 = vrot.slane %v6474_v58, %v11256_v28  ;;  %v12687_v15 = vsel %vm7407_vm15, %v7492_v56, %v12634_v13  ;;  %v6493_v54 = vcombine.low %v3602_v12, %v3606_v37  ;;  %v6500_v20 = vrot.slane %v6490_v19, %v11256_v28  ;;  %v10042_v57 = vld [vmem:[#allocation6 + $0x84] ss:$16 sps:$4 sm:$0xff]   ;;  %v10040_v12 = vld [vmem:[#allocation6 + $0x80] ss:$16 sps:$4 sm:$0xff]  }
 0x326   : > { %v6507_v59 = vrot.slane %v6491_v61, %v11256_v28  ;;  %v6514_v23 = vrot.slane %v6492_v26, %v11256_v28  ;;  %v2394_v53 = vrot.slane %v13818_v4, %v11225_v50  ;;  %v2398_v34 = vrot.slane %v13818_v4, %v11229_v16  ;;  %v13819_v37 = vld [vmem:[#allocation23_spill] sm:$0xff]  ;;  %8164 = vmatprep.subr.bf16.mxu1 %v10042_v57  ;;  %v10045_v26 = vld [vmem:[#allocation6 + $0xa4] ss:$16 sps:$4 sm:$0xff]  }
 0x327   : > { %v7165_v49 = vpop.permute.xlu0 %7164  ;;  %v6489_v60 = vcombine.low %v6481_v8, %v6488_v42  ;;  %v6521_v13 = vrot.slane %v6493_v54, %v11256_v28  ;;  %v2402_v30 = vrot.slane %v13818_v4, %v11232_v17  ;;  %v2406_v46 = vrot.slane %v13818_v4, %v11235_v10  ;;  %8165 = vmatpush1.bf16.msra.mxu1 %v10040_v12 }
 0x328   : > { %v7406_v3 = vrot.slane %v7165_v49, %v12587_v22  ;;  %v6522_v35 = vcombine.low %v6500_v20, %v6507_v59  ;;  %v2410_v62 = vrot.slane %v13818_v4, %v11241_v21  ;;  %v2414_v31 = vrot.slane %v13818_v4, %v11244_v39  ;;  %v10043_v59 = vld [vmem:[#allocation6 + $0xa0] ss:$16 sps:$4 sm:$0xff]   ;;  %8166 = vmatprep.subr.bf16.mxu1 %v10045_v26 }
 0x329   : > { %7278 = vperm.xlu1 %9987, %v6489_v60   ;;  %7248 = vperm.xlu0 %9986, %v12611_v43   ;;  %v6523_v25 = vcombine.low %v6514_v23, %v6521_v13  ;;  %v2418_v58 = vrot.slane %v13818_v4, %v11250_v27  ;;  %v2422_v56 = vrot.slane %v13818_v4, %v11253_v55  ;;  %v10048_v60 = vld [vmem:[#allocation6 + $0xc4] ss:$16 sps:$4 sm:$0xff]  }
 0x32a   : > { %v7408_v19 = vsel %vm7407_vm15, %v7406_v3, %v13819_v37  ;;  %v6530_v8 = vrot.slane %v6522_v35, %v11256_v28  ;;  %v12720_v43 = vcombine.low %v6220_v9, %v6227_v0  ;;  %v6353_v61 = vrot.slane %v12661_v11, %v11256_v28  ;;  %v10054_v35 = vld [vmem:[%s13692_s6 + $0xc] ss:$16 sps:$4 sm:$0xff]  }
 0x32b   : > { %v7168_v18 = vpop.permute.xlu0 %7167  ;;  %v6537_v42 = vrot.slane %v6523_v25, %v11256_v28  ;;  %v6360_v54 = vrot.slane %v12663_v29, %v11256_v28  ;;  %v6367_v20 = vrot.slane %v12665_v7, %v11256_v28  ;;  %v6374_v38 = vrot.slane %v12681_v48, %v11256_v28  ;;  %v13820_v29 = vld [vmem:[#allocation40_spill] sm:$0xff]  ;;  %8167 = vmatpush1.bf16.msra.mxu1 %v10043_v59 }
 0x32c   : > { %v7413_v40 = vrot.slane %v7168_v18, %v12604_v47  ;;  %v12732_v9 = vcombine.low %v2394_v53, %v2398_v34  ;;  %v4678_v0 = vcombine.low %v2402_v30, %v2406_v46  ;;  %v4679_v11 = vcombine.low %v2410_v62, %v2414_v31  ;;  %8168 = vmatprep.subr.bf16.mxu1 %v10048_v60 }
 0x32d   : > { %v6538_v23 = vcombine.low %v6530_v8, %v6537_v42  ;;  %7251 = vperm.xlu0 %9986, %v12613_v32   ;;  %v4680_v4 = vcombine.low %v2418_v58, %v2422_v56  ;;  %v3418_v57 = vrot.slane %v13820_v29, %v11225_v50  ;;  %v3422_v7 = vrot.slane %v13820_v29, %v11229_v16  ;;  %v7216_v49 = vpop.permute.xlu1 %7215  ;;  %v10046_v58 = vld [vmem:[#allocation6 + $0xc0] ss:$16 sps:$4 sm:$0xff]   ;;  %v10052_v56 = vld [vmem:[%s13692_s6 + $0x8] ss:$16 sps:$4 sm:$0xff]  }
 0x32e   : > { %v12740_v48 = vsel %vm7414_vm0, %v7413_v40, %v7408_v19  ;;  %v3426_v53 = vrot.slane %v13820_v29, %v11232_v17  ;;  %v3430_v34 = vrot.slane %v13820_v29, %v11235_v10  ;;  %v3434_v32 = vrot.slane %v13820_v29, %v11241_v21  ;;  %v10051_v8 = vld [vmem:[#allocation6 + $0xe4] ss:$16 sps:$4 sm:$0xff]   ;;  %8960 = vmatprep.subr.bf16.mxu0 %v10054_v35 }
 0x32f   : > { %7281 = vperm.xlu1 %9987, %v6538_v23   ;;  %v7497_v13 = vrot.slane %v7216_v49, %v12604_v47  ;;  %v3438_v30 = vrot.slane %v13820_v29, %v11244_v39  ;;  %v3442_v46 = vrot.slane %v13820_v29, %v11250_v27  ;;  %v3446_v3 = vrot.slane %v13820_v29, %v11253_v55 }
 0x330   : > { %v6194_v62 = vrot.slane %v12622_v1, %v11256_v28  ;;  %v6236_v31 = vrot.slane %v12642_v2, %v11256_v28  ;;  %v6243_v12 = vrot.slane %v12720_v43, %v11256_v28  ;;  %v6375_v25 = vcombine.low %v6353_v61, %v6360_v54  ;;  %8169 = vmatpush1.bf16.msra.mxu1 %v10046_v58 }
 0x331   : > { %v12769_v37 = vsel %vm7414_vm0, %v7497_v13, %v12687_v15  ;;  %7254 = vperm.xlu0 %9986, %v12618_v52   ;;  %v6376_v1 = vcombine.low %v6367_v20, %v6374_v38  ;;  %v4687_v2 = vrot.slane %v12732_v9, %v11256_v28  ;;  %v4694_v19 = vrot.slane %v4678_v0, %v11256_v28  ;;  %v13821_v15 = vld [vmem:[#allocation28_spill] sm:$0xff] }
 0x332   : > { %v4701_v43 = vrot.slane %v4679_v11, %v11256_v28  ;;  %v4708_v61 = vrot.slane %v4680_v4, %v11256_v28  ;;  %v6245_v26 = vcombine.low %v3418_v57, %v3422_v7  ;;  %v6246_v18 = vcombine.low %v3426_v53, %v3430_v34  ;;  %v10049_v0 = vld [vmem:[#allocation6 + $0xe0] ss:$16 sps:$4 sm:$0xff]   ;;  %8961 = vmatpush1.bf16.msra.mxu0 %v10052_v56  ;;  %v10057_v4 = vld [vmem:[#allocation6 + $0xc] ss:$16 sps:$4 sm:$0xff]  }
 0x333   : > { %v6247_v42 = vcombine.low %v3434_v32, %v3438_v30  ;;  %v6248_v54 = vcombine.low %v3442_v46, %v3446_v3  ;;  %v2426_v40 = vrot.slane %v13821_v15, %v11225_v50  ;;  %v2430_v52 = vrot.slane %v13821_v15, %v11229_v16  ;;  %8170 = vmatprep.subr.bf16.mxu1 %v10051_v8  ;;  %v13822_v3 = vld [vmem:[#allocation22_spill] sm:$0xff] }
 0x334   : > { %v2434_v20 = vrot.slane %v13821_v15, %v11232_v17  ;;  %v2438_v38 = vrot.slane %v13821_v15, %v11235_v10  ;;  %v2442_v9 = vrot.slane %v13821_v15, %v11241_v21  ;;  %v2446_v11 = vrot.slane %v13821_v15, %v11244_v39  ;;  %8171 = vmatpush1.bf16.msra.mxu1 %v10049_v0 }
 0x335   : > { %7257 = vperm.xlu0 %9986, %v12620_v51   ;;  %v2450_v59 = vrot.slane %v13821_v15, %v11250_v27  ;;  %v2454_v23 = vrot.slane %v13821_v15, %v11253_v55  ;;  %v6195_v29 = vcombine.low %v6187_v5, %v6194_v62  ;;  %v6244_v57 = vcombine.low %v6236_v31, %v6243_v12 }
 0x336   : > { %v6383_v7 = vrot.slane %v6375_v25, %v11256_v28  ;;  %v6390_v51 = vrot.slane %v6376_v1, %v11256_v28  ;;  %v4709_v49 = vcombine.low %v4687_v2, %v4694_v19  ;;  %v4710_v53 = vcombine.low %v4701_v43, %v4708_v61  ;;  %8197 = vmatprep.subr.bf16.mxu1 %v10057_v4  ;;  %v10067_v2 = vld [vmem:[%s13692_s6 + $0x28] ss:$16 sps:$4 sm:$0xff]   ;;  %v10069_v19 = vld [vmem:[%s13692_s6 + $0x2c] ss:$16 sps:$4 sm:$0xff]  }
 0x337   : > { %v6255_v34 = vrot.slane %v6245_v26, %v11256_v28  ;;  %v6262_v32 = vrot.slane %v6246_v18, %v11256_v28  ;;  %v6269_v60 = vrot.slane %v6247_v42, %v11256_v28  ;;  %v6276_v13 = vrot.slane %v6248_v54, %v11256_v28  ;;  %8962 = vmatprep.subr.bf16.mxu0 %v10069_v19 }
 0x338   : > { %v4726_v30 = vcombine.low %v2426_v40, %v2430_v52  ;;  %v4727_v63 = vcombine.low %v2434_v20, %v2438_v38  ;;  %v4728_v5 = vcombine.low %v2442_v9, %v2446_v11  ;;  %v4729_v46 = vcombine.low %v2450_v59, %v2454_v23  ;;  %8963 = vmatpush1.bf16.msra.mxu0 %v10067_v2 }
 0x339   : > { %7260 = vperm.xlu0 %9986, %v6195_v29   ;;  %v3450_v35 = vrot.slane %v13822_v3, %v11225_v50  ;;  %v3454_v62 = vrot.slane %v13822_v3, %v11229_v16  ;;  %v3458_v31 = vrot.slane %v13822_v3, %v11232_v17  ;;  %v3462_v12 = vrot.slane %v13822_v3, %v11235_v10 }
 0x33a   : > { %v3466_v25 = vrot.slane %v13822_v3, %v11241_v21  ;;  %v3470_v58 = vrot.slane %v13822_v3, %v11244_v39  ;;  %v3474_v56 = vrot.slane %v13822_v3, %v11250_v27  ;;  %v3478_v1 = vrot.slane %v13822_v3, %v11253_v55 }
 0x33b   : > { %v6391_v8 = vcombine.low %v6383_v7, %v6390_v51  ;;  %v4717_v43 = vrot.slane %v4709_v49, %v11256_v28  ;;  %v4724_v61 = vrot.slane %v4710_v53, %v11256_v28  ;;  %v6277_v26 = vcombine.low %v6255_v34, %v6262_v32 }
 0x33c   : > { %v6278_v18 = vcombine.low %v6269_v60, %v6276_v13  ;;  %v4736_v42 = vrot.slane %v4726_v30, %v11256_v28  ;;  %v4743_v54 = vrot.slane %v4727_v63, %v11256_v28  ;;  %v4750_v15 = vrot.slane %v4728_v5, %v11256_v28  ;;  %v10082_v5 = vld [vmem:[%s13692_s6 + $0x48] ss:$16 sps:$4 sm:$0xff]  }
 0x33d   : > { %7263 = vperm.xlu0 %9986, %v6244_v57   ;;  %v4757_v40 = vrot.slane %v4729_v46, %v11256_v28  ;;  %v6294_v52 = vcombine.low %v3450_v35, %v3454_v62  ;;  %v6295_v20 = vcombine.low %v3458_v31, %v3462_v12  ;;  %v6296_v38 = vcombine.low %v3466_v25, %v3470_v58  ;;  %v10084_v46 = vld [vmem:[%s13692_s6 + $0x4c] ss:$16 sps:$4 sm:$0xff]   ;;  %v10085_v35 = vld [vmem:[%s13692_s6 + $0x68] ss:$16 sps:$4 sm:$0xff]  }
 0x33e   : > { %v6297_v9 = vcombine.low %v3474_v56, %v3478_v1  ;;  %v4725_v0 = vcombine.low %v4717_v43, %v4724_v61  ;;  %v6285_v11 = vrot.slane %v6277_v26, %v11256_v28  ;;  %v6292_v59 = vrot.slane %v6278_v18, %v11256_v28  ;;  %8964 = vmatprep.subr.bf16.mxu0 %v10084_v46  ;;  %v10087_v62 = vld [vmem:[%s13692_s6 + $0x6c] ss:$16 sps:$4 sm:$0xff]  }
 0x33f   : > { %v4758_v23 = vcombine.low %v4736_v42, %v4743_v54  ;;  %v4759_v4 = vcombine.low %v4750_v15, %v4757_v40  ;;  %v6304_v29 = vrot.slane %v6294_v52, %v11256_v28  ;;  %v6311_v57 = vrot.slane %v6295_v20, %v11256_v28  ;;  %8965 = vmatpush1.bf16.msra.mxu0 %v10082_v5 }
 0x340   : > { %v6318_v7 = vrot.slane %v6296_v38, %v11256_v28  ;;  %v6325_v51 = vrot.slane %v6297_v9, %v11256_v28  ;;  %v6293_v49 = vcombine.low %v6285_v11, %v6292_v59  ;;  %8966 = vmatprep.subr.bf16.mxu0 %v10087_v62 }
 0x341   : > { %7272 = vperm.xlu0 %9986, %v6391_v8   ;;  %v4766_v53 = vrot.slane %v4758_v23, %v11256_v28  ;;  %v4773_v34 = vrot.slane %v4759_v4, %v11256_v28  ;;  %v6326_v32 = vcombine.low %v6304_v29, %v6311_v57 }
 0x342   : > { %v6327_v60 = vcombine.low %v6318_v7, %v6325_v51 }
 0x343   : > { %v4774_v13 = vcombine.low %v4766_v53, %v4773_v34  ;;  %v6334_v30 = vrot.slane %v6326_v32, %v11256_v28  ;;  %8967 = vmatpush1.bf16.msra.mxu0 %v10085_v35 }
 0x344   : > { %v6341_v63 = vrot.slane %v6327_v60, %v11256_v28 }
 0x345   : > { %7170 = vperm.xlu0 %9986, %v4725_v0  }
 0x346   : > { %v6342_v3 = vcombine.low %v6334_v30, %v6341_v63 }
 0x349   : > { %7266 = vperm.xlu0 %9986, %v6293_v49  }
 0x34d   : > { %7173 = vperm.xlu0 %9986, %v4774_v13  }
 0x351   : > { %7269 = vperm.xlu0 %9986, %v6342_v3  }
 0x358   : > { %v1845_v31 = vpop.xlane.xlu0 %1844 }
 0x359   : > { %v3610_v12 = vrot.slane %v1845_v31, %v11225_v50  ;;  %v3614_v25 = vrot.slane %v1845_v31, %v11229_v16  ;;  %v3618_v58 = vrot.slane %v1845_v31, %v11232_v17  ;;  %v3622_v56 = vrot.slane %v1845_v31, %v11235_v10 }
 0x35a   : > { %v3626_v1 = vrot.slane %v1845_v31, %v11241_v21  ;;  %v3630_v2 = vrot.slane %v1845_v31, %v11244_v39  ;;  %v3634_v19 = vrot.slane %v1845_v31, %v11250_v27  ;;  %v3638_v8 = vrot.slane %v1845_v31, %v11253_v55 }
 0x35b   : > { %v6539_v43 = vcombine.low %v3610_v12, %v3614_v25  ;;  %v6540_v61 = vcombine.low %v3618_v58, %v3622_v56 }
 0x35c   : > { %v1848_v26 = vpop.xlane.xlu0 %1847  ;;  %v6541_v18 = vcombine.low %v3626_v1, %v3630_v2  ;;  %v6542_v42 = vcombine.low %v3634_v19, %v3638_v8 }
 0x35d   : > { %v6549_v54 = vrot.slane %v6539_v43, %v11256_v28  ;;  %v6556_v15 = vrot.slane %v6540_v61, %v11256_v28  ;;  %v3642_v40 = vrot.slane %v1848_v26, %v11225_v50  ;;  %v3646_v52 = vrot.slane %v1848_v26, %v11229_v16 }
 0x35e   : > { %v6563_v20 = vrot.slane %v6541_v18, %v11256_v28  ;;  %v6570_v38 = vrot.slane %v6542_v42, %v11256_v28  ;;  %v3650_v9 = vrot.slane %v1848_v26, %v11232_v17  ;;  %v3654_v0 = vrot.slane %v1848_v26, %v11235_v10 }
 0x35f   : > { %v6571_v11 = vcombine.low %v6549_v54, %v6556_v15  ;;  %v3658_v59 = vrot.slane %v1848_v26, %v11241_v21  ;;  %v3662_v23 = vrot.slane %v1848_v26, %v11244_v39  ;;  %v3666_v4 = vrot.slane %v1848_v26, %v11250_v27 }
 0x360   : > { %v1851_v29 = vpop.xlane.xlu0 %1850  ;;  %v6572_v57 = vcombine.low %v6563_v20, %v6570_v38  ;;  %v3670_v7 = vrot.slane %v1848_v26, %v11253_v55  ;;  %v6588_v51 = vcombine.low %v3642_v40, %v3646_v52  ;;  %v6589_v49 = vcombine.low %v3650_v9, %v3654_v0 }
 0x361   : > { %v6579_v53 = vrot.slane %v6571_v11, %v11256_v28  ;;  %v6590_v34 = vcombine.low %v3658_v59, %v3662_v23  ;;  %v3674_v32 = vrot.slane %v1851_v29, %v11225_v50  ;;  %v3678_v60 = vrot.slane %v1851_v29, %v11229_v16 }
 0x362   : > { %v6586_v13 = vrot.slane %v6572_v57, %v11256_v28  ;;  %v6591_v30 = vcombine.low %v3666_v4, %v3670_v7  ;;  %v6598_v63 = vrot.slane %v6588_v51, %v11256_v28  ;;  %v6605_v5 = vrot.slane %v6589_v49, %v11256_v28 }
 0x363   : > { %v6612_v46 = vrot.slane %v6590_v34, %v11256_v28  ;;  %v3682_v3 = vrot.slane %v1851_v29, %v11232_v17  ;;  %v3686_v35 = vrot.slane %v1851_v29, %v11235_v10  ;;  %v3690_v62 = vrot.slane %v1851_v29, %v11241_v21 }
 0x364   : > { %v1854_v31 = vpop.xlane.xlu0 %1853  ;;  %v6587_v12 = vcombine.low %v6579_v53, %v6586_v13  ;;  %v6619_v25 = vrot.slane %v6591_v30, %v11256_v28  ;;  %v6620_v58 = vcombine.low %v6598_v63, %v6605_v5  ;;  %v3694_v56 = vrot.slane %v1851_v29, %v11244_v39 }
 0x365   : > { %v3698_v1 = vrot.slane %v1851_v29, %v11250_v27  ;;  %v3702_v2 = vrot.slane %v1851_v29, %v11253_v55  ;;  %v6637_v19 = vcombine.low %v3674_v32, %v3678_v60  ;;  %v6638_v8 = vcombine.low %v3682_v3, %v3686_v35 }
 0x366   : > { %7284 = vperm.xlu1 %9987, %v6587_v12   ;;  %v6621_v43 = vcombine.low %v6612_v46, %v6619_v25  ;;  %v6628_v61 = vrot.slane %v6620_v58, %v11256_v28  ;;  %v6639_v26 = vcombine.low %v3690_v62, %v3694_v56  ;;  %v3706_v18 = vrot.slane %v1854_v31, %v11225_v50  ;;  %v10088_v56 = vld [vmem:[%s13692_s6 + $0x88] ss:$16 sps:$4 sm:$0xff]  }
 0x367   : > { %v6640_v42 = vcombine.low %v3698_v1, %v3702_v2  ;;  %v6647_v54 = vrot.slane %v6637_v19, %v11256_v28  ;;  %v6654_v15 = vrot.slane %v6638_v8, %v11256_v28  ;;  %v3710_v40 = vrot.slane %v1854_v31, %v11229_v16  ;;  %v10090_v1 = vld [vmem:[%s13692_s6 + $0x8c] ss:$16 sps:$4 sm:$0xff]  }
 0x368   : > { %v1857_v52 = vpop.xlane.xlu0 %1856  ;;  %v6635_v20 = vrot.slane %v6621_v43, %v11256_v28  ;;  %v6661_v38 = vrot.slane %v6639_v26, %v11256_v28  ;;  %v3714_v9 = vrot.slane %v1854_v31, %v11232_v17  ;;  %v3718_v0 = vrot.slane %v1854_v31, %v11235_v10  ;;  %8968 = vmatprep.subr.bf16.mxu0 %v10090_v1 }
 0x369   : > { %v6668_v11 = vrot.slane %v6640_v42, %v11256_v28  ;;  %v6669_v59 = vcombine.low %v6647_v54, %v6654_v15  ;;  %v3722_v23 = vrot.slane %v1854_v31, %v11241_v21  ;;  %v3726_v4 = vrot.slane %v1854_v31, %v11244_v39  ;;  %8969 = vmatpush1.bf16.msra.mxu0 %v10088_v56 }
 0x36a   : > { %v6636_v29 = vcombine.low %v6628_v61, %v6635_v20  ;;  %v3730_v57 = vrot.slane %v1854_v31, %v11250_v27  ;;  %v3734_v7 = vrot.slane %v1854_v31, %v11253_v55  ;;  %v6686_v51 = vcombine.low %v3706_v18, %v3710_v40 }
 0x36b   : > { %v6670_v49 = vcombine.low %v6661_v38, %v6668_v11  ;;  %v6677_v53 = vrot.slane %v6669_v59, %v11256_v28  ;;  %v6687_v34 = vcombine.low %v3714_v9, %v3718_v0  ;;  %v6688_v32 = vcombine.low %v3722_v23, %v3726_v4 }
 0x36c   : > { %7287 = vperm.xlu1 %9987, %v6636_v29   ;;  %v1860_v60 = vpop.xlane.xlu0 %1859  ;;  %v6689_v13 = vcombine.low %v3730_v57, %v3734_v7  ;;  %v6696_v30 = vrot.slane %v6686_v51, %v11256_v28  ;;  %v3738_v63 = vrot.slane %v1857_v52, %v11225_v50  ;;  %v3742_v5 = vrot.slane %v1857_v52, %v11229_v16 }
 0x36d   : > { %v6684_v46 = vrot.slane %v6670_v49, %v11256_v28  ;;  %v6703_v3 = vrot.slane %v6687_v34, %v11256_v28  ;;  %v6710_v35 = vrot.slane %v6688_v32, %v11256_v28  ;;  %v3746_v62 = vrot.slane %v1857_v52, %v11232_v17 }
 0x36e   : > { %v6717_v31 = vrot.slane %v6689_v13, %v11256_v28  ;;  %v3750_v12 = vrot.slane %v1857_v52, %v11235_v10  ;;  %v3754_v25 = vrot.slane %v1857_v52, %v11241_v21  ;;  %v3758_v58 = vrot.slane %v1857_v52, %v11244_v39 }
 0x36f   : > { %v6685_v2 = vcombine.low %v6677_v53, %v6684_v46  ;;  %v6718_v19 = vcombine.low %v6696_v30, %v6703_v3  ;;  %v3762_v8 = vrot.slane %v1857_v52, %v11250_v27  ;;  %v3766_v43 = vrot.slane %v1857_v52, %v11253_v55 }
 0x370   : > { %v1863_v61 = vpop.xlane.xlu0 %1862  ;;  %v6719_v26 = vcombine.low %v6710_v35, %v6717_v31  ;;  %v6735_v18 = vcombine.low %v3738_v63, %v3742_v5  ;;  %v6736_v42 = vcombine.low %v3746_v62, %v3750_v12  ;;  %v6737_v15 = vcombine.low %v3754_v25, %v3758_v58 }
 0x371   : > { %7290 = vperm.xlu1 %9987, %v6685_v2   ;;  %v6726_v54 = vrot.slane %v6718_v19, %v11256_v28  ;;  %v6738_v40 = vcombine.low %v3762_v8, %v3766_v43  ;;  %v3770_v20 = vrot.slane %v1860_v60, %v11225_v50  ;;  %v3774_v52 = vrot.slane %v1860_v60, %v11229_v16 }
 0x372   : > { %v6733_v38 = vrot.slane %v6719_v26, %v11256_v28  ;;  %v6745_v9 = vrot.slane %v6735_v18, %v11256_v28  ;;  %v6752_v0 = vrot.slane %v6736_v42, %v11256_v28  ;;  %v6759_v11 = vrot.slane %v6737_v15, %v11256_v28 }
 0x373   : > { %v6766_v59 = vrot.slane %v6738_v40, %v11256_v28  ;;  %v3778_v23 = vrot.slane %v1860_v60, %v11232_v17  ;;  %v3782_v4 = vrot.slane %v1860_v60, %v11235_v10  ;;  %v3786_v51 = vrot.slane %v1860_v60, %v11241_v21 }
 0x374   : > { %v6734_v29 = vcombine.low %v6726_v54, %v6733_v38  ;;  %v1866_v57 = vpop.xlane.xlu0 %1865  ;;  %v6767_v7 = vcombine.low %v6745_v9, %v6752_v0  ;;  %v3790_v49 = vrot.slane %v1860_v60, %v11244_v39  ;;  %v3794_v34 = vrot.slane %v1860_v60, %v11250_v27 }
 0x375   : > { %v6768_v53 = vcombine.low %v6759_v11, %v6766_v59  ;;  %v3798_v32 = vrot.slane %v1860_v60, %v11253_v55  ;;  %v6784_v13 = vcombine.low %v3770_v20, %v3774_v52  ;;  %v6785_v63 = vcombine.low %v3778_v23, %v3782_v4 }
 0x376   : > { %7293 = vperm.xlu1 %9987, %v6734_v29   ;;  %v6775_v30 = vrot.slane %v6767_v7, %v11256_v28  ;;  %v6786_v5 = vcombine.low %v3786_v51, %v3790_v49  ;;  %v3802_v46 = vrot.slane %v1863_v61, %v11225_v50  ;;  %v3806_v31 = vrot.slane %v1863_v61, %v11229_v16 }
 0x377   : > { %v6782_v3 = vrot.slane %v6768_v53, %v11256_v28  ;;  %v6787_v35 = vcombine.low %v3794_v34, %v3798_v32  ;;  %v6794_v62 = vrot.slane %v6784_v13, %v11256_v28  ;;  %v6801_v25 = vrot.slane %v6785_v63, %v11256_v28 }
 0x378   : > { %v12940_v12 = vpop.xlane.xlu0 %1868  ;;  %v6808_v60 = vrot.slane %v6786_v5, %v11256_v28  ;;  %v3810_v58 = vrot.slane %v1863_v61, %v11232_v17  ;;  %v3814_v56 = vrot.slane %v1863_v61, %v11235_v10  ;;  %v3818_v19 = vrot.slane %v1863_v61, %v11241_v21 }
 0x379   : > { %v6783_v1 = vcombine.low %v6775_v30, %v6782_v3  ;;  %v6815_v2 = vrot.slane %v6787_v35, %v11256_v28  ;;  %v3822_v8 = vrot.slane %v1863_v61, %v11244_v39  ;;  %v6816_v43 = vcombine.low %v6794_v62, %v6801_v25 }
 0x37a   : > { %v3826_v26 = vrot.slane %v1863_v61, %v11250_v27  ;;  %v3830_v18 = vrot.slane %v1863_v61, %v11253_v55  ;;  %v6833_v42 = vcombine.low %v3802_v46, %v3806_v31  ;;  %v6834_v15 = vcombine.low %v3810_v58, %v3814_v56 }
 0x37b   : > { %7296 = vperm.xlu1 %9987, %v6783_v1   ;;  %v6817_v54 = vcombine.low %v6808_v60, %v6815_v2  ;;  %v6835_v40 = vcombine.low %v3818_v19, %v3822_v8  ;;  %v3834_v20 = vrot.slane %v1866_v57, %v11225_v50  ;;  %v6824_v38 = vrot.slane %v6816_v43, %v11256_v28  ;;  %v10103_v43 = vld [vmem:[%s13692_s6 + $0xa8] ss:$16 sps:$4 sm:$0xff]  }
 0x37c   : > { %v12953_v9 = vpop.xlane.xlu0 %1871  ;;  %v6836_v0 = vcombine.low %v3826_v26, %v3830_v18  ;;  %v6843_v52 = vrot.slane %v6833_v42, %v11256_v28  ;;  %v3838_v11 = vrot.slane %v1866_v57, %v11229_v16  ;;  %v6850_v61 = vrot.slane %v6834_v15, %v11256_v28  ;;  %v10105_v26 = vld [vmem:[%s13692_s6 + $0xac] ss:$16 sps:$4 sm:$0xff]  }
 0x37d   : > { %v6831_v59 = vrot.slane %v6817_v54, %v11256_v28  ;;  %v6857_v23 = vrot.slane %v6835_v40, %v11256_v28  ;;  %v3842_v4 = vrot.slane %v1866_v57, %v11232_v17  ;;  %v3846_v7 = vrot.slane %v1866_v57, %v11235_v10  ;;  %8970 = vmatprep.subr.bf16.mxu0 %v10105_v26 }
 0x37e   : > { %v6864_v29 = vrot.slane %v6836_v0, %v11256_v28  ;;  %v3850_v51 = vrot.slane %v1866_v57, %v11241_v21  ;;  %v3854_v49 = vrot.slane %v1866_v57, %v11244_v39  ;;  %v6865_v34 = vcombine.low %v6843_v52, %v6850_v61  ;;  %8971 = vmatpush1.bf16.msra.mxu0 %v10103_v43 }
 0x37f   : > { %v6832_v53 = vcombine.low %v6824_v38, %v6831_v59  ;;  %v3858_v32 = vrot.slane %v1866_v57, %v11250_v27  ;;  %v3862_v13 = vrot.slane %v1866_v57, %v11253_v55  ;;  %v6882_v63 = vcombine.low %v3834_v20, %v3838_v11 }
 0x380   : > { %v6866_v30 = vcombine.low %v6857_v23, %v6864_v29  ;;  %v6883_v5 = vcombine.low %v3842_v4, %v3846_v7  ;;  %v6884_v46 = vcombine.low %v3850_v51, %v3854_v49  ;;  %v6873_v3 = vrot.slane %v6865_v34, %v11256_v28  ;;  %v12973_v60 = vpop.xlane.xlu0 %1874 }
 0x381   : > { %7299 = vperm.xlu1 %9987, %v6832_v53   ;;  %v6885_v35 = vcombine.low %v3858_v32, %v3862_v13  ;;  %v3866_v62 = vrot.slane %v12940_v12, %v11225_v50  ;;  %v3870_v31 = vrot.slane %v12940_v12, %v11229_v16  ;;  %v6892_v57 = vrot.slane %v6882_v63, %v11256_v28 }
 0x382   : > { %v6880_v25 = vrot.slane %v6866_v30, %v11256_v28  ;;  %v6899_v58 = vrot.slane %v6883_v5, %v11256_v28  ;;  %v6906_v56 = vrot.slane %v6884_v46, %v11256_v28  ;;  %v3874_v2 = vrot.slane %v12940_v12, %v11232_v17 }
 0x383   : > { %v6913_v1 = vrot.slane %v6885_v35, %v11256_v28  ;;  %v3878_v19 = vrot.slane %v12940_v12, %v11235_v10  ;;  %v3882_v8 = vrot.slane %v12940_v12, %v11241_v21  ;;  %v3886_v54 = vrot.slane %v12940_v12, %v11244_v39 }
 0x384   : > { %v6881_v18 = vcombine.low %v6873_v3, %v6880_v25  ;;  %v6914_v42 = vcombine.low %v6892_v57, %v6899_v58  ;;  %v3890_v15 = vrot.slane %v12940_v12, %v11250_v27  ;;  %v3894_v20 = vrot.slane %v12940_v12, %v11253_v55  ;;  %v13005_v7 = vpop.xlane.xlu0 %1877 }
 0x385   : > { %v6915_v40 = vcombine.low %v6906_v56, %v6913_v1  ;;  %v6931_v38 = vcombine.low %v3866_v62, %v3870_v31  ;;  %v6932_v0 = vcombine.low %v3874_v2, %v3878_v19  ;;  %v6933_v11 = vcombine.low %v3882_v8, %v3886_v54 }
 0x386   : > { %7302 = vperm.xlu1 %9987, %v6881_v18   ;;  %v6922_v52 = vrot.slane %v6914_v42, %v11256_v28  ;;  %v3898_v59 = vrot.slane %v12953_v9, %v11225_v50  ;;  %v3902_v61 = vrot.slane %v12953_v9, %v11229_v16  ;;  %v6934_v4 = vcombine.low %v3890_v15, %v3894_v20  ;;  %v7803_v26 = vpop.f32.mrb[0].mxu1 }
 0x387   : > { %v6929_v23 = vrot.slane %v6915_v40, %v11256_v28  ;;  %v6941_v29 = vrot.slane %v6931_v38, %v11256_v28  ;;  %v6948_v12 = vrot.slane %v6932_v0, %v11256_v28  ;;  %v6955_v51 = vrot.slane %v6933_v11, %v11256_v28  ;;  %v9889_v40 = vpop.f32.mrb[1].mxu1 }
 0x388   : > { %v3906_v49 = vrot.slane %v12953_v9, %v11232_v17  ;;  %v3910_v53 = vrot.slane %v12953_v9, %v11235_v10  ;;  %v3914_v34 = vrot.slane %v12953_v9, %v11241_v21  ;;  %v6962_v13 = vrot.slane %v6934_v4, %v11256_v28 }
 0x389   : > { %v6930_v32 = vcombine.low %v6922_v52, %v6929_v23  ;;  %v6963_v30 = vcombine.low %v6941_v29, %v6948_v12  ;;  %v3918_v63 = vrot.slane %v12953_v9, %v11244_v39  ;;  %v3922_v5 = vrot.slane %v12953_v9, %v11250_v27  ;;  %v7806_v52 = vpop.f32.mrb[2].mxu1 }
 0x38a   : > { %v3926_v46 = vrot.slane %v12953_v9, %v11253_v55  ;;  %v6980_v3 = vcombine.low %v3898_v59, %v3902_v61  ;;  %v6981_v35 = vcombine.low %v3906_v49, %v3910_v53  ;;  %v6964_v62 = vcombine.low %v6955_v51, %v6962_v13  ;;  %v9890_v29 = vpop.f32.mrb[3].mxu1 }
 0x38b   : > { %7305 = vperm.xlu1 %9987, %v6930_v32   ;;  %v6971_v31 = vrot.slane %v6963_v30, %v11256_v28  ;;  %v6982_v25 = vcombine.low %v3914_v34, %v3918_v63  ;;  %v3930_v57 = vrot.slane %v12973_v60, %v11225_v50  ;;  %v3934_v9 = vrot.slane %v12973_v60, %v11229_v16  ;;  %v10129_v29 = vld [vmem:[%s13692_s6 + $0x10c] ss:$16 sps:$4 sm:$0xff]  }
 0x38c   : > { %v6983_v58 = vcombine.low %v3922_v5, %v3926_v46  ;;  %v6990_v56 = vrot.slane %v6980_v3, %v11256_v28  ;;  %v6997_v1 = vrot.slane %v6981_v35, %v11256_v28  ;;  %v13026_v2 = vpop.permute.xlu0 %7224  ;;  %v6978_v19 = vrot.slane %v6964_v62, %v11256_v28  ;;  %v10115_v5 = vld [vmem:[%s13692_s6 + $0xc8] ss:$16 sps:$4 sm:$0xff]   ;;  %v10117_v46 = vld [vmem:[%s13692_s6 + $0xcc] ss:$16 sps:$4 sm:$0xff]  }
 0x38d   : > { %v7004_v8 = vrot.slane %v6982_v25, %v11256_v28  ;;  %v3938_v43 = vrot.slane %v12973_v60, %v11232_v17  ;;  %v3942_v54 = vrot.slane %v12973_v60, %v11235_v10  ;;  %v3946_v15 = vrot.slane %v12973_v60, %v11241_v21  ;;  %8972 = vmatprep.subr.bf16.mxu0 %v10117_v46 }
 0x38e   : > { %v7011_v18 = vrot.slane %v6983_v58, %v11256_v28  ;;  %v7012_v42 = vcombine.low %v6990_v56, %v6997_v1  ;;  %v6979_v20 = vcombine.low %v6971_v31, %v6978_v19  ;;  %v3950_v38 = vrot.slane %v12973_v60, %v11244_v39  ;;  %8973 = vmatpush1.bf16.msra.mxu0 %v10115_v5  ;;  %v10058_v5 = vld [vmem:[#allocation6 + $0x28] ss:$16 sps:$4 sm:$0xff]  }
 0x38f   : > { %v3954_v0 = vrot.slane %v12973_v60, %v11250_v27  ;;  %v3958_v61 = vrot.slane %v12973_v60, %v11253_v55  ;;  %v7029_v23 = vcombine.low %v3930_v57, %v3934_v9  ;;  %v7030_v12 = vcombine.low %v3938_v43, %v3942_v54  ;;  %v7720_v57 = vld [vmem:[%s13691_s5] sm:$0x1] }
 0x390   : > { %v7013_v11 = vcombine.low %v7004_v8, %v7011_v18  ;;  %v7020_v59 = vrot.slane %v7012_v42, %v11256_v28  ;;  %v13046_v4 = vpop.permute.xlu0 %7230  ;;  %7308 = vperm.xlu1 %9987, %v6979_v20   ;;  %v7031_v51 = vcombine.low %v3946_v15, %v3950_v38  ;;  %v3962_v49 = vrot.slane %v13005_v7, %v11225_v50 }
 0x391   : > { %v7032_v34 = vcombine.low %v3954_v0, %v3958_v61  ;;  %v7039_v32 = vrot.slane %v7029_v23, %v11256_v28  ;;  %v3966_v13 = vrot.slane %v13005_v7, %v11229_v16  ;;  %v7046_v60 = vrot.slane %v7030_v12, %v11256_v28  ;;  %v10127_v23 = vld [vmem:[%s13692_s6 + $0x108] ss:$16 sps:$4 sm:$0xff]  }
 0x392   : > { %v7027_v53 = vrot.slane %v7013_v11, %v11256_v28  ;;  %v7053_v30 = vrot.slane %v7031_v51, %v11256_v28  ;;  %v3970_v63 = vrot.slane %v13005_v7, %v11232_v17  ;;  %v3974_v62 = vrot.slane %v13005_v7, %v11235_v10 }
 0x393   : > { %v7060_v35 = vrot.slane %v7032_v34, %v11256_v28  ;;  %v3978_v31 = vrot.slane %v13005_v7, %v11241_v21  ;;  %v7061_v58 = vcombine.low %v7039_v32, %v7046_v60  ;;  %v3982_v56 = vrot.slane %v13005_v7, %v11244_v39 }
 0x394   : > { %v7028_v3 = vcombine.low %v7020_v59, %v7027_v53  ;;  %v13069_v25 = vpop.permute.xlu0 %7233  ;;  %v3986_v1 = vrot.slane %v13005_v7, %v11250_v27  ;;  %v3990_v9 = vrot.slane %v13005_v7, %v11253_v55  ;;  %v7078_v21 = vcombine.low %v3962_v49, %v3966_v13  ;;  %v10121_v55 = vld [vmem:[%s13692_s6 + $0xe8] ss:$16 sps:$4 sm:$0xff]   ;;  %v10123_v7 = vld [vmem:[%s13692_s6 + $0xec] ss:$16 sps:$4 sm:$0xff]   ;;  %v10177_v49 = vld [vmem:[%s13692_s6 + $0x224] ss:$16 sps:$4 sm:$0xff]  }
 0x395   : > { %v7062_v19 = vcombine.low %v7053_v30, %v7060_v35  ;;  %v7079_v8 = vcombine.low %v3970_v63, %v3974_v62  ;;  %v7069_v43 = vrot.slane %v7061_v58, %v11256_v28  ;;  %v7080_v18 = vcombine.low %v3978_v31, %v3982_v56  ;;  %8974 = vmatprep.subr.bf16.mxu0 %v10123_v7  ;;  %v10055_v13 = vld [vmem:[#allocation6 + $0x8] ss:$16 sps:$4 sm:$0xff]   ;;  %v10060_v63 = vld [vmem:[#allocation6 + $0x2c] ss:$16 sps:$4 sm:$0xff]   ;;  %v10133_v58 = vld [vmem:[%s13692_s6 + $0x128] ss:$16 sps:$4 sm:$0xff]  }
 0x396   : > { %7311 = vperm.xlu1 %9987, %v7028_v3   ;;  %v7081_v42 = vcombine.low %v3986_v1, %v3990_v9  ;;  %v7804_v54 = vadd.f32 %v7803_v26, %v7720_v57  ;;  %v7088_v39 = vrot.slane %v7078_v21, %v11256_v28  ;;  %8975 = vmatpush1.bf16.msra.mxu0 %v10121_v55  ;;  %v13823_v51 = vlaneseq  ;;  %v10063_v35 = vld [vmem:[#allocation6 + $0x4c] ss:$16 sps:$4 sm:$0xff]   ;;  %v10061_v62 = vld [vmem:[#allocation6 + $0x48] ss:$16 sps:$4 sm:$0xff]  }
 0x397   : > { %v7076_v15 = vrot.slane %v7062_v19, %v11256_v28  ;;  %v7095_v27 = vrot.slane %v7079_v8, %v11256_v28  ;;  %v7102_v20 = vrot.slane %v7080_v18, %v11256_v28  ;;  %8976 = vmatprep.subr.bf16.mxu0 %v10129_v29  ;;  %v13826_v34 = vmov 0.0   ;;  %v10066_v57 = vld [vmem:[#allocation6 + $0x6c] ss:$16 sps:$4 sm:$0xff]   ;;  %v10135_v56 = vld [vmem:[%s13692_s6 + $0x12c] ss:$16 sps:$4 sm:$0xff]  }
 0x398   : > { %v13084_v40 = vpop.permute.xlu0 %7236  ;;  %v7109_v26 = vrot.slane %v7081_v42, %v11256_v28  ;;  %10300 = vtanh.f32 %v7804_v54  ;;  %vm13105_vm1 = vcmp.lt.s32.totalorder %v13823_v51, 512  ;;  %v13827_v46 = vmov 0   ;;  %v10064_v1 = vld [vmem:[#allocation6 + $0x68] ss:$16 sps:$4 sm:$0xff]   ;;  %v10072_v21 = vld [vmem:[#allocation6 + $0x8c] ss:$16 sps:$4 sm:$0xff]  }
 0x399   : > { %v7077_v38 = vcombine.low %v7069_v43, %v7076_v15  ;;  %v7110_v0 = vcombine.low %v7088_v39, %v7095_v27  ;;  %479 = vst.msk [vmem:[#allocation2] sm:$0xf] %vm13105_vm1, %v13826_v34  ;;  %v10141_v9 = vld [vmem:[%s13692_s6 + $0x14c] ss:$16 sps:$4 sm:$0xff]   ;;  %v10139_v8 = vld [vmem:[%s13692_s6 + $0x148] ss:$16 sps:$4 sm:$0xff]  }
 0x39a   : > { %v7111_v52 = vcombine.low %v7102_v20, %v7109_v26  ;;  %8977 = vmatpush1.bf16.msra.mxu0 %v10127_v23  ;;  %v10147_v43 = vld [vmem:[%s13692_s6 + $0x16c] ss:$16 sps:$4 sm:$0xff]   ;;  %v10075_v54 = vld [vmem:[#allocation6 + $0xac] ss:$16 sps:$4 sm:$0xff]   ;;  %v10145_v15 = vld [vmem:[%s13692_s6 + $0x168] ss:$16 sps:$4 sm:$0xff]  }
 0x39b   : > { %7314 = vperm.xlu1 %9987, %v7077_v38   ;;  %v7118_v11 = vrot.slane %v7110_v0, %v11256_v28  ;;  %8978 = vmatprep.subr.bf16.mxu0 %v10135_v56  ;;  %v10070_v18 = vld [vmem:[#allocation6 + $0x88] ss:$16 sps:$4 sm:$0xff]   ;;  %v10078_v7 = vld [vmem:[#allocation6 + $0xcc] ss:$16 sps:$4 sm:$0xff]   ;;  %v10151_v20 = vld [vmem:[%s13692_s6 + $0x188] ss:$16 sps:$4 sm:$0xff]   ;;  %v13157_v0 = vpop.permute.xlu1 %7227 }
 0x39c   : > { %v13095_v59 = vpop.permute.xlu0 %7239  ;;  %v7125_v61 = vrot.slane %v7111_v52, %v11256_v28  ;;  %v10153_v39 = vld [vmem:[%s13692_s6 + $0x18c] ss:$16 sps:$4 sm:$0xff]   ;;  %v10093_v51 = vld [vmem:[%s13692_s6 + $0x4] ss:$16 sps:$4 sm:$0xff]   ;;  %v10163_v34 = vld [vmem:[%s13692_s6 + $0x1c8] ss:$16 sps:$4 sm:$0xff]  }
 0x39d   : > { %v10073_v27 = vld [vmem:[#allocation6 + $0xa8] ss:$16 sps:$4 sm:$0xff]   ;;  %v10094_v56 = vld [vmem:[%s13692_s6 + $0x20] ss:$16 sps:$4 sm:$0xff]  }
 0x39e   : > { %v7126_v12 = vcombine.low %v7118_v11, %v7125_v61  ;;  %8979 = vmatpush1.bf16.msra.mxu0 %v10133_v58  ;;  %v10159_v26 = vld [vmem:[%s13692_s6 + $0x1ac] ss:$16 sps:$4 sm:$0xff]   ;;  %v10081_v11 = vld [vmem:[#allocation6 + $0xec] ss:$16 sps:$4 sm:$0xff]   ;;  %v10157_v61 = vld [vmem:[%s13692_s6 + $0x1a8] ss:$16 sps:$4 sm:$0xff]  }
 0x39f   : > { %8980 = vmatprep.subr.bf16.mxu0 %v10141_v9  ;;  %v10076_v38 = vld [vmem:[#allocation6 + $0xc8] ss:$16 sps:$4 sm:$0xff]  }
 0x3a0   : > { %v13109_v53 = vpop.permute.xlu0 %7242  ;;  %7317 = vperm.xlu1 %9987, %v7126_v12   ;;  %v10165_v23 = vld [vmem:[%s13692_s6 + $0x1cc] ss:$16 sps:$4 sm:$0xff]  }
 0x3a1   : > { %v10079_v29 = vld [vmem:[#allocation6 + $0xe8] ss:$16 sps:$4 sm:$0xff]  }
 0x3a2   : > { %v10301_v32 = vpop.eup %10300  ;;  %8981 = vmatpush1.bf16.msra.mxu0 %v10139_v8 }
 0x3a3   : > { %v13114_v60 = vpack.c.bf16 %v10301_v32, %v10301_v32  ;;  %8982 = vmatprep.subr.bf16.mxu0 %v10147_v43  ;;  %v7416_v32 = vadd.s32 4294967184, %v11796_v6  ;;  %v10097_v43 = vld [vmem:[%s13692_s6 + $0x40] ss:$16 sps:$4 sm:$0xff]  }
 0x3a4   : > { %v13116_v30 = vpop.permute.xlu0 %7245 }
 0x3a5   : > { %8189 = vmatmul.mubr.bf16.vlgmr.msra.gmra.mrb[4].mxu1 %v13114_v60  ;;  %v13190_v58 = vsub.s32 %v7416_v32, %v13781_v45  ;;  %v10120_v32 = vld [vmem:[%s13692_s6 + $0xe4] ss:$16 sps:$4 sm:$0xff]  }
 0x3a6   : > { %8198 = vmatpush1.bf16.msra.mxu1 %v10055_v13  ;;  %8229 = vmatprep.mubr.bf16.mxu1 %v13827_v46  ;;  %v7219_v13 = vpop.permute.xlu1 %7218  ;;  %v10091_v46 = vld [vmem:[%s13692_s6] ss:$16 sps:$4 sm:$0xff]  }
 0x3a7   : > { %8199 = vmatprep.subr.bf16.mxu1 %v10060_v63  ;;  %8983 = vmatpush1.bf16.msra.mxu0 %v10145_v15  ;;  %v10171_v63 = vld [vmem:[%s13692_s6 + $0x1ec] ss:$16 sps:$4 sm:$0xff]  }
 0x3a8   : > { %v13120_v3 = vpop.permute.xlu0 %7248  ;;  %8984 = vmatprep.subr.bf16.mxu0 %v10153_v39 }
 0x3aa   : > { %8200 = vmatpush1.bf16.msra.mxu1 %v10058_v5  ;;  %v7423_v5 = vadd.s32 4294967176, %v11796_v6 }
 0x3ab   : > { %8201 = vmatprep.subr.bf16.mxu1 %v10063_v35  ;;  %8985 = vmatpush1.bf16.msra.mxu0 %v10151_v20 }
 0x3ac   : > { %v13122_v31 = vpop.permute.xlu0 %7251  ;;  %8986 = vmatprep.subr.bf16.mxu0 %v10159_v26  ;;  %v13194_v6 = vsub.s32 %v7423_v5, %v13781_v45  ;;  %v10100_v26 = vld [vmem:[%s13692_s6 + $0x60] ss:$16 sps:$4 sm:$0xff]  }
 0x3ae   : > { %8202 = vmatpush1.bf16.msra.mxu1 %v10061_v62  ;;  %v10096_v62 = vld [vmem:[%s13692_s6 + $0x24] ss:$16 sps:$4 sm:$0xff]  }
 0x3af   : > { %8203 = vmatprep.subr.bf16.mxu1 %v10066_v57  ;;  %8987 = vmatpush1.bf16.msra.mxu0 %v10157_v61  ;;  %v10169_v57 = vld [vmem:[%s13692_s6 + $0x1e8] ss:$16 sps:$4 sm:$0xff]  }
 0x3b0   : > { %v13133_v19 = vpop.permute.xlu0 %7254  ;;  %8988 = vmatprep.subr.bf16.mxu0 %v10165_v23  ;;  %v10109_v23 = vld [vmem:[%s13692_s6 + $0xa0] ss:$16 sps:$4 sm:$0xff]  }
 0x3b2   : > { %8204 = vmatpush1.bf16.msra.mxu1 %v10064_v1  ;;  %v7222_v1 = vpop.permute.xlu1 %7221 }
 0x3b3   : > { %8205 = vmatprep.subr.bf16.mxu1 %v10072_v21  ;;  %8989 = vmatpush1.bf16.msra.mxu0 %v10163_v34  ;;  %v10099_v21 = vld [vmem:[%s13692_s6 + $0x44] ss:$16 sps:$4 sm:$0xff]   ;;  %v7507_v45 = vrot.slane %v7222_v1, %v13194_v6  ;;  %v10112_v34 = vld [vmem:[%s13692_s6 + $0xc0] ss:$16 sps:$4 sm:$0xff]  }
 0x3b4   : > { %v13141_v42 = vpop.permute.xlu0 %7257  ;;  %8990 = vmatprep.subr.bf16.mxu0 %v10171_v63  ;;  %v10126_v63 = vld [vmem:[%s13692_s6 + $0x104] ss:$16 sps:$4 sm:$0xff]  }
 0x3b6   : > { %8206 = vmatpush1.bf16.msra.mxu1 %v10070_v18  ;;  %v13238_v61 = vpop.permute.xlu1 %7275 }
 0x3b7   : > { %8207 = vmatprep.subr.bf16.mxu1 %v10075_v54  ;;  %8991 = vmatpush1.bf16.msra.mxu0 %v10169_v57  ;;  %v10102_v54 = vld [vmem:[%s13692_s6 + $0x64] ss:$16 sps:$4 sm:$0xff]   ;;  %v10130_v57 = vld [vmem:[%s13692_s6 + $0x120] ss:$16 sps:$4 sm:$0xff]  }
 0x3b8   : > { %v13149_v55 = vpop.permute.xlu0 %7260 }
 0x3ba   : > { %8208 = vmatpush1.bf16.msra.mxu1 %v10073_v27 }
 0x3bb   : > { %8209 = vmatprep.subr.bf16.mxu1 %v10078_v7 }
 0x3bc   : > { %v13159_v52 = vpop.permute.xlu0 %7263 }
 0x3be   : > { %8210 = vmatpush1.bf16.msra.mxu1 %v10076_v38 }
 0x3bf   : > { %8211 = vmatprep.subr.bf16.mxu1 %v10081_v11  ;;  %v10111_v11 = vld [vmem:[%s13692_s6 + $0xa4] ss:$16 sps:$4 sm:$0xff]  }
 0x3c0   : > { %v13167_v12 = vpop.permute.xlu0 %7272 }
 0x3c2   : > { %8212 = vmatpush1.bf16.msra.mxu1 %v10079_v29  ;;  %v10114_v29 = vld [vmem:[%s13692_s6 + $0xc4] ss:$16 sps:$4 sm:$0xff]  }
 0x3c3   : > { %8878 = vmatprep.subr.bf16.mxu1 %v10093_v51  ;;  %v13246_v51 = vpop.permute.xlu1 %7278 }
 0x3c4   : > { %v7171_v35 = vpop.permute.xlu0 %7170 }
 0x3c5   : > { %8230 = vmatmul.mubr.bf16.vlgmr.msra.gmra.mrb[8].mxu1 %v13114_v60  ;;  %v7502_v60 = vrot.slane %v7219_v13, %v13190_v58  ;;  %v7420_v8 = vrot.slane %v7171_v35, %v13190_v58  ;;  %v10118_v13 = vld [vmem:[%s13692_s6 + $0xe0] ss:$16 sps:$4 sm:$0xff]   ;;  %v10132_v35 = vld [vmem:[%s13692_s6 + $0x124] ss:$16 sps:$4 sm:$0xff]  }
 0x3c6   : > { %8879 = vmatpush1.bf16.msra.mxu1 %v10091_v46  ;;  %v10124_v46 = vld [vmem:[%s13692_s6 + $0x100] ss:$16 sps:$4 sm:$0xff]  }
 0x3c7   : > { %8880 = vmatprep.subr.bf16.mxu1 %v10096_v62  ;;  %v7503_v39 = vsel %vm7421_vm2, %v7502_v60, %v12769_v37  ;;  %v7422_v27 = vsel %vm7421_vm2, %v7420_v8, %v12740_v48  ;;  %v10108_v37 = vld [vmem:[%s13692_s6 + $0x84] ss:$16 sps:$4 sm:$0xff]   ;;  %v10106_v48 = vld [vmem:[%s13692_s6 + $0x80] ss:$16 sps:$4 sm:$0xff]   ;;  %v13260_v5 = vpop.permute.xlu1 %7281 }
 0x3c8   : > { %v13199_v9 = vpop.permute.xlu0 %7266  ;;  %v13219_v7 = vsel %vm7428_vm12, %v7507_v45, %v7503_v39  ;;  %v10144_v60 = vld [vmem:[%s13692_s6 + $0x164] ss:$16 sps:$4 sm:$0xff]   ;;  %v10142_v8 = vld [vmem:[%s13692_s6 + $0x160] ss:$16 sps:$4 sm:$0xff]  }
 0x3c9   : > { %v10154_v39 = vld [vmem:[%s13692_s6 + $0x1a0] ss:$16 sps:$4 sm:$0xff]  }
 0x3ca   : > { %8881 = vmatpush1.bf16.msra.mxu1 %v10094_v56  ;;  %v10138_v56 = vld [vmem:[%s13692_s6 + $0x144] ss:$16 sps:$4 sm:$0xff]  }
 0x3cb   : > { %8882 = vmatprep.subr.bf16.mxu1 %v10099_v21  ;;  %v10136_v21 = vld [vmem:[%s13692_s6 + $0x140] ss:$16 sps:$4 sm:$0xff]  }
 0x3cc   : > { %v7174_v18 = vpop.permute.xlu0 %7173 }
 0x3cd   : > { %v7427_v15 = vrot.slane %v7174_v18, %v13194_v6  ;;  %v10148_v18 = vld [vmem:[%s13692_s6 + $0x180] ss:$16 sps:$4 sm:$0xff]  }
 0x3ce   : > { %8883 = vmatpush1.bf16.msra.mxu1 %v10097_v43  ;;  %v10150_v43 = vld [vmem:[%s13692_s6 + $0x184] ss:$16 sps:$4 sm:$0xff]  }
 0x3cf   : > { %v13222_v20 = vsel %vm7428_vm12, %v7427_v15, %v7422_v27  ;;  %8884 = vmatprep.subr.bf16.mxu1 %v10102_v54  ;;  %v10156_v54 = vld [vmem:[%s13692_s6 + $0x1a4] ss:$16 sps:$4 sm:$0xff]  }
 0x3d0   : > { %v7667_v38 = vcombine.low %v13222_v20, %v13219_v7  ;;  %v10162_v27 = vld [vmem:[%s13692_s6 + $0x1c4] ss:$16 sps:$4 sm:$0xff]  }
 0x3d2   : > { %8885 = vmatpush1.bf16.msra.mxu1 %v10100_v26 }
 0x3d3   : > { %8886 = vmatprep.subr.bf16.mxu1 %v10108_v37  ;;  %v10160_v37 = vld [vmem:[%s13692_s6 + $0x1c0] ss:$16 sps:$4 sm:$0xff]  }
 0x3d6   : > { %8887 = vmatpush1.bf16.msra.mxu1 %v10106_v48  ;;  %v10168_v48 = vld [vmem:[%s13692_s6 + $0x1e4] ss:$16 sps:$4 sm:$0xff]  }
 0x3d7   : > { %8888 = vmatprep.subr.bf16.mxu1 %v10111_v11  ;;  %v10166_v11 = vld [vmem:[%s13692_s6 + $0x1e0] ss:$16 sps:$4 sm:$0xff]  }
 0x3da   : > { %8889 = vmatpush1.bf16.msra.mxu1 %v10109_v23 }
 0x3db   : > { %8890 = vmatprep.subr.bf16.mxu1 %v10114_v29  ;;  %v10174_v29 = vld [vmem:[%s13692_s6 + $0x204] ss:$16 sps:$4 sm:$0xff]  }
 0x3de   : > { %8891 = vmatpush1.bf16.msra.mxu1 %v10112_v34 }
 0x3df   : > { %8892 = vmatprep.subr.bf16.mxu1 %v10120_v32 }
 0x3e2   : > { %8893 = vmatpush1.bf16.msra.mxu1 %v10118_v13  ;;  %v13828_v13 = vld [vmem:[#allocation32_spill] sm:$0xff] }
 0x3e3   : > { %8894 = vmatprep.subr.bf16.mxu1 %v10126_v63  ;;  %v7591_v63 = vrot.slane %v13167_v12, %v13828_v13 }
 0x3e5   : > { %v13268_v62 = vpop.permute.xlu1 %7284 }
 0x3e6   : > { %8895 = vmatpush1.bf16.msra.mxu1 %v10124_v46  ;;  %v13829_v46 = vld [vmem:[#allocation20_spill] sm:$0xff] }
 0x3e7   : > { %8896 = vmatprep.subr.bf16.mxu1 %v10132_v35  ;;  %v7595_v35 = vrot.slane %v13238_v61, %v13829_v46 }
 0x3ea   : > { %8897 = vmatpush1.bf16.msra.mxu1 %v10130_v57 }
 0x3eb   : > { %v13276_v1 = vpop.permute.xlu1 %7287  ;;  %8898 = vmatprep.subr.bf16.mxu1 %v10138_v56  ;;  %v7512_v56 = vrot.slane %v13026_v2, %v13828_v13  ;;  %v7546_v13 = vrot.slane %v13116_v30, %v13811_v41 }
 0x3ee   : > { %8899 = vmatpush1.bf16.msra.mxu1 %v10136_v21  ;;  %v7596_v21 = vsel %vm7330_vm3, %v7595_v35, %v7591_v63 }
 0x3ef   : > { %8900 = vmatprep.subr.bf16.mxu1 %v10144_v60  ;;  %v13830_v60 = vld [vmem:[#allocation29_spill] sm:$0xff] }
 0x3f0   : > { %v7291_v45 = vpop.permute.xlu1 %7290 }
 0x3f2   : > { %8901 = vmatpush1.bf16.msra.mxu1 %v10142_v8  ;;  %v7521_v8 = vrot.slane %v13046_v4, %v13830_v60  ;;  %v13833_v4 = vld [vmem:[#allocation34_spill] sm:$0xff] }
 0x3f3   : > { %8902 = vmatprep.subr.bf16.mxu1 %v10150_v43  ;;  %v7600_v43 = vrot.slane %v13246_v51, %v13830_v60 }
 0x3f5   : > { %v7294_v15 = vpop.permute.xlu1 %7293 }
 0x3f6   : > { %8903 = vmatpush1.bf16.msra.mxu1 %v10148_v18  ;;  %v7516_v18 = vrot.slane %v13157_v0, %v13829_v46  ;;  %v7615_v0 = vrot.slane %v13276_v1, %v13833_v4  ;;  %v7551_v1 = vrot.slane %v13120_v3, %v13812_v44 }
 0x3f7   : > { %8904 = vmatprep.subr.bf16.mxu1 %v10156_v54  ;;  %v13831_v54 = vld [vmem:[#allocation30_spill] sm:$0xff] }
 0x3f8   : > { %v7526_v12 = vrot.slane %v13069_v25, %v13831_v54  ;;  %v7605_v51 = vrot.slane %v13260_v5, %v13831_v54  ;;  %v7625_v5 = vrot.slane %v7294_v15, %v13811_v41  ;;  %v7561_v15 = vrot.slane %v13133_v19, %v12294_v14  ;;  %v7270_v19 = vpop.permute.xlu0 %7269 }
 0x3fa   : > { %v7297_v26 = vpop.permute.xlu1 %7296  ;;  %8905 = vmatpush1.bf16.msra.mxu1 %v10154_v39  ;;  %v13832_v39 = vld [vmem:[#allocation31_spill] sm:$0xff] }
 0x3fb   : > { %8906 = vmatprep.subr.bf16.mxu1 %v10162_v27  ;;  %v7531_v61 = vrot.slane %v13084_v40, %v13832_v39  ;;  %v7601_v27 = vsel %vm7337_vm4, %v7600_v43, %v7596_v21  ;;  %v7610_v2 = vrot.slane %v13268_v62, %v13832_v39  ;;  %v7541_v40 = vrot.slane %v13109_v53, %v13810_v24 }
 0x3fc   : > { %v7630_v53 = vrot.slane %v7297_v26, %v13812_v44  ;;  %v7566_v26 = vrot.slane %v13141_v42, %v12299_v36  ;;  %v7576_v42 = vrot.slane %v13159_v52, %v12604_v47 }
 0x3fe   : > { %8907 = vmatpush1.bf16.msra.mxu1 %v10160_v37  ;;  %v7517_v37 = vsel %vm7330_vm3, %v7516_v18, %v7512_v56  ;;  %v7581_v18 = vrot.slane %v13199_v9, %v13190_v58 }
 0x3ff   : > { %8908 = vmatprep.subr.bf16.mxu1 %v10168_v48  ;;  %v7536_v48 = vrot.slane %v13095_v59, %v13833_v4  ;;  %v7606_v59 = vsel %vm7344_vm5, %v7605_v51, %v7601_v27  ;;  %v7675_v51 = vrot.slane %v7667_v38, %v11256_v28 }
 0x400   : > { %v7300_v23 = vpop.permute.xlu1 %7299  ;;  %v7611_v46 = vsel %vm7351_vm6, %v7610_v2, %v7606_v59 }
 0x401   : > { %v7616_v30 = vsel %vm7358_vm7, %v7615_v0, %v7611_v46  ;;  %v7635_v35 = vrot.slane %v7300_v23, %v13813_v33  ;;  %v7571_v23 = vrot.slane %v13149_v55, %v12587_v22  ;;  %v10178_v46 = vld [vmem:[%s13692_s6 + $0x240] ss:$16 sps:$4 sm:$0xff]  }
 0x402   : > { %8909 = vmatpush1.bf16.msra.mxu1 %v10166_v11  ;;  %v7522_v11 = vsel %vm7337_vm4, %v7521_v8, %v7517_v37 }
 0x403   : > { %8919 = vmatprep.subr.bf16.mxu1 %v10174_v29  ;;  %v7620_v29 = vrot.slane %v7291_v45, %v13810_v24  ;;  %v7527_v62 = vsel %vm7344_vm5, %v7526_v12, %v7522_v11  ;;  %v7556_v45 = vrot.slane %v13122_v31, %v13813_v33  ;;  %v1686_v11 = vld [vmem:[#allocation2] sm:$0xf] }
 0x404   : > { %v7532_v63 = vsel %vm7351_vm6, %v7531_v61, %v7527_v62 }
 0x405   : > { %v7303_v34 = vpop.permute.xlu1 %7302  ;;  %v7537_v24 = vsel %vm7358_vm7, %v7536_v48, %v7532_v63  ;;  %v7621_v3 = vsel %vm7365_vm8, %v7620_v29, %v7616_v30  ;;  %v10175_v63 = vld [vmem:[%s13692_s6 + $0x220] ss:$16 sps:$4 sm:$0xff]  }
 0x406   : > { %v7542_v41 = vsel %vm7365_vm8, %v7541_v40, %v7537_v24  ;;  %v7640_v56 = vrot.slane %v7303_v34, %v12294_v14  ;;  %v7626_v31 = vsel %vm7372_vm9, %v7625_v5, %v7621_v3  ;;  %v10181_v24 = vld [vmem:[%s13692_s6 + $0x260] ss:$16 sps:$4 sm:$0xff]  }
 0x407   : > { %v7547_v44 = vsel %vm7372_vm9, %v7546_v13, %v7542_v41  ;;  %v7631_v8 = vsel %vm7379_vm10, %v7630_v53, %v7626_v31  ;;  %v10183_v53 = vld [vmem:[%s13692_s6 + $0x264] ss:$16 sps:$4 sm:$0xff]   ;;  %v10184_v30 = vld [vmem:[%s13692_s6 + $0x280] ss:$16 sps:$4 sm:$0xff]  }
 0x408   : > { %v7552_v33 = vsel %vm7379_vm10, %v7551_v1, %v7547_v44  ;;  %v7636_v43 = vsel %vm7386_vm11, %v7635_v35, %v7631_v8  ;;  %v10180_v1 = vld [vmem:[%s13692_s6 + $0x244] ss:$16 sps:$4 sm:$0xff]   ;;  %v10187_v41 = vld [vmem:[%s13692_s6 + $0x2a0] ss:$16 sps:$4 sm:$0xff]  }
 0x409   : > { %v7557_v34 = vsel %vm7386_vm11, %v7556_v45, %v7552_v33  ;;  %v7641_v55 = vsel %vm7393_vm13, %v7640_v56, %v7636_v43  ;;  %v10186_v45 = vld [vmem:[%s13692_s6 + $0x284] ss:$16 sps:$4 sm:$0xff]   ;;  %v10190_v3 = vld [vmem:[%s13692_s6 + $0x2c0] ss:$16 sps:$4 sm:$0xff]  }
 0x40a   : > { %v7306_v32 = vpop.permute.xlu1 %7305  ;;  %v10189_v35 = vld [vmem:[%s13692_s6 + $0x2a4] ss:$16 sps:$4 sm:$0xff]   ;;  %v10193_v44 = vld [vmem:[%s13692_s6 + $0x2e0] ss:$16 sps:$4 sm:$0xff]  }
 0x40b   : > { %v7645_v21 = vrot.slane %v7306_v32, %v12299_v36  ;;  %v7562_v32 = vsel %vm7393_vm13, %v7561_v15, %v7557_v34  ;;  %v10192_v15 = vld [vmem:[%s13692_s6 + $0x2c4] ss:$16 sps:$4 sm:$0xff]   ;;  %v10196_v31 = vld [vmem:[%s13692_s6 + $0x300] ss:$16 sps:$4 sm:$0xff]  }
 0x40c   : > { %v10195_v56 = vld [vmem:[%s13692_s6 + $0x2e4] ss:$16 sps:$4 sm:$0xff]   ;;  %v10205_v8 = vld [vmem:[%s13692_s6 + $0x360] ss:$16 sps:$4 sm:$0xff]  }
 0x40d   : > { %v7646_v12 = vsel %vm7400_vm14, %v7645_v21, %v7641_v55  ;;  %v10201_v21 = vld [vmem:[%s13692_s6 + $0x324] ss:$16 sps:$4 sm:$0xff]   ;;  %v10208_v34 = vld [vmem:[%s13692_s6 + $0x380] ss:$16 sps:$4 sm:$0xff]  }
 0x40e   : > { %v10204_v33 = vld [vmem:[%s13692_s6 + $0x344] ss:$16 sps:$4 sm:$0xff]   ;;  %v10211_v43 = vld [vmem:[%s13692_s6 + $0x3a0] ss:$16 sps:$4 sm:$0xff]  }
 0x40f   : > { %v7309_v57 = vpop.permute.xlu1 %7308  ;;  %v10217_v55 = vld [vmem:[%s13692_s6 + $0x3e0] ss:$16 sps:$4 sm:$0xff]  }
 0x410   : > { %v7650_v14 = vrot.slane %v7309_v57, %v12587_v22  ;;  %v7567_v22 = vsel %vm7400_vm14, %v7566_v26, %v7562_v32  ;;  %v7586_v57 = vrot.slane %v7270_v19, %v13194_v6  ;;  %v10198_v26 = vld [vmem:[%s13692_s6 + $0x304] ss:$16 sps:$4 sm:$0xff]   ;;  %v10214_v32 = vld [vmem:[%s13692_s6 + $0x3c0] ss:$16 sps:$4 sm:$0xff]  }
 0x411   : > { %v7572_v52 = vsel %vm7407_vm15, %v7571_v23, %v7567_v22  ;;  %v10202_v23 = vld [vmem:[%s13692_s6 + $0x340] ss:$16 sps:$4 sm:$0xff]   ;;  %v10207_v19 = vld [vmem:[%s13692_s6 + $0x364] ss:$16 sps:$4 sm:$0xff]   ;;  %v10222_v22 = vld [vmem:[%s13692_s6 + $0x20c] ss:$16 sps:$4 sm:$0xff]  }
 0x412   : > { %v7651_v39 = vsel %vm7407_vm15, %v7650_v14, %v7646_v12  ;;  %v7577_v61 = vsel %vm7414_vm0, %v7576_v42, %v7572_v52  ;;  %v10210_v14 = vld [vmem:[%s13692_s6 + $0x384] ss:$16 sps:$4 sm:$0xff]   ;;  %v10220_v12 = vld [vmem:[%s13692_s6 + $0x208] ss:$16 sps:$4 sm:$0xff]  }
 0x413   : > { %v7582_v2 = vsel %vm7421_vm2, %v7581_v18, %v7577_v61  ;;  %v10213_v42 = vld [vmem:[%s13692_s6 + $0x3a4] ss:$16 sps:$4 sm:$0xff]  }
 0x414   : > { %v7587_v37 = vsel %vm7428_vm12, %v7586_v57, %v7582_v2  ;;  %v10219_v18 = vld [vmem:[%s13692_s6 + $0x3e4] ss:$16 sps:$4 sm:$0xff]   ;;  %v10228_v2 = vld [vmem:[%s13692_s6 + $0x24c] ss:$16 sps:$4 sm:$0xff]  }
 0x415   : > { %v7312_v25 = vpop.permute.xlu1 %7311 }
 0x416   : > { %v7655_v36 = vrot.slane %v7312_v25, %v12604_v47 }
 0x418   : > { %v7656_v27 = vsel %vm7414_vm0, %v7655_v36, %v7651_v39  ;;  %v10216_v36 = vld [vmem:[%s13692_s6 + $0x3c4] ss:$16 sps:$4 sm:$0xff]  }
 0x41a   : > { %v7315_v60 = vpop.permute.xlu1 %7314 }
 0x41b   : > { %v7660_v54 = vrot.slane %v7315_v60, %v13190_v58  ;;  %v10199_v60 = vld [vmem:[%s13692_s6 + $0x320] ss:$16 sps:$4 sm:$0xff]  }
 0x41d   : > { %v7661_v58 = vsel %vm7421_vm2, %v7660_v54, %v7656_v27 }
 0x41f   : > { %v7318_v47 = vpop.permute.xlu1 %7317 }
 0x420   : > { %v7665_v9 = vrot.slane %v7318_v47, %v13194_v6  ;;  %v10225_v47 = vld [vmem:[%s13692_s6 + $0x22c] ss:$16 sps:$4 sm:$0xff]  }
 0x422   : > { %v7666_v4 = vsel %vm7428_vm12, %v7665_v9, %v7661_v58  ;;  %v10223_v9 = vld [vmem:[%s13692_s6 + $0x228] ss:$16 sps:$4 sm:$0xff]  }
 0x423   : > { %v7668_v48 = vcombine.low %v7587_v37, %v7666_v4  ;;  %v10226_v58 = vld [vmem:[%s13692_s6 + $0x248] ss:$16 sps:$4 sm:$0xff]   ;;  %v10231_v37 = vld [vmem:[%s13692_s6 + $0x26c] ss:$16 sps:$4 sm:$0xff]  }
 0x424   : > { %v10229_v4 = vld [vmem:[%s13692_s6 + $0x268] ss:$16 sps:$4 sm:$0xff]  }
 0x425   : > { %v7682_v0 = vrot.slane %v7668_v48, %v11256_v28  ;;  %v10234_v48 = vld [vmem:[%s13692_s6 + $0x28c] ss:$16 sps:$4 sm:$0xff]  }
 0x427   : > { %v7683_v25 = vcombine.low %v7675_v51, %v7682_v0  ;;  %v10232_v51 = vld [vmem:[%s13692_s6 + $0x288] ss:$16 sps:$4 sm:$0xff]   ;;  %v10237_v0 = vld [vmem:[%s13692_s6 + $0x2ac] ss:$16 sps:$4 sm:$0xff]  }
 0x429   : > { %v7690_v6 = vrot.slane %v7683_v25, %v11256_v28  ;;  %v10172_v28 = vld [vmem:[%s13692_s6 + $0x200] ss:$16 sps:$4 sm:$0xff]   ;;  %v10235_v25 = vld [vmem:[%s13692_s6 + $0x2a8] ss:$16 sps:$4 sm:$0xff]  }
 0x42b   : > { %v7692_v40 = vadd.f32 %v7690_v6, %v1686_v11  ;;  %v10240_v11 = vld [vmem:[%s13692_s6 + $0x2cc] ss:$16 sps:$4 sm:$0xff]   ;;  %v10238_v6 = vld [vmem:[%s13692_s6 + $0x2c8] ss:$16 sps:$4 sm:$0xff]  }
 0x42d   : > { %7697 = vst.msk [vmem:[#allocation2] sm:$0xf] %vm13105_vm1, %v7692_v40  ;;  %v10243_v40 = vld [vmem:[%s13692_s6 + $0x2ec] ss:$16 sps:$4 sm:$0xff]  }
 0x434   : > { %v7701_v29 = vld [vmem:[#allocation2] sm:$0xf] }
 0x435   : > { %v13405_v62 = vmul.f32 0.00390625, %v7701_v29  ;;  %v10268_v29 = vld [vmem:[#allocation8 + $0x40] sm:$0xff]  }
 0x436   : > { %9827 = vmatprep.subr.bf16.mxu0 %v10268_v29 }
 0x437   : > { %v7818_v13 = vrot.slane %v13405_v62, %v11229_v16  ;;  %v7814_v7 = vrot.slane %v13405_v62, %v11225_v50  ;;  %v7826_v20 = vrot.slane %v13405_v62, %v11235_v10  ;;  %v7822_v54 = vrot.slane %v13405_v62, %v11232_v17  ;;  %v10269_v62 = vld [vmem:[#allocation8] sm:$0xff]  }
 0x439   : > { %v7832_v38 = vpack.c.bf16 %v7818_v13, %v7818_v13  ;;  %v7831_v59 = vpack.c.bf16 %v7814_v7, %v7814_v7  ;;  %v13419_v5 = vpack.c.bf16 %v7826_v20, %v7826_v20  ;;  %v13521_v39 = vpack.c.bf16 %v7822_v54, %v7822_v54  ;;  %v10270_v13 = vld [vmem:[#allocation8 + $0x48] sm:$0xff]   ;;  %v10241_v7 = vld [vmem:[%s13692_s6 + $0x2e8] ss:$16 sps:$4 sm:$0xff]   ;;  %v10283_v54 = vld [vmem:[#allocation8 + $0x38] sm:$0xff]  }
 0x43a   : > { %v10271_v20 = vld [vmem:[#allocation8 + $0x8] sm:$0xff]  }
 0x43b   : > { %8910 = vmatprep.mubr.bf16.mxu1 %v7832_v38  ;;  %8992 = vmatprep.mubr.bf16.mxu0 %v7832_v38  ;;  %v10246_v38 = vld [vmem:[%s13692_s6 + $0x30c] ss:$16 sps:$4 sm:$0xff]  }
 0x43c   : > { %8911 = vmatmul.mubr.bf16.vlgmr.msra.gmra.mrb[12].mxu1 %v7831_v59  ;;  %8993 = vmatmul.mubr.bf16.vlgmr.msra.gmra.mrb[128].mxu0 %v7831_v59 }
 0x43d   : > { %8920 = vmatpush1.bf16.msra.mxu1 %v10172_v28  ;;  %8951 = vmatprep.mubr.bf16.mxu1 %v13419_v5  ;;  %v10272_v28 = vld [vmem:[#allocation8 + $0x50] sm:$0xff]  }
 0x43e   : > { %8921 = vmatprep.subr.bf16.mxu1 %v10177_v49  ;;  %9828 = vmatpush3.bf16.msra.mxu0 %v10269_v62  ;;  %v10244_v49 = vld [vmem:[%s13692_s6 + $0x308] ss:$16 sps:$4 sm:$0xff]  }
 0x43f   : > { %9829 = vmatprep.subr.bf16.mxu0 %v10270_v13  ;;  %v10295_v13 = vld [vmem:[#allocation8 + $0xa8] sm:$0xff]  }
 0x441   : > { %8922 = vmatpush1.bf16.msra.mxu1 %v10175_v63  ;;  %v10273_v63 = vld [vmem:[#allocation8 + $0x10] sm:$0xff]  }
 0x442   : > { %8923 = vmatprep.subr.bf16.mxu1 %v10180_v1  ;;  %9830 = vmatpush3.bf16.msra.mxu0 %v10271_v20  ;;  %v10249_v1 = vld [vmem:[%s13692_s6 + $0x32c] ss:$16 sps:$4 sm:$0xff]   ;;  %v10297_v20 = vld [vmem:[#allocation8 + $0xb0] sm:$0xff]  }
 0x443   : > { %9831 = vmatprep.subr.bf16.mxu0 %v10272_v28 }
 0x445   : > { %8924 = vmatpush1.bf16.msra.mxu1 %v10178_v46 }
 0x446   : > { %8925 = vmatprep.subr.bf16.mxu1 %v10183_v53  ;;  %v10274_v53 = vld [vmem:[#allocation8 + $0x58] sm:$0xff]   ;;  %9832 = vmatpush3.bf16.msra.mxu0 %v10273_v63 }
 0x447   : > { %9833 = vmatprep.subr.bf16.mxu0 %v10274_v53 }
 0x449   : > { %8926 = vmatpush1.bf16.msra.mxu1 %v10181_v24 }
 0x44a   : > { %8927 = vmatprep.subr.bf16.mxu1 %v10186_v45  ;;  %v10247_v45 = vld [vmem:[%s13692_s6 + $0x328] ss:$16 sps:$4 sm:$0xff]  }
 0x44d   : > { %8928 = vmatpush1.bf16.msra.mxu1 %v10184_v30  ;;  %v10275_v30 = vld [vmem:[#allocation8 + $0x18] sm:$0xff]  }
 0x44e   : > { %8929 = vmatprep.subr.bf16.mxu1 %v10189_v35  ;;  %v10252_v35 = vld [vmem:[%s13692_s6 + $0x34c] ss:$16 sps:$4 sm:$0xff]   ;;  %9834 = vmatpush3.bf16.msra.mxu0 %v10275_v30 }
 0x451   : > { %8930 = vmatpush1.bf16.msra.mxu1 %v10187_v41  ;;  %v10276_v41 = vld [vmem:[#allocation8 + $0x60] sm:$0xff]  }
 0x452   : > { %8931 = vmatprep.subr.bf16.mxu1 %v10192_v15  ;;  %v10250_v15 = vld [vmem:[%s13692_s6 + $0x348] ss:$16 sps:$4 sm:$0xff]   ;;  %9835 = vmatprep.subr.bf16.mxu0 %v10276_v41 }
 0x455   : > { %8932 = vmatpush1.bf16.msra.mxu1 %v10190_v3  ;;  %v10277_v3 = vld [vmem:[#allocation8 + $0x20] sm:$0xff]  }
 0x456   : > { %8933 = vmatprep.subr.bf16.mxu1 %v10195_v56  ;;  %v10255_v56 = vld [vmem:[%s13692_s6 + $0x36c] ss:$16 sps:$4 sm:$0xff]   ;;  %9836 = vmatpush3.bf16.msra.mxu0 %v10277_v3 }
 0x459   : > { %8934 = vmatpush1.bf16.msra.mxu1 %v10193_v44  ;;  %v10278_v44 = vld [vmem:[#allocation8 + $0x68] sm:$0xff]  }
 0x45a   : > { %8935 = vmatprep.subr.bf16.mxu1 %v10198_v26  ;;  %v10253_v26 = vld [vmem:[%s13692_s6 + $0x368] ss:$16 sps:$4 sm:$0xff]   ;;  %9837 = vmatprep.subr.bf16.mxu0 %v10278_v44 }
 0x45d   : > { %8936 = vmatpush1.bf16.msra.mxu1 %v10196_v31  ;;  %v10258_v31 = vld [vmem:[%s13692_s6 + $0x38c] ss:$16 sps:$4 sm:$0xff]  }
 0x45e   : > { %8937 = vmatprep.subr.bf16.mxu1 %v10201_v21  ;;  %v10256_v21 = vld [vmem:[%s13692_s6 + $0x388] ss:$16 sps:$4 sm:$0xff]  }
 0x461   : > { %8938 = vmatpush1.bf16.msra.mxu1 %v10199_v60  ;;  %v10261_v60 = vld [vmem:[%s13692_s6 + $0x3ac] ss:$16 sps:$4 sm:$0xff]  }
 0x462   : > { %8939 = vmatprep.subr.bf16.mxu1 %v10204_v33  ;;  %v10259_v33 = vld [vmem:[%s13692_s6 + $0x3a8] ss:$16 sps:$4 sm:$0xff]  }
 0x465   : > { %8940 = vmatpush1.bf16.msra.mxu1 %v10202_v23  ;;  %v10264_v23 = vld [vmem:[%s13692_s6 + $0x3cc] ss:$16 sps:$4 sm:$0xff]  }
 0x466   : > { %8941 = vmatprep.subr.bf16.mxu1 %v10207_v19  ;;  %v10262_v19 = vld [vmem:[%s13692_s6 + $0x3c8] ss:$16 sps:$4 sm:$0xff]  }
 0x469   : > { %8942 = vmatpush1.bf16.msra.mxu1 %v10205_v8  ;;  %v10267_v8 = vld [vmem:[%s13692_s6 + $0x3ec] ss:$16 sps:$4 sm:$0xff]  }
 0x46a   : > { %8943 = vmatprep.subr.bf16.mxu1 %v10210_v14  ;;  %v10265_v14 = vld [vmem:[%s13692_s6 + $0x3e8] ss:$16 sps:$4 sm:$0xff]  }
 0x46d   : > { %8944 = vmatpush1.bf16.msra.mxu1 %v10208_v34  ;;  %v10279_v34 = vld [vmem:[#allocation8 + $0x28] sm:$0xff]  }
 0x46e   : > { %8945 = vmatprep.subr.bf16.mxu1 %v10213_v42  ;;  %v10280_v42 = vld [vmem:[#allocation8 + $0x70] sm:$0xff]   ;;  %9838 = vmatpush3.bf16.msra.mxu0 %v10279_v34 }
 0x46f   : > { %9839 = vmatprep.subr.bf16.mxu0 %v10280_v42 }
 0x471   : > { %8946 = vmatpush1.bf16.msra.mxu1 %v10211_v43  ;;  %v10281_v43 = vld [vmem:[#allocation8 + $0x30] sm:$0xff]  }
 0x472   : > { %8947 = vmatprep.subr.bf16.mxu1 %v10216_v36  ;;  %v10282_v36 = vld [vmem:[#allocation8 + $0x78] sm:$0xff]   ;;  %9840 = vmatpush3.bf16.msra.mxu0 %v10281_v43 }
 0x473   : > { %9841 = vmatprep.subr.bf16.mxu0 %v10282_v36  ;;  %v9140_v36 = vld [vmem:[%s13696_s10] sm:$0x1] }
 0x475   : > { %8948 = vmatpush1.bf16.msra.mxu1 %v10214_v32  ;;  %v10284_v32 = vld [vmem:[#allocation8 + $0xc0] sm:$0xff]  }
 0x476   : > { %8949 = vmatprep.subr.bf16.mxu1 %v10219_v18  ;;  %v10285_v18 = vld [vmem:[#allocation8 + $0x80] sm:$0xff]   ;;  %9842 = vmatpush3.bf16.msra.mxu0 %v10283_v54 }
 0x478   : > { %v13514_v57 = vpop.f32.mrb[4].mxu1 }
 0x479   : > { %8950 = vmatpush1.bf16.msra.mxu1 %v10217_v55  ;;  %v13519_v52 = vpop.f32.mrb[5].mxu1  ;;  %v10286_v55 = vld [vmem:[#allocation8 + $0xc8] sm:$0xff]  }
 0x47a   : > { %9001 = vmatprep.subr.bf16.mxu1 %v10222_v22  ;;  %v8194_v61 = vpop.f32.mrb[6].mxu1  ;;  %v10287_v22 = vld [vmem:[#allocation8 + $0x88] sm:$0xff]  }
 0x47b   : > { %v8195_v27 = vpop.f32.mrb[7].mxu1  ;;  %v10291_v61 = vld [vmem:[#allocation8 + $0x98] sm:$0xff]  }
 0x47c   : > { %8952 = vmatmul.mubr.bf16.vlgmr.msra.gmra.mrb[16].mxu1 %v13521_v39  ;;  %v10292_v27 = vld [vmem:[#allocation8 + $0xe0] sm:$0xff]  }
 0x47d   : > { %9002 = vmatpush1.bf16.msra.mxu1 %v10220_v12  ;;  %9033 = vmatprep.mubr.bf16.mxu1 %v13419_v5  ;;  %v10288_v12 = vld [vmem:[#allocation8 + $0xd0] sm:$0xff]  }
 0x47e   : > { %9003 = vmatprep.subr.bf16.mxu1 %v10225_v47  ;;  %v10290_v47 = vld [vmem:[#allocation8 + $0xd8] sm:$0xff]  }
 0x481   : > { %9004 = vmatpush1.bf16.msra.mxu1 %v10223_v9  ;;  %v10293_v9 = vld [vmem:[#allocation8 + $0xa0] sm:$0xff]  }
 0x482   : > { %9005 = vmatprep.subr.bf16.mxu1 %v10228_v2  ;;  %v10294_v2 = vld [vmem:[#allocation8 + $0xe8] sm:$0xff]  }
 0x485   : > { %9006 = vmatpush1.bf16.msra.mxu1 %v10226_v58 }
 0x486   : > { %9007 = vmatprep.subr.bf16.mxu1 %v10231_v37 }
 0x489   : > { %9008 = vmatpush1.bf16.msra.mxu1 %v10229_v4 }
 0x48a   : > { %9009 = vmatprep.subr.bf16.mxu1 %v10234_v48 }
 0x48d   : > { %9010 = vmatpush1.bf16.msra.mxu1 %v10232_v51 }
 0x48e   : > { %9011 = vmatprep.subr.bf16.mxu1 %v10237_v0 }
 0x491   : > { %9012 = vmatpush1.bf16.msra.mxu1 %v10235_v25 }
 0x492   : > { %9013 = vmatprep.subr.bf16.mxu1 %v10240_v11 }
 0x495   : > { %9014 = vmatpush1.bf16.msra.mxu1 %v10238_v6 }
 0x496   : > { %9015 = vmatprep.subr.bf16.mxu1 %v10243_v40 }
 0x498   : > { %v13570_v59 = vpop.f32.mrb[8].mxu1 }
 0x499   : > { %9016 = vmatpush1.bf16.msra.mxu1 %v10241_v7  ;;  %v13575_v5 = vpop.f32.mrb[9].mxu1  ;;  %v10296_v7 = vld [vmem:[#allocation8 + $0xf0] sm:$0xff]  }
 0x49a   : > { %9017 = vmatprep.subr.bf16.mxu1 %v10246_v38  ;;  %v8235_v46 = vpop.f32.mrb[10].mxu1  ;;  %v10298_v38 = vld [vmem:[#allocation8 + $0xf8] sm:$0xff]  }
 0x49b   : > { %v8236_v24 = vpop.f32.mrb[11].mxu1 }
 0x49d   : > { %9018 = vmatpush1.bf16.msra.mxu1 %v10244_v49 }
 0x49e   : > { %9019 = vmatprep.subr.bf16.mxu1 %v10249_v1 }
 0x4a1   : > { %9020 = vmatpush1.bf16.msra.mxu1 %v10247_v45 }
 0x4a2   : > { %9021 = vmatprep.subr.bf16.mxu1 %v10252_v35 }
 0x4a5   : > { %9022 = vmatpush1.bf16.msra.mxu1 %v10250_v15 }
 0x4a6   : > { %9023 = vmatprep.subr.bf16.mxu1 %v10255_v56 }
 0x4a9   : > { %9024 = vmatpush1.bf16.msra.mxu1 %v10253_v26 }
 0x4aa   : > { %9025 = vmatprep.subr.bf16.mxu1 %v10258_v31 }
 0x4ad   : > { %9026 = vmatpush1.bf16.msra.mxu1 %v10256_v21 }
 0x4ae   : > { %9027 = vmatprep.subr.bf16.mxu1 %v10261_v60 }
 0x4b1   : > { %9028 = vmatpush1.bf16.msra.mxu1 %v10259_v33 }
 0x4b2   : > { %9029 = vmatprep.subr.bf16.mxu1 %v10264_v23 }
 0x4b5   : > { %9030 = vmatpush1.bf16.msra.mxu1 %v10262_v19 }
 0x4b6   : > { %9031 = vmatprep.subr.bf16.mxu1 %v10267_v8 }
 0x4b9   : > { %9032 = vmatpush1.bf16.msra.mxu1 %v10265_v14 }
 0x4ba   : > { %9849 = vmatprep.subr.bf16.mxu1 %v10284_v32 }
 0x4bc   : > { %9034 = vmatmul.mubr.bf16.vlgmr.msra.gmra.mrb[20].mxu1 %v13521_v39  ;;  %v10289_v39 = vld [vmem:[#allocation8 + $0x90] sm:$0xff]  }
 0x4bd   : > { %9850 = vmatpush3.bf16.msra.mxu1 %v10285_v18 }
 0x4be   : > { %9851 = vmatprep.subr.bf16.mxu1 %v10286_v55 }
 0x4c1   : > { %9852 = vmatpush3.bf16.msra.mxu1 %v10287_v22 }
 0x4c2   : > { %9853 = vmatprep.subr.bf16.mxu1 %v10288_v12 }
 0x4c5   : > { %9854 = vmatpush3.bf16.msra.mxu1 %v10289_v39 }
 0x4c6   : > { %9855 = vmatprep.subr.bf16.mxu1 %v10290_v47 }
 0x4c9   : > { %9856 = vmatpush3.bf16.msra.mxu1 %v10291_v61 }
 0x4ca   : > { %9857 = vmatprep.subr.bf16.mxu1 %v10292_v27 }
 0x4cd   : > { %9858 = vmatpush3.bf16.msra.mxu1 %v10293_v9 }
 0x4ce   : > { %9859 = vmatprep.subr.bf16.mxu1 %v10294_v2 }
 0x4d1   : > { %9860 = vmatpush3.bf16.msra.mxu1 %v10295_v13 }
 0x4d2   : > { %9861 = vmatprep.subr.bf16.mxu1 %v10296_v7 }
 0x4d5   : > { %9862 = vmatpush3.bf16.msra.mxu1 %v10297_v20 }
 0x4d6   : > { %9863 = vmatprep.subr.bf16.mxu1 %v10298_v38 }
 0x50f   : > { %v8912_v58 = vpop.f32.mrb[12].mxu1  ;;  %v8994_v37 = vpop.f32.mrb[128].mxu0 }
 0x510   : > { %v8913_v4 = vadd.f32 %v8912_v58, %v13514_v57  ;;  %v8995_v48 = vadd.f32 %v8994_v37, %v13570_v59  ;;  %v8914_v51 = vpop.f32.mrb[13].mxu1  ;;  %v8996_v0 = vpop.f32.mrb[129].mxu0  ;;  %v10299_v57 = vld [vmem:[#allocation8 + $0xb8] sm:$0xff]  }
 0x511   : > { %v8915_v25 = vadd.f32 %v8914_v51, %v13519_v52  ;;  %v8997_v11 = vadd.f32 %v8996_v0, %v13575_v5  ;;  %v8916_v6 = vpop.f32.mrb[14].mxu1  ;;  %v8998_v40 = vpop.f32.mrb[130].mxu0  ;;  %9864 = vmatpush3.bf16.msra.mxu1 %v10299_v57  ;;  %v9042_v52 = vld [vmem:[%s13694_s8] sm:$0xf] }
 0x512   : > { %v8917_v29 = vpop.f32.mrb[15].mxu1  ;;  %v8999_v62 = vpop.f32.mrb[131].mxu0  ;;  %v9047_v28 = vrot.slane %v9042_v52, %v11225_v50  ;;  %v9051_v49 = vrot.slane %v9042_v52, %v11229_v16  ;;  %v9055_v3 = vrot.slane %v9042_v52, %v11232_v17  ;;  %v9059_v50 = vrot.slane %v9042_v52, %v11235_v10 }
 0x54f   : > { %v8953_v59 = vpop.f32.mrb[16].mxu1 }
 0x550   : > { %v8954_v5 = vadd.f32 %v8953_v59, %v8913_v4  ;;  %v8955_v63 = vpop.f32.mrb[17].mxu1 }
 0x551   : > { %v8956_v1 = vadd.f32 %v8955_v63, %v8915_v25  ;;  %v8957_v46 = vpop.f32.mrb[18].mxu1 }
 0x552   : > { %v9064_v53 = vadd.f32 %v9047_v28, %v8954_v5  ;;  %v8958_v24 = vpop.f32.mrb[19].mxu1 }
 0x553   : > { %v9065_v45 = vadd.f32 %v9051_v49, %v8956_v1 }
 0x554   : > { %v9068_v30 = vmax.f32 %v9064_v53, 0.0 }
 0x555   : > { %v9069_v35 = vmax.f32 %v9065_v45, 0.0 }
 0x556   : > { %v9072_v15 = vpack.c.bf16 %v9068_v30, %v9068_v30 }
 0x557   : > { %v9073_v41 = vpack.c.bf16 %v9069_v35, %v9069_v35 }
 0x559   : > { %9365 = vmatprep.mubr.bf16.mxu0 %v9073_v41 }
 0x55a   : > { %9366 = vmatmul.mubr.bf16.vlgmr.msra.gmra.mrb[132].mxu0 %v9072_v15 }
 0x58f   : > { %v9035_v56 = vpop.f32.mrb[20].mxu1 }
 0x590   : > { %v9036_v44 = vadd.f32 %v9035_v56, %v8995_v48  ;;  %v9037_v16 = vpop.f32.mrb[21].mxu1 }
 0x591   : > { %v9038_v26 = vadd.f32 %v9037_v16, %v8997_v11  ;;  %v9039_v31 = vpop.f32.mrb[22].mxu1 }
 0x592   : > { %v9066_v21 = vadd.f32 %v9055_v3, %v9036_v44  ;;  %v9040_v60 = vpop.f32.mrb[23].mxu1 }
 0x593   : > { %v9067_v33 = vadd.f32 %v9059_v50, %v9038_v26 }
 0x594   : > { %v9070_v23 = vmax.f32 %v9066_v21, 0.0 }
 0x595   : > { %v9071_v19 = vmax.f32 %v9067_v33, 0.0 }
 0x596   : > { %v9074_v14 = vpack.c.bf16 %v9070_v23, %v9070_v23 }
 0x597   : > { %v9075_v8 = vpack.c.bf16 %v9071_v19, %v9071_v19 }
 0x599   : > { %9405 = vmatprep.mubr.bf16.mxu1 %v9075_v8 }
 0x59a   : > { %9406 = vmatmul.mubr.bf16.vlgmr.msra.gmra.mrb[24].mxu1 %v9074_v14 }
 0x62d   : > { %v9843_v34 = vpop.f32.mrb[132].mxu0 }
 0x62e   : > { %v9844_v17 = vpop.f32.mrb[133].mxu0 }
 0x62f   : > { %v9845_v42 = vadd.f32 %v9844_v17, %v9843_v34  ;;  %v9846_v43 = vpop.f32.mrb[134].mxu0 }
 0x630   : > { %v9847_v10 = vpop.f32.mrb[135].mxu0 }
 0x631   : > { %v9368_v55 = vadd.f32 %v9845_v42, %v9140_v36 }
 0x66d   : > { %v9865_v32 = vpop.f32.mrb[24].mxu1 }
 0x66e   : > { %v9866_v18 = vpop.f32.mrb[25].mxu1 }
 0x66f   : > { %v9867_v54 = vadd.f32 %v9866_v18, %v9865_v32  ;;  %v9868_v22 = vpop.f32.mrb[26].mxu1 }
 0x670   : > { %v9869_v12 = vpop.f32.mrb[27].mxu1 }
 0x671   : > { %v9408_v39 = vadd.f32 %v9867_v54, %v9368_v55 }
 0x673   : > { %9413 = vst [vmem:[%s456_s21] sm:$0x1] %v9408_v39 }
 0x674   : > { %10399 = shalt.err (!%p10396_p6)
}
 0x675   : > { %s10400_s11 = scalar_lea.hbm %s13639_s23, 16  ;;  %s10404_s13 = scalar_lea.hbm %s13834_s28, 32 }
 0x676   : > { %p10401_p7 = scmp.ne.s32.totalorder %s13639_s23, %s10400_s11  ;;  %p10405_p4 = scmp.lt.u32.totalorder %s13639_s23, %s13834_s28 }
 0x677   : > { %p10406_p8 = scmp.lt.u32.totalorder %s10404_s13, %s10400_s11  ;;  %p10408_p13 = scmp.lt.u32.totalorder %s10400_s11, %s13639_s23 }
 0x678   : > { %p10402_p9 = pnand %p10401_p7, %p13835_p10 }
 0x679   : > { %p10407_p1 = por %p10406_p8, %p10405_p4 }
 0x67a   : > { %p10403_p12 = pneg %p10402_p9 }
 0x67b   : > { %p10409_p11 = por %p10408_p13, %p10407_p1 }
 0x67d   : > { %p10410_p0 = pnand %p10409_p11, %p10403_p12 }
 0x67f   : > { %10413 = shalt.err (!%p10410_p0)
}
 0x680   : > { %9903 = dma.vmem_to_hbm [thread:$0]  (%p13835_p10), %s13641_s30, 16, %s13639_s23, %s9415_s7  }
 0x681 PF: > { %s13836_s17 = sld [smem:[#allocation16_spill]]  ;;  %s13837_s22 = sld [smem:[#allocation13_spill]] }
 0x682   : > { %s13838_s21 = sld [smem:[#allocation18_spill]] }
 0x687   : > { %p9925_p2 = scmp.ge.s32.totalorder %s13836_s17, 2  ;;  %s9439_s29 = sand.u32 1, %s13837_s22  }
 0x688   : > { %p13839_p3 = scmp.ne.s32.totalorder %s13838_s21, 0  ;;  %s9440_s24 = scalar_lea.sflag [#allocation5], %s9439_s29 }
 0x68a   : > { %p9916_p5 = pnand %p9925_p2, %p13839_p3 }
 0x68c   : > { %10447 = dma.done.wait (!%p9916_p5), %s9440_s24, 16  }
 0x68d   : > { %10449 = vsyncadd (!%p9916_p5), %s9440_s24, 4294967280  ;;  %s26_s22 = sadd.s32 1, %s13836_s17   ;;  %s13840_s20 = sld [smem:[#allocation14_spill]] }
 0x68e   : > { %p23_p6 = scmp.ge.s32.totalorder %s26_s22, 4   ;;  %s13841_s19 = sld [smem:[#allocation19_spill]] }
 0x68f   : > { %s13842_s27 = sld [smem:[#allocation15_spill]]  ;;  %s13843_s21 = sld [smem:[#allocation17_spill]] }
 0x690   : > { %s13844_s17 = smov %s10456_s18  ;;  %25 = sbr.rel (!%p23_p6) target bundleno = 9 (0x9), region = 123 }
 0x693   : > { %s13845_s18 = smov %s13840_s20 }
 0x695   : > { %s13846_s20 = smov %s13842_s27 }
 0x697   :  { %9444 = vsyncpa [#allocation4], 1 }
 0x698   :  { %9446 = vsyncpa [#allocation4 + $0x1], 1 }
 0x699   :  { %9447 = vsyncpa [#allocation7], 1 }
 0x69a   :  { %9448 = vsyncpa [#allocation5], 1 }
 0x69b   :  { %9450 = vsyncpa [#allocation5 + $0x1], 1 }

</bundles_post_ra>
